<compile_context>
chip_gen: v7x
topology: tpu7x:2x2x1
jax: 0.10.0
libtpu: 0.0.40
codegen_flags: <defaults>
</compile_context>

<pallas_src>
import jax
import jax.numpy as jnp
from jax.experimental import pallas as pl
from jax.experimental.pallas import tpu as pltpu

INPUT_DIM = 2254       # fixed by the module (fc1 in / fc4 out)
INPUT_PAD = 2304       # 18 * 128: lane-dense padding for the encode contraction
HIDDEN_DIM = 256       # fixed by the module
COMPRESS_DIM = 128     # args.compress_dim (chosen small, MXU-friendly)


def _round_up(n, m):
    return ((n + m - 1) // m) * m


def _pick_batch_tile(batch):
    """Rows per grid step.

    - equals the full batch when batch <= 16 (block dim == array dim is legal),
    - otherwise a multiple of 16 (bf16 sublane tile) chosen so the grid has at
      least 2 steps (lets the "parallel" axis shard over v7x's two TensorCores),
    - capped at 256 rows (matches the v6e/v7x 256x256 MXU tile; ~10 MB VMEM).
    """
    if batch <= 16:
        return batch
    return min(256, _round_up(pl.cdiv(batch, 2), 16))


def vae_kernel(x_ref, eps_ref,
               w1_ref, b1_ref, w2_ref, b2_ref,
               w3_ref, b3_ref, w4_ref, b4_ref,
               recon_ref, mu_ref, logvar_ref):
    # encode: h1 = relu(x @ W1 + b1)   (bf16 MXU inputs, f32 accumulate)
    x = x_ref[...]                                          # (TB, INPUT_PAD) bf16
    h1 = jnp.dot(x, w1_ref[...], preferred_element_type=jnp.float32) + b1_ref[...]
    h1 = jnp.maximum(h1, 0.0)

    # fused fc21|fc22: one 256-wide matmul, mu/logvar are lane-aligned slices
    h2 = jnp.dot(h1.astype(jnp.bfloat16), w2_ref[...],
                 preferred_element_type=jnp.float32) + b2_ref[...]
    mu = h2[:, :COMPRESS_DIM]
    logvar = h2[:, COMPRESS_DIM:]

    # reparameterize: z = mu + eps * exp(0.5 * logvar)   (f32 elementwise)
    z = mu + eps_ref[...] * jnp.exp(0.5 * logvar)

    # decode: sigmoid(relu(z @ W3 + b3) @ W4 + b4)
    h3 = jnp.dot(z.astype(jnp.bfloat16), w3_ref[...],
                 preferred_element_type=jnp.float32) + b3_ref[...]
    h3 = jnp.maximum(h3, 0.0)
    logits = jnp.dot(h3.astype(jnp.bfloat16), w4_ref[...],
                     preferred_element_type=jnp.float32) + b4_ref[...]

    # sigmoid(x) == 0.5 * tanh(0.5 * x) + 0.5  -> one EUP op per vreg.
    # f32 math, stored as bf16 (halves the dominant recon HBM write).
    recon_ref[...] = (0.5 * jnp.tanh(0.5 * logits) + 0.5).astype(recon_ref.dtype)
    mu_ref[...] = mu
    logvar_ref[...] = logvar


@jax.jit
def vae_forward(x, eps, params):
    """x: (..., 2254) float32, eps: (B, COMPRESS_DIM) float32 (randn_like draw).

    Returns (recon bf16 (B, 2254), mu f32 (B, 128), logvar f32 (B, 128)).
    """
    x = x.reshape(-1, INPUT_DIM)
    B = x.shape[0]

    TB = _pick_batch_tile(B)
    grid = (pl.cdiv(B, TB),)           # partial final batch block is fine:
                                       # every row is independent, OOB rows are
                                       # never written back.

    # --- x: single fused pad + bf16 cast (halves the dominant HBM read) ----
    x_p = jnp.pad(x.astype(jnp.bfloat16), ((0, 0), (0, INPUT_PAD - INPUT_DIM)))
    eps = eps.astype(jnp.float32)

    # --- weights: bf16, fc21|fc22 fused; only W1 needs feature padding ------
    w1 = jnp.pad(params["w1"].astype(jnp.bfloat16),
                 ((0, INPUT_PAD - INPUT_DIM), (0, 0)))          # (2304, 256)
    b1 = params["b1"].astype(jnp.float32)                       # (1, 256)

    w2 = jnp.concatenate([params["w21"], params["w22"]], axis=1).astype(jnp.bfloat16)
    b2 = jnp.concatenate([params["b21"], params["b22"]], axis=1).astype(jnp.float32)

    w3 = params["w3"].astype(jnp.bfloat16)                      # (128, 256)
    b3 = params["b3"].astype(jnp.float32)                       # (1, 256)

    w4 = params["w4"].astype(jnp.bfloat16)                      # (256, 2254)
    b4 = params["b4"].astype(jnp.float32)                       # (1, 2254)

    # --- BlockSpecs: batch-tiled activations, grid-resident weights ---------
    def act_spec(cols):
        return pl.BlockSpec((TB, cols), lambda i: (i, 0))

    def const_spec(shape):
        return pl.BlockSpec(shape, lambda i: (0, 0))

    in_specs = [
        act_spec(INPUT_PAD),                          # x (bf16)
        act_spec(COMPRESS_DIM),                       # eps (f32)
        const_spec((INPUT_PAD, HIDDEN_DIM)),          # w1
        const_spec((1, HIDDEN_DIM)),                  # b1
        const_spec((HIDDEN_DIM, 2 * COMPRESS_DIM)),   # w2 (fused)
        const_spec((1, 2 * COMPRESS_DIM)),            # b2 (fused)
        const_spec((COMPRESS_DIM, HIDDEN_DIM)),       # w3
        const_spec((1, HIDDEN_DIM)),                  # b3
        const_spec((HIDDEN_DIM, INPUT_DIM)),          # w4 (logical 2254 cols)
        const_spec((1, INPUT_DIM)),                   # b4
    ]
    out_specs = (
        act_spec(INPUT_DIM),                          # recon (bf16, logical 2254)
        act_spec(COMPRESS_DIM),                       # mu
        act_spec(COMPRESS_DIM),                       # logvar
    )
    out_shapes = (
        jax.ShapeDtypeStruct((B, INPUT_DIM), jnp.bfloat16),
        jax.ShapeDtypeStruct((B, COMPRESS_DIM), jnp.float32),
        jax.ShapeDtypeStruct((B, COMPRESS_DIM), jnp.float32),
    )

    # --- cost estimate (bf16 x/recon, bf16 weights, tanh+exp counted) -------
    matmul_flops = 2 * B * (INPUT_PAD * HIDDEN_DIM
                            + HIDDEN_DIM * 2 * COMPRESS_DIM
                            + COMPRESS_DIM * HIDDEN_DIM
                            + HIDDEN_DIM * INPUT_DIM)
    weight_bytes = (2 * (INPUT_PAD * HIDDEN_DIM + HIDDEN_DIM * 2 * COMPRESS_DIM
                         + COMPRESS_DIM * HIDDEN_DIM + HIDDEN_DIM * INPUT_DIM)
                    + 4 * (HIDDEN_DIM + 2 * COMPRESS_DIM + HIDDEN_DIM + INPUT_DIM))
    act_bytes = (2 * B * INPUT_PAD          # x read (bf16)
                 + 4 * B * COMPRESS_DIM     # eps read (f32)
                 + 2 * B * INPUT_DIM        # recon write (bf16)
                 + 8 * B * COMPRESS_DIM)    # mu + logvar writes (f32)
    cost = pl.CostEstimate(
        flops=matmul_flops,
        transcendentals=B * (COMPRESS_DIM + INPUT_DIM),  # exp (reparam) + tanh (sigmoid)
        bytes_accessed=weight_bytes + act_bytes,
    )

    recon, mu, logvar = pl.pallas_call(
        vae_kernel,
        out_shape=out_shapes,
        grid=grid,
        in_specs=in_specs,
        out_specs=out_specs,
        compiler_params=pltpu.CompilerParams(
            dimension_semantics=("parallel",),
            vmem_limit_bytes=48 << 20,
        ),
        cost_estimate=cost,
    )(x_p, eps, w1, b1, w2, b2, w3, b3, w4, b4)

    return recon, mu, logvar


def init_params(key):
    """Deterministic synthetic parameters (nn.Linear-shaped, stored as (in, out))."""
    ks = jax.random.split(key, 10)

    def lin(kw, kb, fan_in, fan_out):
        bound = 1.0 / jnp.sqrt(fan_in)
        w = jax.random.uniform(kw, (fan_in, fan_out), jnp.float32, -bound, bound)
        b = jax.random.uniform(kb, (1, fan_out), jnp.float32, -bound, bound)
        return w, b

    w1, b1 = lin(ks[0], ks[1], INPUT_DIM, HIDDEN_DIM)
    w21, b21 = lin(ks[2], ks[3], HIDDEN_DIM, COMPRESS_DIM)
    w22, b22 = lin(ks[4], ks[5], HIDDEN_DIM, COMPRESS_DIM)
    w3, b3 = lin(ks[6], ks[7], COMPRESS_DIM, HIDDEN_DIM)
    w4, b4 = lin(ks[8], ks[9], HIDDEN_DIM, INPUT_DIM)
    return dict(w1=w1, b1=b1, w21=w21, b21=b21, w22=w22, b22=b22,
                w3=w3, b3=b3, w4=w4, b4=b4)


def reference_forward(x, eps, p):
    """Pure-JAX reference mirroring the PyTorch forward with the same
    bf16-matmul-input / f32-accumulate numerics as the kernel (recon kept f32)."""
    bf16 = jnp.bfloat16
    f32 = jnp.float32

    def mm(a, w):
        return jnp.dot(a.astype(bf16), w.astype(bf16), preferred_element_type=f32)

    h1 = jnp.maximum(mm(x, p["w1"]) + p["b1"], 0.0)
    mu = mm(h1, p["w21"]) + p["b21"]
    logvar = mm(h1, p["w22"]) + p["b22"]
    z = mu + eps * jnp.exp(0.5 * logvar)
    h3 = jnp.maximum(mm(z, p["w3"]) + p["b3"], 0.0)
    recon = jax.nn.sigmoid(mm(h3, p["w4"]) + p["b4"])
    return recon, mu, logvar


if __name__ == "__main__":
    key = jax.random.PRNGKey(0)
    k_params, k_x, k_eps = jax.random.split(key, 3)

    B = 8
    params = init_params(k_params)
    x = jax.random.uniform(k_x, (B, INPUT_DIM), jnp.float32)        # binary-ish EHR codes
    eps = jax.random.normal(k_eps, (B, COMPRESS_DIM), jnp.float32)  # torch.randn_like(std)

    recon, mu, logvar = vae_forward(x, eps, params)
    jax.block_until_ready((recon, mu, logvar))

    # correctness check against pure-JAX reference (same bf16-matmul numerics;
    # recon tolerance covers its bf16 storage quantization, ~half an ULP near 1.0)
    r_ref, mu_ref, lv_ref = reference_forward(x, eps, params)
    assert recon.shape == (B, INPUT_DIM) and recon.dtype == jnp.bfloat16
    assert mu.shape == (B, COMPRESS_DIM) and logvar.shape == (B, COMPRESS_DIM)
    assert jnp.allclose(recon.astype(jnp.float32), r_ref, atol=4e-3, rtol=4e-3)
    assert jnp.allclose(mu, mu_ref, atol=2e-3, rtol=2e-3)
    assert jnp.allclose(logvar, lv_ref, atol=2e-3, rtol=2e-3)

    print("KERNEL_OK")
</pallas_src>

<mosaic_0001>
module attributes {stable_mosaic.version = 11 : i64} {
  func.func @vae_kernel(%arg0: i32, %arg1: memref<8x2304xbf16, #tpu.memory_space<vmem>>, %arg2: memref<8x128xf32, #tpu.memory_space<vmem>>, %arg3: memref<2304x256xbf16, #tpu.memory_space<vmem>>, %arg4: memref<1x256xf32, #tpu.memory_space<vmem>>, %arg5: memref<256x256xbf16, #tpu.memory_space<vmem>>, %arg6: memref<1x256xf32, #tpu.memory_space<vmem>>, %arg7: memref<128x256xbf16, #tpu.memory_space<vmem>>, %arg8: memref<1x256xf32, #tpu.memory_space<vmem>>, %arg9: memref<256x2254xbf16, #tpu.memory_space<vmem>>, %arg10: memref<1x2254xf32, #tpu.memory_space<vmem>>, %arg11: memref<8x2254xbf16, #tpu.memory_space<vmem>>, %arg12: memref<8x128xf32, #tpu.memory_space<vmem>>, %arg13: memref<8x128xf32, #tpu.memory_space<vmem>>) attributes {dimension_semantics = [#tpu.dimension_semantics<parallel>], iteration_bounds = array<i64: 1>, scalar_prefetch = 0 : i64, scratch_operands = 0 : i64, tpu.core_type = #tpu.core_type<tc>, window_params = [{transform_indices = @transform_0, window_bounds = array<i64: 8, 2304>}, {transform_indices = @transform_1, window_bounds = array<i64: 8, 128>}, {pipeline_mode = #tpu.pipeline_mode<synchronous>, transform_indices = @transform_2, window_bounds = array<i64: 2304, 256>}, {pipeline_mode = #tpu.pipeline_mode<synchronous>, transform_indices = @transform_3, window_bounds = array<i64: 1, 256>}, {pipeline_mode = #tpu.pipeline_mode<synchronous>, transform_indices = @transform_4, window_bounds = array<i64: 256, 256>}, {pipeline_mode = #tpu.pipeline_mode<synchronous>, transform_indices = @transform_5, window_bounds = array<i64: 1, 256>}, {pipeline_mode = #tpu.pipeline_mode<synchronous>, transform_indices = @transform_6, window_bounds = array<i64: 128, 256>}, {pipeline_mode = #tpu.pipeline_mode<synchronous>, transform_indices = @transform_7, window_bounds = array<i64: 1, 256>}, {pipeline_mode = #tpu.pipeline_mode<synchronous>, transform_indices = @transform_8, window_bounds = array<i64: 256, 2254>}, {pipeline_mode = #tpu.pipeline_mode<synchronous>, transform_indices = @transform_9, window_bounds = array<i64: 1, 2254>}, {transform_indices = @transform_10, window_bounds = array<i64: 8, 2254>}, {transform_indices = @transform_11, window_bounds = array<i64: 8, 128>}, {transform_indices = @transform_12, window_bounds = array<i64: 8, 128>}]} {
    %c0 = arith.constant 0 : index
    %c0_0 = arith.constant 0 : index
    %0 = vector.load %arg1[%c0, %c0_0] : memref<8x2304xbf16, #tpu.memory_space<vmem>>, vector<8x2304xbf16>
    %c0_1 = arith.constant 0 : index
    %c0_2 = arith.constant 0 : index
    %1 = vector.load %arg3[%c0_1, %c0_2] : memref<2304x256xbf16, #tpu.memory_space<vmem>>, vector<2304x256xbf16>
    %cst = arith.constant dense<0.000000e+00> : vector<8x256xf32>
    %2 = tpu.matmul %0, %1, %cst {dimension_numbers = #tpu.dot_dimension_numbers<[1], [0], [0], [1], [0, 0, 1, 1], [], []>} : vector<8x2304xbf16>, vector<2304x256xbf16>, vector<8x256xf32> -> vector<8x256xf32>
    %c0_3 = arith.constant 0 : index
    %c0_4 = arith.constant 0 : index
    %3 = vector.load %arg4[%c0_3, %c0_4] : memref<1x256xf32, #tpu.memory_space<vmem>>, vector<1x256xf32>
    %4 = vector.broadcast %3 : vector<1x256xf32> to vector<8x256xf32>
    %5 = arith.addf %2, %4 : vector<8x256xf32>
    %cst_5 = arith.constant 0.000000e+00 : f32
    %6 = vector.broadcast %cst_5 : f32 to vector<8x256xf32>
    %7 = arith.maximumf %5, %6 : vector<8x256xf32>
    %8 = arith.truncf %7 : vector<8x256xf32> to vector<8x256xbf16>
    %c0_6 = arith.constant 0 : index
    %c0_7 = arith.constant 0 : index
    %9 = vector.load %arg5[%c0_6, %c0_7] : memref<256x256xbf16, #tpu.memory_space<vmem>>, vector<256x256xbf16>
    %cst_8 = arith.constant dense<0.000000e+00> : vector<8x256xf32>
    %10 = tpu.matmul %8, %9, %cst_8 {dimension_numbers = #tpu.dot_dimension_numbers<[1], [0], [0], [1], [0, 0, 1, 1], [], []>} : vector<8x256xbf16>, vector<256x256xbf16>, vector<8x256xf32> -> vector<8x256xf32>
    %c0_9 = arith.constant 0 : index
    %c0_10 = arith.constant 0 : index
    %11 = vector.load %arg6[%c0_9, %c0_10] : memref<1x256xf32, #tpu.memory_space<vmem>>, vector<1x256xf32>
    %12 = vector.broadcast %11 : vector<1x256xf32> to vector<8x256xf32>
    %13 = arith.addf %10, %12 : vector<8x256xf32>
    %14 = vector.extract_strided_slice %13 {offsets = [0, 0], sizes = [8, 128], strides = [1, 1]} : vector<8x256xf32> to vector<8x128xf32>
    %15 = vector.extract_strided_slice %13 {offsets = [0, 128], sizes = [8, 128], strides = [1, 1]} : vector<8x256xf32> to vector<8x128xf32>
    %c0_11 = arith.constant 0 : index
    %c0_12 = arith.constant 0 : index
    %16 = vector.load %arg2[%c0_11, %c0_12] : memref<8x128xf32, #tpu.memory_space<vmem>>, vector<8x128xf32>
    %cst_13 = arith.constant 5.000000e-01 : f32
    %17 = vector.broadcast %cst_13 : f32 to vector<8x128xf32>
    %18 = arith.mulf %17, %15 : vector<8x128xf32>
    %19 = math.exp %18 : vector<8x128xf32>
    %20 = arith.mulf %16, %19 : vector<8x128xf32>
    %21 = arith.addf %14, %20 : vector<8x128xf32>
    %22 = arith.truncf %21 : vector<8x128xf32> to vector<8x128xbf16>
    %c0_14 = arith.constant 0 : index
    %c0_15 = arith.constant 0 : index
    %23 = vector.load %arg7[%c0_14, %c0_15] : memref<128x256xbf16, #tpu.memory_space<vmem>>, vector<128x256xbf16>
    %cst_16 = arith.constant dense<0.000000e+00> : vector<8x256xf32>
    %24 = tpu.matmul %22, %23, %cst_16 {dimension_numbers = #tpu.dot_dimension_numbers<[1], [0], [0], [1], [0, 0, 1, 1], [], []>} : vector<8x128xbf16>, vector<128x256xbf16>, vector<8x256xf32> -> vector<8x256xf32>
    %c0_17 = arith.constant 0 : index
    %c0_18 = arith.constant 0 : index
    %25 = vector.load %arg8[%c0_17, %c0_18] : memref<1x256xf32, #tpu.memory_space<vmem>>, vector<1x256xf32>
    %26 = vector.broadcast %25 : vector<1x256xf32> to vector<8x256xf32>
    %27 = arith.addf %24, %26 : vector<8x256xf32>
    %cst_19 = arith.constant 0.000000e+00 : f32
    %28 = vector.broadcast %cst_19 : f32 to vector<8x256xf32>
    %29 = arith.maximumf %27, %28 : vector<8x256xf32>
    %30 = arith.truncf %29 : vector<8x256xf32> to vector<8x256xbf16>
    %c0_20 = arith.constant 0 : index
    %c0_21 = arith.constant 0 : index
    %31 = vector.load %arg9[%c0_20, %c0_21] : memref<256x2254xbf16, #tpu.memory_space<vmem>>, vector<256x2254xbf16>
    %cst_22 = arith.constant dense<0.000000e+00> : vector<8x2254xf32>
    %32 = tpu.matmul %30, %31, %cst_22 {dimension_numbers = #tpu.dot_dimension_numbers<[1], [0], [0], [1], [0, 0, 1, 1], [], []>} : vector<8x256xbf16>, vector<256x2254xbf16>, vector<8x2254xf32> -> vector<8x2254xf32>
    %c0_23 = arith.constant 0 : index
    %c0_24 = arith.constant 0 : index
    %33 = vector.load %arg10[%c0_23, %c0_24] : memref<1x2254xf32, #tpu.memory_space<vmem>>, vector<1x2254xf32>
    %34 = vector.broadcast %33 : vector<1x2254xf32> to vector<8x2254xf32>
    %35 = arith.addf %32, %34 : vector<8x2254xf32>
    %cst_25 = arith.constant 5.000000e-01 : f32
    %36 = vector.broadcast %cst_25 : f32 to vector<8x2254xf32>
    %37 = arith.mulf %36, %35 : vector<8x2254xf32>
    %38 = math.tanh %37 : vector<8x2254xf32>
    %cst_26 = arith.constant 5.000000e-01 : f32
    %39 = vector.broadcast %cst_26 : f32 to vector<8x2254xf32>
    %40 = arith.mulf %39, %38 : vector<8x2254xf32>
    %cst_27 = arith.constant 5.000000e-01 : f32
    %41 = vector.broadcast %cst_27 : f32 to vector<8x2254xf32>
    %42 = arith.addf %40, %41 : vector<8x2254xf32>
    %43 = arith.truncf %42 : vector<8x2254xf32> to vector<8x2254xbf16>
    %c0_28 = arith.constant 0 : index
    %c0_29 = arith.constant 0 : index
    %44 = vector.load %arg11[%c0_28, %c0_29] : memref<8x2254xbf16, #tpu.memory_space<vmem>>, vector<8x2254xbf16>
    tpu.vector_store %arg11[%c0_28, %c0_29], %43 {strides = array<i32>} : memref<8x2254xbf16, #tpu.memory_space<vmem>>, vector<8x2254xbf16>,
    %c0_30 = arith.constant 0 : index
    %c0_31 = arith.constant 0 : index
    %45 = vector.load %arg12[%c0_30, %c0_31] : memref<8x128xf32, #tpu.memory_space<vmem>>, vector<8x128xf32>
    tpu.vector_store %arg12[%c0_30, %c0_31], %14 {strides = array<i32>} : memref<8x128xf32, #tpu.memory_space<vmem>>, vector<8x128xf32>,
    %c0_32 = arith.constant 0 : index
    %c0_33 = arith.constant 0 : index
    %46 = vector.load %arg13[%c0_32, %c0_33] : memref<8x128xf32, #tpu.memory_space<vmem>>, vector<8x128xf32>
    tpu.vector_store %arg13[%c0_32, %c0_33], %15 {strides = array<i32>} : memref<8x128xf32, #tpu.memory_space<vmem>>, vector<8x128xf32>,
    return
  }
  func.func @transform_0(%arg0: i32) -> (i32, i32) {
    %c0_i32 = arith.constant 0 : i32
    %c0_i32_0 = arith.constant 0 : i32
    return %arg0, %c0_i32 : i32, i32
  }
  func.func @transform_1(%arg0: i32) -> (i32, i32) {
    %c0_i32 = arith.constant 0 : i32
    %c0_i32_0 = arith.constant 0 : i32
    return %arg0, %c0_i32 : i32, i32
  }
  func.func @transform_2(%arg0: i32) -> (i32, i32) {
    %c0_i32 = arith.constant 0 : i32
    %c0_i32_0 = arith.constant 0 : i32
    %c0_i32_1 = arith.constant 0 : i32
    return %c0_i32, %c0_i32_0 : i32, i32
  }
  func.func @transform_3(%arg0: i32) -> (i32, i32) {
    %c0_i32 = arith.constant 0 : i32
    %c0_i32_0 = arith.constant 0 : i32
    %c0_i32_1 = arith.constant 0 : i32
    return %c0_i32, %c0_i32_0 : i32, i32
  }
  func.func @transform_4(%arg0: i32) -> (i32, i32) {
    %c0_i32 = arith.constant 0 : i32
    %c0_i32_0 = arith.constant 0 : i32
    %c0_i32_1 = arith.constant 0 : i32
    return %c0_i32, %c0_i32_0 : i32, i32
  }
  func.func @transform_5(%arg0: i32) -> (i32, i32) {
    %c0_i32 = arith.constant 0 : i32
    %c0_i32_0 = arith.constant 0 : i32
    %c0_i32_1 = arith.constant 0 : i32
    return %c0_i32, %c0_i32_0 : i32, i32
  }
  func.func @transform_6(%arg0: i32) -> (i32, i32) {
    %c0_i32 = arith.constant 0 : i32
    %c0_i32_0 = arith.constant 0 : i32
    %c0_i32_1 = arith.constant 0 : i32
    return %c0_i32, %c0_i32_0 : i32, i32
  }
  func.func @transform_7(%arg0: i32) -> (i32, i32) {
    %c0_i32 = arith.constant 0 : i32
    %c0_i32_0 = arith.constant 0 : i32
    %c0_i32_1 = arith.constant 0 : i32
    return %c0_i32, %c0_i32_0 : i32, i32
  }
  func.func @transform_8(%arg0: i32) -> (i32, i32) {
    %c0_i32 = arith.constant 0 : i32
    %c0_i32_0 = arith.constant 0 : i32
    %c0_i32_1 = arith.constant 0 : i32
    return %c0_i32, %c0_i32_0 : i32, i32
  }
  func.func @transform_9(%arg0: i32) -> (i32, i32) {
    %c0_i32 = arith.constant 0 : i32
    %c0_i32_0 = arith.constant 0 : i32
    %c0_i32_1 = arith.constant 0 : i32
    return %c0_i32, %c0_i32_0 : i32, i32
  }
  func.func @transform_10(%arg0: i32) -> (i32, i32) {
    %c0_i32 = arith.constant 0 : i32
    %c0_i32_0 = arith.constant 0 : i32
    return %arg0, %c0_i32 : i32, i32
  }
  func.func @transform_11(%arg0: i32) -> (i32, i32) {
    %c0_i32 = arith.constant 0 : i32
    %c0_i32_0 = arith.constant 0 : i32
    return %arg0, %c0_i32 : i32, i32
  }
  func.func @transform_12(%arg0: i32) -> (i32, i32) {
    %c0_i32 = arith.constant 0 : i32
    %c0_i32_0 = arith.constant 0 : i32
    return %arg0, %c0_i32 : i32, i32
  }
}

</mosaic_0001>

<bundles_post_ra>
// kernel: vae_forward.1
= control target key start
LH: loop header
LB: loop body
LE: loop exit
PB: predicated region body
PF: predicated region fallthrough
CT: control target
= control target key end

     0   :  { %18 = vsyncpa [#allocation3], 0  ;;  %s8948_s0 = inlined_call_operand.vmem [shape: bf16[8,2304], index: 0, kind: input, shape index: {}]   ;;  %s8949_s1 = inlined_call_operand.vmem [shape: f32[8,128], index: 1, kind: input, shape index: {}]   ;;  %s8950_s2 = inlined_call_operand.vmem [shape: bf16[2304,256], index: 2, kind: input, shape index: {}]   ;;  %s8951_s3 = inlined_call_operand.vmem [shape: f32[1,256], index: 3, kind: input, shape index: {}]   ;;  %s8952_s4 = inlined_call_operand.vmem [shape: bf16[256,256], index: 4, kind: input, shape index: {}]   ;;  %s8953_s5 = inlined_call_operand.vmem [shape: f32[1,256], index: 5, kind: input, shape index: {}]   ;;  %s8954_s6 = inlined_call_operand.vmem [shape: bf16[128,256], index: 6, kind: input, shape index: {}]   ;;  %s8955_s7 = inlined_call_operand.vmem [shape: f32[1,256], index: 7, kind: input, shape index: {}]   ;;  %s8956_s8 = inlined_call_operand.vmem [shape: bf16[256,2254], index: 8, kind: input, shape index: {}]   ;;  %s8957_s9 = inlined_call_operand.vmem [shape: f32[1,2254], index: 9, kind: input, shape index: {}]   ;;  %s8958_s10 = inlined_call_operand.hbm [shape: bf16[8,2254], index: 10, kind: output, shape index: {0}]   ;;  %s8959_s11 = inlined_call_operand.hbm [shape: f32[8,128], index: 11, kind: output, shape index: {1}]   ;;  %s8960_s12 = inlined_call_operand.hbm [shape: f32[8,128], index: 12, kind: output, shape index: {2}]  }
   0x1   :  { %v5721_v0 = vld [vmem:[%s8950_s2 + $0x4] ss:$8 sps:$4 sm:$0xff]   ;;  %v5723_v1 = vld [vmem:[%s8950_s2] ss:$8 sps:$4 sm:$0xff]   ;;  %v5724_v2 = vld [vmem:[%s8950_s2 + $0x14] ss:$8 sps:$4 sm:$0xff]  }
   0x2   :  { %1853 = vmatprep.subr.bf16.mxu0 %v5721_v0  ;;  %v5726_v3 = vld [vmem:[%s8950_s2 + $0x10] ss:$8 sps:$4 sm:$0xff]   ;;  %v5727_v4 = vld [vmem:[%s8950_s2 + $0x24] ss:$8 sps:$4 sm:$0xff]   ;;  %v5729_v5 = vld [vmem:[%s8950_s2 + $0x20] ss:$8 sps:$4 sm:$0xff]  }
   0x3   :  { %1854 = vmatpush1.bf16.msra.mxu0 %v5723_v1  ;;  %v5730_v6 = vld [vmem:[%s8950_s2 + $0x34] ss:$8 sps:$4 sm:$0xff]   ;;  %v5732_v7 = vld [vmem:[%s8950_s2 + $0x30] ss:$8 sps:$4 sm:$0xff]   ;;  %v5733_v8 = vld [vmem:[%s8950_s2 + $0x44] ss:$8 sps:$4 sm:$0xff]  }
   0x4   :  { %1855 = vmatprep.subr.bf16.mxu0 %v5724_v2  ;;  %v5735_v9 = vld [vmem:[%s8950_s2 + $0x40] ss:$8 sps:$4 sm:$0xff]   ;;  %v5736_v10 = vld [vmem:[%s8950_s2 + $0x54] ss:$8 sps:$4 sm:$0xff]   ;;  %v5738_v11 = vld [vmem:[%s8950_s2 + $0x50] ss:$8 sps:$4 sm:$0xff]  }
   0x5   :  { %v5739_v12 = vld [vmem:[%s8950_s2 + $0x64] ss:$8 sps:$4 sm:$0xff]   ;;  %v5741_v15 = vld [vmem:[%s8950_s2 + $0x60] ss:$8 sps:$4 sm:$0xff]   ;;  %v5742_v16 = vld [vmem:[%s8950_s2 + $0x74] ss:$8 sps:$4 sm:$0xff]  }
   0x6   :  { %v41_v13 = vld [vmem:[%s8948_s0] sm:$0xff]  ;;  %v5744_v17 = vld [vmem:[%s8950_s2 + $0x70] ss:$8 sps:$4 sm:$0xff]   ;;  %v5748_v20 = vld [vmem:[%s8950_s2 + $0x94] ss:$8 sps:$4 sm:$0xff]  }
   0x7   :  { %1856 = vmatpush1.bf16.msra.mxu0 %v5726_v3  ;;  %v5024_v14 = vcombine.high %v41_v13, %v41_v13  ;;  %v5745_v18 = vld [vmem:[%s8950_s2 + $0x84] ss:$8 sps:$4 sm:$0xff]   ;;  %v5747_v19 = vld [vmem:[%s8950_s2 + $0x80] ss:$8 sps:$4 sm:$0xff]   ;;  %v5750_v21 = vld [vmem:[%s8950_s2 + $0x90] ss:$8 sps:$4 sm:$0xff]   ;;  %v5023_v36 = vcombine.low %v41_v13, %v41_v13 }
   0x8   :  { %1857 = vmatprep.subr.bf16.mxu0 %v5727_v4  ;;  %v5751_v22 = vld [vmem:[%s8950_s2 + $0xa4] ss:$8 sps:$4 sm:$0xff]   ;;  %v5753_v23 = vld [vmem:[%s8950_s2 + $0xa0] ss:$8 sps:$4 sm:$0xff]   ;;  %v5754_v24 = vld [vmem:[%s8950_s2 + $0xb4] ss:$8 sps:$4 sm:$0xff]  }
   0x9   :  { %1885 = vmatprep.mubr.bf16.mxu0 %v5024_v14  ;;  %v5756_v25 = vld [vmem:[%s8950_s2 + $0xb0] ss:$8 sps:$4 sm:$0xff]   ;;  %v5757_v26 = vld [vmem:[%s8950_s2 + $0xc4] ss:$8 sps:$4 sm:$0xff]   ;;  %v5759_v27 = vld [vmem:[%s8950_s2 + $0xc0] ss:$8 sps:$4 sm:$0xff]  }
   0xa   :  { %v5760_v28 = vld [vmem:[%s8950_s2 + $0xd4] ss:$8 sps:$4 sm:$0xff]   ;;  %v5762_v29 = vld [vmem:[%s8950_s2 + $0xd0] ss:$8 sps:$4 sm:$0xff]   ;;  %v5763_v30 = vld [vmem:[%s8950_s2 + $0xe4] ss:$8 sps:$4 sm:$0xff]  }
   0xb   :  { %1858 = vmatpush1.bf16.msra.mxu0 %v5729_v5  ;;  %v5765_v31 = vld [vmem:[%s8950_s2 + $0xe0] ss:$8 sps:$4 sm:$0xff]   ;;  %v5766_v32 = vld [vmem:[%s8950_s2 + $0xf4] ss:$8 sps:$4 sm:$0xff]   ;;  %v5768_v33 = vld [vmem:[%s8950_s2 + $0xf0] ss:$8 sps:$4 sm:$0xff]  }
   0xc   :  { %1859 = vmatprep.subr.bf16.mxu0 %v5730_v6  ;;  %v5773_v34 = vld [vmem:[%s8950_s2 + $0x104] ss:$8 sps:$4 sm:$0xff]   ;;  %v5771_v37 = vld [vmem:[%s8950_s2 + $0x100] ss:$8 sps:$4 sm:$0xff]   ;;  %v5776_v39 = vld [vmem:[%s8950_s2 + $0x114] ss:$8 sps:$4 sm:$0xff]  }
   0xd   :  { %v6957_v35 = vld [vmem:[%s8948_s0 + $0x8] sm:$0xff]  ;;  %v5774_v40 = vld [vmem:[%s8950_s2 + $0x110] ss:$8 sps:$4 sm:$0xff]   ;;  %v5782_v43 = vld [vmem:[%s8950_s2 + $0x134] ss:$8 sps:$4 sm:$0xff]  }
   0xe   :  { %v5026_v38 = vcombine.high %v6957_v35, %v6957_v35  ;;  %v5779_v41 = vld [vmem:[%s8950_s2 + $0x124] ss:$8 sps:$4 sm:$0xff]   ;;  %v5777_v42 = vld [vmem:[%s8950_s2 + $0x120] ss:$8 sps:$4 sm:$0xff]   ;;  %v5780_v44 = vld [vmem:[%s8950_s2 + $0x130] ss:$8 sps:$4 sm:$0xff]  }
   0xf   :  { %1860 = vmatpush1.bf16.msra.mxu0 %v5732_v7  ;;  %v5785_v45 = vld [vmem:[%s8950_s2 + $0x144] ss:$8 sps:$4 sm:$0xff]   ;;  %v5783_v46 = vld [vmem:[%s8950_s2 + $0x140] ss:$8 sps:$4 sm:$0xff]   ;;  %v5788_v47 = vld [vmem:[%s8950_s2 + $0x154] ss:$8 sps:$4 sm:$0xff]   ;;  %v5025_v7 = vcombine.low %v6957_v35, %v6957_v35 }
  0x10   :  { %1861 = vmatprep.subr.bf16.mxu0 %v5733_v8  ;;  %v5786_v48 = vld [vmem:[%s8950_s2 + $0x150] ss:$8 sps:$4 sm:$0xff]   ;;  %v5791_v49 = vld [vmem:[%s8950_s2 + $0x164] ss:$8 sps:$4 sm:$0xff]   ;;  %v5789_v50 = vld [vmem:[%s8950_s2 + $0x160] ss:$8 sps:$4 sm:$0xff]  }
  0x11   :  { %v5794_v51 = vld [vmem:[%s8950_s2 + $0x174] ss:$8 sps:$4 sm:$0xff]   ;;  %v5792_v52 = vld [vmem:[%s8950_s2 + $0x170] ss:$8 sps:$4 sm:$0xff]   ;;  %v5797_v53 = vld [vmem:[%s8950_s2 + $0x184] ss:$8 sps:$4 sm:$0xff]  }
  0x12   :  { %v5795_v54 = vld [vmem:[%s8950_s2 + $0x180] ss:$8 sps:$4 sm:$0xff]   ;;  %v5800_v55 = vld [vmem:[%s8950_s2 + $0x194] ss:$8 sps:$4 sm:$0xff]   ;;  %v5798_v56 = vld [vmem:[%s8950_s2 + $0x190] ss:$8 sps:$4 sm:$0xff]  }
  0x13   :  { %1862 = vmatpush1.bf16.msra.mxu0 %v5735_v9  ;;  %v5803_v57 = vld [vmem:[%s8950_s2 + $0x1a4] ss:$8 sps:$4 sm:$0xff]   ;;  %v5801_v58 = vld [vmem:[%s8950_s2 + $0x1a0] ss:$8 sps:$4 sm:$0xff]   ;;  %v5806_v59 = vld [vmem:[%s8950_s2 + $0x1b4] ss:$8 sps:$4 sm:$0xff]  }
  0x14   :  { %1863 = vmatprep.subr.bf16.mxu0 %v5736_v10  ;;  %v5804_v60 = vld [vmem:[%s8950_s2 + $0x1b0] ss:$8 sps:$4 sm:$0xff]   ;;  %v5809_v61 = vld [vmem:[%s8950_s2 + $0x1c4] ss:$8 sps:$4 sm:$0xff]   ;;  %v5807_v62 = vld [vmem:[%s8950_s2 + $0x1c0] ss:$8 sps:$4 sm:$0xff]  }
  0x15   :  { %v5812_v63 = vld [vmem:[%s8950_s2 + $0x1d4] ss:$8 sps:$4 sm:$0xff]   ;;  %v5810_v0 = vld [vmem:[%s8950_s2 + $0x1d0] ss:$8 sps:$4 sm:$0xff]   ;;  %v5815_v1 = vld [vmem:[%s8950_s2 + $0x1e4] ss:$8 sps:$4 sm:$0xff]  }
  0x16   :  { %v5813_v2 = vld [vmem:[%s8950_s2 + $0x1e0] ss:$8 sps:$4 sm:$0xff]   ;;  %v5818_v3 = vld [vmem:[%s8950_s2 + $0x1f4] ss:$8 sps:$4 sm:$0xff]   ;;  %v5816_v4 = vld [vmem:[%s8950_s2 + $0x1f0] ss:$8 sps:$4 sm:$0xff]  }
  0x17   :  { %1864 = vmatpush1.bf16.msra.mxu0 %v5738_v11  ;;  %v5823_v5 = vld [vmem:[%s8950_s2 + $0x204] ss:$8 sps:$4 sm:$0xff]   ;;  %v7060_v6 = vld [vmem:[%s8948_s0 + $0x10] sm:$0xff]  ;;  %v5821_v8 = vld [vmem:[%s8950_s2 + $0x200] ss:$8 sps:$4 sm:$0xff]  }
  0x18   :  { %1865 = vmatprep.subr.bf16.mxu0 %v5739_v12  ;;  %v5826_v9 = vld [vmem:[%s8950_s2 + $0x214] ss:$8 sps:$4 sm:$0xff]   ;;  %v5028_v10 = vcombine.high %v7060_v6, %v7060_v6  ;;  %v5824_v11 = vld [vmem:[%s8950_s2 + $0x210] ss:$8 sps:$4 sm:$0xff]   ;;  %v5829_v12 = vld [vmem:[%s8950_s2 + $0x224] ss:$8 sps:$4 sm:$0xff]  }
  0x19   :  { %v5827_v13 = vld [vmem:[%s8950_s2 + $0x220] ss:$8 sps:$4 sm:$0xff]   ;;  %v5832_v14 = vld [vmem:[%s8950_s2 + $0x234] ss:$8 sps:$4 sm:$0xff]   ;;  %v5860_v35 = vld [vmem:[%s8950_s2 + $0x2d0] ss:$8 sps:$4 sm:$0xff]  }
  0x1b   :  { %1866 = vmatpush1.bf16.msra.mxu0 %v5741_v15  ;;  %v5830_v15 = vld [vmem:[%s8950_s2 + $0x230] ss:$8 sps:$4 sm:$0xff]  }
  0x1c   :  { %1867 = vmatprep.subr.bf16.mxu0 %v5742_v16  ;;  %v5835_v16 = vld [vmem:[%s8950_s2 + $0x244] ss:$8 sps:$4 sm:$0xff]  }
  0x1f   :  { %1868 = vmatpush1.bf16.msra.mxu0 %v5744_v17  ;;  %v5833_v17 = vld [vmem:[%s8950_s2 + $0x240] ss:$8 sps:$4 sm:$0xff]  }
  0x20   :  { %1869 = vmatprep.subr.bf16.mxu0 %v5745_v18  ;;  %v5838_v18 = vld [vmem:[%s8950_s2 + $0x254] ss:$8 sps:$4 sm:$0xff]  }
  0x23   :  { %1870 = vmatpush1.bf16.msra.mxu0 %v5747_v19  ;;  %v5836_v19 = vld [vmem:[%s8950_s2 + $0x250] ss:$8 sps:$4 sm:$0xff]  }
  0x24   :  { %1871 = vmatprep.subr.bf16.mxu0 %v5748_v20  ;;  %v5841_v20 = vld [vmem:[%s8950_s2 + $0x264] ss:$8 sps:$4 sm:$0xff]  }
  0x27   :  { %1872 = vmatpush1.bf16.msra.mxu0 %v5750_v21  ;;  %v5839_v21 = vld [vmem:[%s8950_s2 + $0x260] ss:$8 sps:$4 sm:$0xff]  }
  0x28   :  { %1873 = vmatprep.subr.bf16.mxu0 %v5751_v22  ;;  %v5844_v22 = vld [vmem:[%s8950_s2 + $0x274] ss:$8 sps:$4 sm:$0xff]  }
  0x2b   :  { %1874 = vmatpush1.bf16.msra.mxu0 %v5753_v23  ;;  %v5842_v23 = vld [vmem:[%s8950_s2 + $0x270] ss:$8 sps:$4 sm:$0xff]  }
  0x2c   :  { %1875 = vmatprep.subr.bf16.mxu0 %v5754_v24  ;;  %v5847_v24 = vld [vmem:[%s8950_s2 + $0x284] ss:$8 sps:$4 sm:$0xff]  }
  0x2f   :  { %1876 = vmatpush1.bf16.msra.mxu0 %v5756_v25  ;;  %v5845_v25 = vld [vmem:[%s8950_s2 + $0x280] ss:$8 sps:$4 sm:$0xff]  }
  0x30   :  { %1877 = vmatprep.subr.bf16.mxu0 %v5757_v26  ;;  %v5850_v26 = vld [vmem:[%s8950_s2 + $0x294] ss:$8 sps:$4 sm:$0xff]  }
  0x33   :  { %1878 = vmatpush1.bf16.msra.mxu0 %v5759_v27  ;;  %v5848_v27 = vld [vmem:[%s8950_s2 + $0x290] ss:$8 sps:$4 sm:$0xff]  }
  0x34   :  { %1879 = vmatprep.subr.bf16.mxu0 %v5760_v28  ;;  %v5853_v28 = vld [vmem:[%s8950_s2 + $0x2a4] ss:$8 sps:$4 sm:$0xff]  }
  0x37   :  { %1880 = vmatpush1.bf16.msra.mxu0 %v5762_v29  ;;  %v5851_v29 = vld [vmem:[%s8950_s2 + $0x2a0] ss:$8 sps:$4 sm:$0xff]  }
  0x38   :  { %1881 = vmatprep.subr.bf16.mxu0 %v5763_v30  ;;  %v5856_v30 = vld [vmem:[%s8950_s2 + $0x2b4] ss:$8 sps:$4 sm:$0xff]  }
  0x3b   :  { %1882 = vmatpush1.bf16.msra.mxu0 %v5765_v31  ;;  %v5854_v31 = vld [vmem:[%s8950_s2 + $0x2b0] ss:$8 sps:$4 sm:$0xff]  }
  0x3c   :  { %1883 = vmatprep.subr.bf16.mxu0 %v5766_v32  ;;  %v5859_v32 = vld [vmem:[%s8950_s2 + $0x2c4] ss:$8 sps:$4 sm:$0xff]  }
  0x3f   :  { %1884 = vmatpush1.bf16.msra.mxu0 %v5768_v33  ;;  %v5857_v33 = vld [vmem:[%s8950_s2 + $0x2c0] ss:$8 sps:$4 sm:$0xff]  }
  0x40   :  { %1894 = vmatprep.subr.bf16.mxu0 %v5773_v34  ;;  %v5862_v34 = vld [vmem:[%s8950_s2 + $0x2d4] ss:$8 sps:$4 sm:$0xff]  }
  0x42   :  { %1886 = vmatmul.mubr.bf16.vlgmr.msra.gmra.mrb[0].mxu0 %v5023_v36  ;;  %v5865_v36 = vld [vmem:[%s8950_s2 + $0x2e4] ss:$8 sps:$4 sm:$0xff]  }
  0x43   :  { %1895 = vmatpush1.bf16.msra.mxu0 %v5771_v37  ;;  %1926 = vmatprep.mubr.bf16.mxu0 %v5026_v38  ;;  %v5863_v37 = vld [vmem:[%s8950_s2 + $0x2e0] ss:$8 sps:$4 sm:$0xff]   ;;  %v5868_v38 = vld [vmem:[%s8950_s2 + $0x2f4] ss:$8 sps:$4 sm:$0xff]  }
  0x44   :  { %1896 = vmatprep.subr.bf16.mxu0 %v5776_v39  ;;  %v5866_v39 = vld [vmem:[%s8950_s2 + $0x2f0] ss:$8 sps:$4 sm:$0xff]  }
  0x47   :  { %1897 = vmatpush1.bf16.msra.mxu0 %v5774_v40  ;;  %v5873_v40 = vld [vmem:[%s8950_s2 + $0x304] ss:$8 sps:$4 sm:$0xff]  }
  0x48   :  { %1898 = vmatprep.subr.bf16.mxu0 %v5779_v41  ;;  %v7165_v41 = vld [vmem:[%s8948_s0 + $0x18] sm:$0xff] }
  0x4b   :  { %1899 = vmatpush1.bf16.msra.mxu0 %v5777_v42  ;;  %v5027_v42 = vcombine.low %v7060_v6, %v7060_v6  ;;  %v5910_v6 = vld [vmem:[%s8950_s2 + $0x3d0] ss:$8 sps:$4 sm:$0xff]  }
  0x4c   :  { %1900 = vmatprep.subr.bf16.mxu0 %v5782_v43  ;;  %v5871_v43 = vld [vmem:[%s8950_s2 + $0x300] ss:$8 sps:$4 sm:$0xff]  }
  0x4f   :  { %1901 = vmatpush1.bf16.msra.mxu0 %v5780_v44  ;;  %v5876_v44 = vld [vmem:[%s8950_s2 + $0x314] ss:$8 sps:$4 sm:$0xff]  }
  0x50   :  { %1902 = vmatprep.subr.bf16.mxu0 %v5785_v45  ;;  %v5030_v45 = vcombine.high %v7165_v41, %v7165_v41 }
  0x53   :  { %1903 = vmatpush1.bf16.msra.mxu0 %v5783_v46  ;;  %v5874_v46 = vld [vmem:[%s8950_s2 + $0x310] ss:$8 sps:$4 sm:$0xff]  }
  0x54   :  { %1904 = vmatprep.subr.bf16.mxu0 %v5788_v47  ;;  %v5879_v47 = vld [vmem:[%s8950_s2 + $0x324] ss:$8 sps:$4 sm:$0xff]  }
  0x57   :  { %1905 = vmatpush1.bf16.msra.mxu0 %v5786_v48  ;;  %v5877_v48 = vld [vmem:[%s8950_s2 + $0x320] ss:$8 sps:$4 sm:$0xff]  }
  0x58   :  { %1906 = vmatprep.subr.bf16.mxu0 %v5791_v49  ;;  %v5882_v49 = vld [vmem:[%s8950_s2 + $0x334] ss:$8 sps:$4 sm:$0xff]  }
  0x5b   :  { %1907 = vmatpush1.bf16.msra.mxu0 %v5789_v50  ;;  %v5880_v50 = vld [vmem:[%s8950_s2 + $0x330] ss:$8 sps:$4 sm:$0xff]  }
  0x5c   :  { %1908 = vmatprep.subr.bf16.mxu0 %v5794_v51  ;;  %v5885_v51 = vld [vmem:[%s8950_s2 + $0x344] ss:$8 sps:$4 sm:$0xff]  }
  0x5f   :  { %1909 = vmatpush1.bf16.msra.mxu0 %v5792_v52  ;;  %v5883_v52 = vld [vmem:[%s8950_s2 + $0x340] ss:$8 sps:$4 sm:$0xff]  }
  0x60   :  { %1910 = vmatprep.subr.bf16.mxu0 %v5797_v53  ;;  %v5888_v53 = vld [vmem:[%s8950_s2 + $0x354] ss:$8 sps:$4 sm:$0xff]  }
  0x63   :  { %1911 = vmatpush1.bf16.msra.mxu0 %v5795_v54  ;;  %v5886_v54 = vld [vmem:[%s8950_s2 + $0x350] ss:$8 sps:$4 sm:$0xff]  }
  0x64   :  { %1912 = vmatprep.subr.bf16.mxu0 %v5800_v55  ;;  %v5891_v55 = vld [vmem:[%s8950_s2 + $0x364] ss:$8 sps:$4 sm:$0xff]  }
  0x67   :  { %1913 = vmatpush1.bf16.msra.mxu0 %v5798_v56  ;;  %v5889_v56 = vld [vmem:[%s8950_s2 + $0x360] ss:$8 sps:$4 sm:$0xff]  }
  0x68   :  { %1914 = vmatprep.subr.bf16.mxu0 %v5803_v57  ;;  %v5894_v57 = vld [vmem:[%s8950_s2 + $0x374] ss:$8 sps:$4 sm:$0xff]  }
  0x6b   :  { %1915 = vmatpush1.bf16.msra.mxu0 %v5801_v58  ;;  %v5892_v58 = vld [vmem:[%s8950_s2 + $0x370] ss:$8 sps:$4 sm:$0xff]  }
  0x6c   :  { %1916 = vmatprep.subr.bf16.mxu0 %v5806_v59  ;;  %v5897_v59 = vld [vmem:[%s8950_s2 + $0x384] ss:$8 sps:$4 sm:$0xff]  }
  0x6f   :  { %1917 = vmatpush1.bf16.msra.mxu0 %v5804_v60  ;;  %v5895_v60 = vld [vmem:[%s8950_s2 + $0x380] ss:$8 sps:$4 sm:$0xff]  }
  0x70   :  { %1918 = vmatprep.subr.bf16.mxu0 %v5809_v61  ;;  %v5900_v61 = vld [vmem:[%s8950_s2 + $0x394] ss:$8 sps:$4 sm:$0xff]  }
  0x73   :  { %1919 = vmatpush1.bf16.msra.mxu0 %v5807_v62  ;;  %v5898_v62 = vld [vmem:[%s8950_s2 + $0x390] ss:$8 sps:$4 sm:$0xff]  }
  0x74   :  { %1920 = vmatprep.subr.bf16.mxu0 %v5812_v63  ;;  %v5903_v63 = vld [vmem:[%s8950_s2 + $0x3a4] ss:$8 sps:$4 sm:$0xff]  }
  0x77   :  { %1921 = vmatpush1.bf16.msra.mxu0 %v5810_v0  ;;  %v5901_v0 = vld [vmem:[%s8950_s2 + $0x3a0] ss:$8 sps:$4 sm:$0xff]  }
  0x78   :  { %1922 = vmatprep.subr.bf16.mxu0 %v5815_v1  ;;  %v5906_v1 = vld [vmem:[%s8950_s2 + $0x3b4] ss:$8 sps:$4 sm:$0xff]  }
  0x7b   :  { %1923 = vmatpush1.bf16.msra.mxu0 %v5813_v2  ;;  %v5904_v2 = vld [vmem:[%s8950_s2 + $0x3b0] ss:$8 sps:$4 sm:$0xff]  }
  0x7c   :  { %1924 = vmatprep.subr.bf16.mxu0 %v5818_v3  ;;  %v5909_v3 = vld [vmem:[%s8950_s2 + $0x3c4] ss:$8 sps:$4 sm:$0xff]  }
  0x7f   :  { %1925 = vmatpush1.bf16.msra.mxu0 %v5816_v4  ;;  %v5907_v4 = vld [vmem:[%s8950_s2 + $0x3c0] ss:$8 sps:$4 sm:$0xff]  }
  0x80   :  { %1935 = vmatprep.subr.bf16.mxu0 %v5823_v5  ;;  %v5912_v5 = vld [vmem:[%s8950_s2 + $0x3d4] ss:$8 sps:$4 sm:$0xff]  }
  0x82   :  { %1927 = vmatmul.mubr.bf16.vlgmr.msra.gmra.mrb[0].mxu0 %v5025_v7  ;;  %v5915_v7 = vld [vmem:[%s8950_s2 + $0x3e4] ss:$8 sps:$4 sm:$0xff]  }
  0x83   :  { %1936 = vmatpush1.bf16.msra.mxu0 %v5821_v8  ;;  %1967 = vmatprep.mubr.bf16.mxu0 %v5028_v10  ;;  %v5913_v8 = vld [vmem:[%s8950_s2 + $0x3e0] ss:$8 sps:$4 sm:$0xff]   ;;  %v5916_v10 = vld [vmem:[%s8950_s2 + $0x3f0] ss:$8 sps:$4 sm:$0xff]  }
  0x84   :  { %1937 = vmatprep.subr.bf16.mxu0 %v5826_v9  ;;  %v5918_v9 = vld [vmem:[%s8950_s2 + $0x3f4] ss:$8 sps:$4 sm:$0xff]  }
  0x87   :  { %1938 = vmatpush1.bf16.msra.mxu0 %v5824_v11  ;;  %v5923_v11 = vld [vmem:[%s8950_s2 + $0x404] ss:$8 sps:$4 sm:$0xff]  }
  0x88   :  { %1939 = vmatprep.subr.bf16.mxu0 %v5829_v12  ;;  %v7270_v12 = vld [vmem:[%s8948_s0 + $0x20] sm:$0xff] }
  0x8b   :  { %1940 = vmatpush1.bf16.msra.mxu0 %v5827_v13  ;;  %v5029_v13 = vcombine.low %v7165_v41, %v7165_v41 }
  0x8c   :  { %1941 = vmatprep.subr.bf16.mxu0 %v5832_v14  ;;  %v5921_v14 = vld [vmem:[%s8950_s2 + $0x400] ss:$8 sps:$4 sm:$0xff]  }
  0x8f   :  { %1942 = vmatpush1.bf16.msra.mxu0 %v5830_v15  ;;  %v5926_v15 = vld [vmem:[%s8950_s2 + $0x414] ss:$8 sps:$4 sm:$0xff]  }
  0x90   :  { %1943 = vmatprep.subr.bf16.mxu0 %v5835_v16  ;;  %v5032_v16 = vcombine.high %v7270_v12, %v7270_v12 }
  0x93   :  { %1944 = vmatpush1.bf16.msra.mxu0 %v5833_v17  ;;  %v5924_v17 = vld [vmem:[%s8950_s2 + $0x410] ss:$8 sps:$4 sm:$0xff]  }
  0x94   :  { %1945 = vmatprep.subr.bf16.mxu0 %v5838_v18  ;;  %v5929_v18 = vld [vmem:[%s8950_s2 + $0x424] ss:$8 sps:$4 sm:$0xff]  }
  0x97   :  { %1946 = vmatpush1.bf16.msra.mxu0 %v5836_v19  ;;  %v5927_v19 = vld [vmem:[%s8950_s2 + $0x420] ss:$8 sps:$4 sm:$0xff]  }
  0x98   :  { %1947 = vmatprep.subr.bf16.mxu0 %v5841_v20  ;;  %v5932_v20 = vld [vmem:[%s8950_s2 + $0x434] ss:$8 sps:$4 sm:$0xff]  }
  0x9b   :  { %1948 = vmatpush1.bf16.msra.mxu0 %v5839_v21  ;;  %v5930_v21 = vld [vmem:[%s8950_s2 + $0x430] ss:$8 sps:$4 sm:$0xff]  }
  0x9c   :  { %1949 = vmatprep.subr.bf16.mxu0 %v5844_v22  ;;  %v5935_v22 = vld [vmem:[%s8950_s2 + $0x444] ss:$8 sps:$4 sm:$0xff]  }
  0x9f   :  { %1950 = vmatpush1.bf16.msra.mxu0 %v5842_v23  ;;  %v5933_v23 = vld [vmem:[%s8950_s2 + $0x440] ss:$8 sps:$4 sm:$0xff]  }
  0xa0   :  { %1951 = vmatprep.subr.bf16.mxu0 %v5847_v24  ;;  %v5938_v24 = vld [vmem:[%s8950_s2 + $0x454] ss:$8 sps:$4 sm:$0xff]  }
  0xa3   :  { %1952 = vmatpush1.bf16.msra.mxu0 %v5845_v25  ;;  %v5936_v25 = vld [vmem:[%s8950_s2 + $0x450] ss:$8 sps:$4 sm:$0xff]  }
  0xa4   :  { %1953 = vmatprep.subr.bf16.mxu0 %v5850_v26  ;;  %v5941_v26 = vld [vmem:[%s8950_s2 + $0x464] ss:$8 sps:$4 sm:$0xff]  }
  0xa7   :  { %1954 = vmatpush1.bf16.msra.mxu0 %v5848_v27 }
  0xa8   :  { %1955 = vmatprep.subr.bf16.mxu0 %v5853_v28 }
  0xab   :  { %1956 = vmatpush1.bf16.msra.mxu0 %v5851_v29 }
  0xac   :  { %1957 = vmatprep.subr.bf16.mxu0 %v5856_v30 }
  0xaf   :  { %1958 = vmatpush1.bf16.msra.mxu0 %v5854_v31 }
  0xb0   :  { %1959 = vmatprep.subr.bf16.mxu0 %v5859_v32 }
  0xb3   :  { %1960 = vmatpush1.bf16.msra.mxu0 %v5857_v33 }
  0xb4   :  { %1961 = vmatprep.subr.bf16.mxu0 %v5862_v34 }
  0xb7   :  { %1962 = vmatpush1.bf16.msra.mxu0 %v5860_v35 }
  0xb8   :  { %1963 = vmatprep.subr.bf16.mxu0 %v5865_v36 }
  0xbb   :  { %1964 = vmatpush1.bf16.msra.mxu0 %v5863_v37 }
  0xbc   :  { %1965 = vmatprep.subr.bf16.mxu0 %v5868_v38 }
  0xbf   :  { %1966 = vmatpush1.bf16.msra.mxu0 %v5866_v39 }
  0xc0   :  { %1976 = vmatprep.subr.bf16.mxu0 %v5873_v40 }
  0xc2   :  { %1968 = vmatmul.mubr.bf16.vlgmr.msra.gmra.mrb[0].mxu0 %v5027_v42 }
  0xc3   :  { %1977 = vmatpush1.bf16.msra.mxu0 %v5871_v43  ;;  %2008 = vmatprep.mubr.bf16.mxu0 %v5030_v45 }
  0xc4   :  { %1978 = vmatprep.subr.bf16.mxu0 %v5876_v44 }
  0xc7   :  { %1979 = vmatpush1.bf16.msra.mxu0 %v5874_v46 }
  0xc8   :  { %1980 = vmatprep.subr.bf16.mxu0 %v5879_v47 }
  0xcb   :  { %1981 = vmatpush1.bf16.msra.mxu0 %v5877_v48 }
  0xcc   :  { %1982 = vmatprep.subr.bf16.mxu0 %v5882_v49 }
  0xcf   :  { %1983 = vmatpush1.bf16.msra.mxu0 %v5880_v50 }
  0xd0   :  { %1984 = vmatprep.subr.bf16.mxu0 %v5885_v51 }
  0xd3   :  { %1985 = vmatpush1.bf16.msra.mxu0 %v5883_v52 }
  0xd4   :  { %1986 = vmatprep.subr.bf16.mxu0 %v5888_v53 }
  0xd7   :  { %1987 = vmatpush1.bf16.msra.mxu0 %v5886_v54 }
  0xd8   :  { %1988 = vmatprep.subr.bf16.mxu0 %v5891_v55 }
  0xdb   :  { %1989 = vmatpush1.bf16.msra.mxu0 %v5889_v56 }
  0xdc   :  { %1990 = vmatprep.subr.bf16.mxu0 %v5894_v57 }
  0xdf   :  { %1991 = vmatpush1.bf16.msra.mxu0 %v5892_v58 }
  0xe0   :  { %1992 = vmatprep.subr.bf16.mxu0 %v5897_v59 }
  0xe3   :  { %1993 = vmatpush1.bf16.msra.mxu0 %v5895_v60 }
  0xe4   :  { %1994 = vmatprep.subr.bf16.mxu0 %v5900_v61 }
  0xe7   :  { %1995 = vmatpush1.bf16.msra.mxu0 %v5898_v62 }
  0xe8   :  { %1996 = vmatprep.subr.bf16.mxu0 %v5903_v63 }
  0xeb   :  { %1997 = vmatpush1.bf16.msra.mxu0 %v5901_v0 }
  0xec   :  { %1998 = vmatprep.subr.bf16.mxu0 %v5906_v1 }
  0xef   :  { %1999 = vmatpush1.bf16.msra.mxu0 %v5904_v2 }
  0xf0   :  { %2000 = vmatprep.subr.bf16.mxu0 %v5909_v3 }
  0xf3   :  { %2001 = vmatpush1.bf16.msra.mxu0 %v5907_v4 }
  0xf4   :  { %2002 = vmatprep.subr.bf16.mxu0 %v5912_v5 }
  0xf7   :  { %2003 = vmatpush1.bf16.msra.mxu0 %v5910_v6 }
  0xf8   :  { %2004 = vmatprep.subr.bf16.mxu0 %v5915_v7 }
  0xfb   :  { %2005 = vmatpush1.bf16.msra.mxu0 %v5913_v8 }
  0xfc   :  { %2006 = vmatprep.subr.bf16.mxu0 %v5918_v9 }
  0xff   :  { %2007 = vmatpush1.bf16.msra.mxu0 %v5916_v10 }
 0x100   :  { %2017 = vmatprep.subr.bf16.mxu0 %v5923_v11 }
 0x102   :  { %2009 = vmatmul.mubr.bf16.vlgmr.msra.gmra.mrb[0].mxu0 %v5029_v13 }
 0x103   :  { %2018 = vmatpush1.bf16.msra.mxu0 %v5921_v14  ;;  %2049 = vmatprep.mubr.bf16.mxu0 %v5032_v16 }
 0x104   :  { %2019 = vmatprep.subr.bf16.mxu0 %v5926_v15 }
 0x107   :  { %2020 = vmatpush1.bf16.msra.mxu0 %v5924_v17 }
 0x108   :  { %2021 = vmatprep.subr.bf16.mxu0 %v5929_v18 }
 0x10b   :  { %2022 = vmatpush1.bf16.msra.mxu0 %v5927_v19 }
 0x10c   :  { %2023 = vmatprep.subr.bf16.mxu0 %v5932_v20 }
 0x10f   :  { %2024 = vmatpush1.bf16.msra.mxu0 %v5930_v21 }
 0x110   :  { %2025 = vmatprep.subr.bf16.mxu0 %v5935_v22 }
 0x113   :  { %2026 = vmatpush1.bf16.msra.mxu0 %v5933_v23 }
 0x114   :  { %2027 = vmatprep.subr.bf16.mxu0 %v5938_v24 }
 0x115   :  { %19 = vsyncpa [#allocation5], 0  ;;  %v5939_v27 = vld [vmem:[%s8950_s2 + $0x460] ss:$8 sps:$4 sm:$0xff]   ;;  %v5944_v28 = vld [vmem:[%s8950_s2 + $0x474] ss:$8 sps:$4 sm:$0xff]   ;;  %v5031_v48 = vcombine.low %v7270_v12, %v7270_v12 }
 0x116   :  { %v5942_v29 = vld [vmem:[%s8950_s2 + $0x470] ss:$8 sps:$4 sm:$0xff]   ;;  %v5947_v30 = vld [vmem:[%s8950_s2 + $0x484] ss:$8 sps:$4 sm:$0xff]   ;;  %v5945_v31 = vld [vmem:[%s8950_s2 + $0x480] ss:$8 sps:$4 sm:$0xff]  }
 0x117   :  { %2028 = vmatpush1.bf16.msra.mxu0 %v5936_v25  ;;  %v5950_v32 = vld [vmem:[%s8950_s2 + $0x494] ss:$8 sps:$4 sm:$0xff]   ;;  %v5948_v33 = vld [vmem:[%s8950_s2 + $0x490] ss:$8 sps:$4 sm:$0xff]   ;;  %v5953_v34 = vld [vmem:[%s8950_s2 + $0x4a4] ss:$8 sps:$4 sm:$0xff]  }
 0x118   :  { %2029 = vmatprep.subr.bf16.mxu0 %v5941_v26  ;;  %v5951_v35 = vld [vmem:[%s8950_s2 + $0x4a0] ss:$8 sps:$4 sm:$0xff]   ;;  %v5956_v36 = vld [vmem:[%s8950_s2 + $0x4b4] ss:$8 sps:$4 sm:$0xff]   ;;  %v5954_v37 = vld [vmem:[%s8950_s2 + $0x4b0] ss:$8 sps:$4 sm:$0xff]  }
 0x119   :  { %v5959_v38 = vld [vmem:[%s8950_s2 + $0x4c4] ss:$8 sps:$4 sm:$0xff]   ;;  %v5957_v39 = vld [vmem:[%s8950_s2 + $0x4c0] ss:$8 sps:$4 sm:$0xff]   ;;  %v5962_v40 = vld [vmem:[%s8950_s2 + $0x4d4] ss:$8 sps:$4 sm:$0xff]  }
 0x11a   :  { %v5960_v41 = vld [vmem:[%s8950_s2 + $0x4d0] ss:$8 sps:$4 sm:$0xff]   ;;  %v5965_v42 = vld [vmem:[%s8950_s2 + $0x4e4] ss:$8 sps:$4 sm:$0xff]   ;;  %v5963_v43 = vld [vmem:[%s8950_s2 + $0x4e0] ss:$8 sps:$4 sm:$0xff]  }
 0x11b   :  { %2030 = vmatpush1.bf16.msra.mxu0 %v5939_v27  ;;  %v5968_v44 = vld [vmem:[%s8950_s2 + $0x4f4] ss:$8 sps:$4 sm:$0xff]   ;;  %v5966_v45 = vld [vmem:[%s8950_s2 + $0x4f0] ss:$8 sps:$4 sm:$0xff]   ;;  %v5973_v46 = vld [vmem:[%s8950_s2 + $0x504] ss:$8 sps:$4 sm:$0xff]  }
 0x11c   :  { %2031 = vmatprep.subr.bf16.mxu0 %v5944_v28  ;;  %v7375_v47 = vld [vmem:[%s8948_s0 + $0x28] sm:$0xff]  ;;  %v5976_v51 = vld [vmem:[%s8950_s2 + $0x514] ss:$8 sps:$4 sm:$0xff]   ;;  %v5974_v52 = vld [vmem:[%s8950_s2 + $0x510] ss:$8 sps:$4 sm:$0xff]   ;;  %vm4976_vm0 = vcmask 1043456  }
 0x11d   :  { %v5971_v49 = vld [vmem:[%s8950_s2 + $0x500] ss:$8 sps:$4 sm:$0xff]   ;;  %v5034_v50 = vcombine.high %v7375_v47, %v7375_v47  ;;  %v5979_v53 = vld [vmem:[%s8950_s2 + $0x524] ss:$8 sps:$4 sm:$0xff]   ;;  %v5982_v55 = vld [vmem:[%s8950_s2 + $0x534] ss:$8 sps:$4 sm:$0xff]   ;;  %v5033_v19 = vcombine.low %v7375_v47, %v7375_v47 }
 0x11e   :  { %v5977_v54 = vld [vmem:[%s8950_s2 + $0x520] ss:$8 sps:$4 sm:$0xff]   ;;  %v5980_v56 = vld [vmem:[%s8950_s2 + $0x530] ss:$8 sps:$4 sm:$0xff]   ;;  %v5985_v57 = vld [vmem:[%s8950_s2 + $0x544] ss:$8 sps:$4 sm:$0xff]  }
 0x11f   :  { %2032 = vmatpush1.bf16.msra.mxu0 %v5942_v29  ;;  %v5983_v58 = vld [vmem:[%s8950_s2 + $0x540] ss:$8 sps:$4 sm:$0xff]   ;;  %v5988_v59 = vld [vmem:[%s8950_s2 + $0x554] ss:$8 sps:$4 sm:$0xff]   ;;  %v5986_v60 = vld [vmem:[%s8950_s2 + $0x550] ss:$8 sps:$4 sm:$0xff]  }
 0x120   :  { %2033 = vmatprep.subr.bf16.mxu0 %v5947_v30  ;;  %v5991_v61 = vld [vmem:[%s8950_s2 + $0x564] ss:$8 sps:$4 sm:$0xff]   ;;  %v5989_v62 = vld [vmem:[%s8950_s2 + $0x560] ss:$8 sps:$4 sm:$0xff]   ;;  %v5994_v63 = vld [vmem:[%s8950_s2 + $0x574] ss:$8 sps:$4 sm:$0xff]  }
 0x121   :  { %v5992_v0 = vld [vmem:[%s8950_s2 + $0x570] ss:$8 sps:$4 sm:$0xff]   ;;  %v5997_v1 = vld [vmem:[%s8950_s2 + $0x584] ss:$8 sps:$4 sm:$0xff]   ;;  %v5995_v2 = vld [vmem:[%s8950_s2 + $0x580] ss:$8 sps:$4 sm:$0xff]  }
 0x122   :  { %v6000_v3 = vld [vmem:[%s8950_s2 + $0x594] ss:$8 sps:$4 sm:$0xff]   ;;  %v5998_v4 = vld [vmem:[%s8950_s2 + $0x590] ss:$8 sps:$4 sm:$0xff]   ;;  %v6003_v5 = vld [vmem:[%s8950_s2 + $0x5a4] ss:$8 sps:$4 sm:$0xff]  }
 0x123   :  { %2034 = vmatpush1.bf16.msra.mxu0 %v5945_v31  ;;  %v6001_v6 = vld [vmem:[%s8950_s2 + $0x5a0] ss:$8 sps:$4 sm:$0xff]   ;;  %v6006_v7 = vld [vmem:[%s8950_s2 + $0x5b4] ss:$8 sps:$4 sm:$0xff]   ;;  %v6004_v8 = vld [vmem:[%s8950_s2 + $0x5b0] ss:$8 sps:$4 sm:$0xff]  }
 0x124   :  { %2035 = vmatprep.subr.bf16.mxu0 %v5950_v32  ;;  %v6009_v9 = vld [vmem:[%s8950_s2 + $0x5c4] ss:$8 sps:$4 sm:$0xff]   ;;  %v6007_v10 = vld [vmem:[%s8950_s2 + $0x5c0] ss:$8 sps:$4 sm:$0xff]   ;;  %v6012_v11 = vld [vmem:[%s8950_s2 + $0x5d4] ss:$8 sps:$4 sm:$0xff]  }
 0x125   :  { %v6010_v12 = vld [vmem:[%s8950_s2 + $0x5d0] ss:$8 sps:$4 sm:$0xff]   ;;  %v6015_v13 = vld [vmem:[%s8950_s2 + $0x5e4] ss:$8 sps:$4 sm:$0xff]   ;;  %v6013_v14 = vld [vmem:[%s8950_s2 + $0x5e0] ss:$8 sps:$4 sm:$0xff]  }
 0x126   :  { %v6018_v15 = vld [vmem:[%s8950_s2 + $0x5f4] ss:$8 sps:$4 sm:$0xff]   ;;  %v6016_v16 = vld [vmem:[%s8950_s2 + $0x5f0] ss:$8 sps:$4 sm:$0xff]   ;;  %v6023_v17 = vld [vmem:[%s8950_s2 + $0x604] ss:$8 sps:$4 sm:$0xff]  }
 0x127   :  { %2036 = vmatpush1.bf16.msra.mxu0 %v5948_v33  ;;  %v7480_v18 = vld [vmem:[%s8948_s0 + $0x30] sm:$0xff]  ;;  %v6021_v20 = vld [vmem:[%s8950_s2 + $0x600] ss:$8 sps:$4 sm:$0xff]   ;;  %v6029_v24 = vld [vmem:[%s8950_s2 + $0x624] ss:$8 sps:$4 sm:$0xff]   ;;  %vm4977_vm1 = vcmask 637956  }
 0x128   :  { %2037 = vmatprep.subr.bf16.mxu0 %v5953_v34  ;;  %v5036_v21 = vcombine.high %v7480_v18, %v7480_v18  ;;  %v6026_v22 = vld [vmem:[%s8950_s2 + $0x614] ss:$8 sps:$4 sm:$0xff]   ;;  %v6024_v23 = vld [vmem:[%s8950_s2 + $0x610] ss:$8 sps:$4 sm:$0xff]   ;;  %v6027_v25 = vld [vmem:[%s8950_s2 + $0x620] ss:$8 sps:$4 sm:$0xff]  }
 0x129   :  { %v6032_v26 = vld [vmem:[%s8950_s2 + $0x634] ss:$8 sps:$4 sm:$0xff]   ;;  %v6030_v27 = vld [vmem:[%s8950_s2 + $0x630] ss:$8 sps:$4 sm:$0xff]   ;;  %v6035_v28 = vld [vmem:[%s8950_s2 + $0x644] ss:$8 sps:$4 sm:$0xff]  }
 0x12a   :  { %v6033_v29 = vld [vmem:[%s8950_s2 + $0x640] ss:$8 sps:$4 sm:$0xff]   ;;  %v6038_v30 = vld [vmem:[%s8950_s2 + $0x654] ss:$8 sps:$4 sm:$0xff]   ;;  %v6036_v31 = vld [vmem:[%s8950_s2 + $0x650] ss:$8 sps:$4 sm:$0xff]  }
 0x12b   :  { %2038 = vmatpush1.bf16.msra.mxu0 %v5951_v35  ;;  %v6041_v32 = vld [vmem:[%s8950_s2 + $0x664] ss:$8 sps:$4 sm:$0xff]   ;;  %v6039_v33 = vld [vmem:[%s8950_s2 + $0x660] ss:$8 sps:$4 sm:$0xff]   ;;  %v6044_v34 = vld [vmem:[%s8950_s2 + $0x674] ss:$8 sps:$4 sm:$0xff]  }
 0x12c   :  { %2039 = vmatprep.subr.bf16.mxu0 %v5956_v36  ;;  %v6042_v35 = vld [vmem:[%s8950_s2 + $0x670] ss:$8 sps:$4 sm:$0xff]   ;;  %v6047_v36 = vld [vmem:[%s8950_s2 + $0x684] ss:$8 sps:$4 sm:$0xff]   ;;  %vm4978_vm2 = vmor %vm4977_vm1, %vm4976_vm0 }
 0x12d   :  { %v6060_v47 = vld [vmem:[%s8950_s2 + $0x6d0] ss:$8 sps:$4 sm:$0xff]  }
 0x12f   :  { %2040 = vmatpush1.bf16.msra.mxu0 %v5954_v37  ;;  %v6045_v37 = vld [vmem:[%s8950_s2 + $0x680] ss:$8 sps:$4 sm:$0xff]  }
 0x130   :  { %2041 = vmatprep.subr.bf16.mxu0 %v5959_v38  ;;  %v6050_v38 = vld [vmem:[%s8950_s2 + $0x694] ss:$8 sps:$4 sm:$0xff]  }
 0x133   :  { %2042 = vmatpush1.bf16.msra.mxu0 %v5957_v39  ;;  %v6048_v39 = vld [vmem:[%s8950_s2 + $0x690] ss:$8 sps:$4 sm:$0xff]  }
 0x134   :  { %2043 = vmatprep.subr.bf16.mxu0 %v5962_v40  ;;  %v6053_v40 = vld [vmem:[%s8950_s2 + $0x6a4] ss:$8 sps:$4 sm:$0xff]  }
 0x137   :  { %2044 = vmatpush1.bf16.msra.mxu0 %v5960_v41  ;;  %v6051_v41 = vld [vmem:[%s8950_s2 + $0x6a0] ss:$8 sps:$4 sm:$0xff]  }
 0x138   :  { %2045 = vmatprep.subr.bf16.mxu0 %v5965_v42  ;;  %v6056_v42 = vld [vmem:[%s8950_s2 + $0x6b4] ss:$8 sps:$4 sm:$0xff]  }
 0x13b   :  { %2046 = vmatpush1.bf16.msra.mxu0 %v5963_v43  ;;  %v6054_v43 = vld [vmem:[%s8950_s2 + $0x6b0] ss:$8 sps:$4 sm:$0xff]  }
 0x13c   :  { %2047 = vmatprep.subr.bf16.mxu0 %v5968_v44  ;;  %v6059_v44 = vld [vmem:[%s8950_s2 + $0x6c4] ss:$8 sps:$4 sm:$0xff]  }
 0x13f   :  { %2048 = vmatpush1.bf16.msra.mxu0 %v5966_v45  ;;  %v6057_v45 = vld [vmem:[%s8950_s2 + $0x6c0] ss:$8 sps:$4 sm:$0xff]  }
 0x140   :  { %2058 = vmatprep.subr.bf16.mxu0 %v5973_v46  ;;  %v6062_v46 = vld [vmem:[%s8950_s2 + $0x6d4] ss:$8 sps:$4 sm:$0xff]  }
 0x142   :  { %2050 = vmatmul.mubr.bf16.vlgmr.msra.gmra.mrb[0].mxu0 %v5031_v48  ;;  %v6065_v48 = vld [vmem:[%s8950_s2 + $0x6e4] ss:$8 sps:$4 sm:$0xff]  }
 0x143   :  { %2059 = vmatpush1.bf16.msra.mxu0 %v5971_v49  ;;  %2090 = vmatprep.mubr.bf16.mxu0 %v5034_v50  ;;  %v6063_v49 = vld [vmem:[%s8950_s2 + $0x6e0] ss:$8 sps:$4 sm:$0xff]   ;;  %v6068_v50 = vld [vmem:[%s8950_s2 + $0x6f4] ss:$8 sps:$4 sm:$0xff]  }
 0x144   :  { %2060 = vmatprep.subr.bf16.mxu0 %v5976_v51  ;;  %v6066_v51 = vld [vmem:[%s8950_s2 + $0x6f0] ss:$8 sps:$4 sm:$0xff]  }
 0x147   :  { %2061 = vmatpush1.bf16.msra.mxu0 %v5974_v52  ;;  %v6073_v52 = vld [vmem:[%s8950_s2 + $0x704] ss:$8 sps:$4 sm:$0xff]  }
 0x148   :  { %2062 = vmatprep.subr.bf16.mxu0 %v5979_v53  ;;  %v7585_v53 = vld [vmem:[%s8948_s0 + $0x38] sm:$0xff] }
 0x14b   :  { %2063 = vmatpush1.bf16.msra.mxu0 %v5977_v54  ;;  %v5035_v54 = vcombine.low %v7480_v18, %v7480_v18  ;;  %v6094_v18 = vld [vmem:[%s8950_s2 + $0x774] ss:$8 sps:$4 sm:$0xff]  }
 0x14c   :  { %2064 = vmatprep.subr.bf16.mxu0 %v5982_v55  ;;  %v6071_v55 = vld [vmem:[%s8950_s2 + $0x700] ss:$8 sps:$4 sm:$0xff]  }
 0x14f   :  { %2065 = vmatpush1.bf16.msra.mxu0 %v5980_v56  ;;  %v5038_v56 = vcombine.high %v7585_v53, %v7585_v53 }
 0x150   :  { %2066 = vmatprep.subr.bf16.mxu0 %v5985_v57  ;;  %v6076_v57 = vld [vmem:[%s8950_s2 + $0x714] ss:$8 sps:$4 sm:$0xff]  }
 0x153   :  { %2067 = vmatpush1.bf16.msra.mxu0 %v5983_v58  ;;  %v6171_v58 = vld [vmem:[%s8952_s4 + $0x4] ss:$8 sps:$4 sm:$0xff]  }
 0x154   :  { %2068 = vmatprep.subr.bf16.mxu0 %v5988_v59  ;;  %v6173_v59 = vld [vmem:[%s8952_s4] ss:$8 sps:$4 sm:$0xff]   ;;  %2430 = vmatprep.subr.bf16.mxu1 %v6171_v58  ;;  %v6124_v58 = vld [vmem:[%s8950_s2 + $0x810] ss:$8 sps:$4 sm:$0xff]  }
 0x155   :  { %2431 = vmatpush1.bf16.msra.mxu1 %v6173_v59  ;;  %v6127_v59 = vld [vmem:[%s8950_s2 + $0x820] ss:$8 sps:$4 sm:$0xff]  }
 0x157   :  { %2069 = vmatpush1.bf16.msra.mxu0 %v5986_v60  ;;  %v6174_v60 = vld [vmem:[%s8952_s4 + $0x14] ss:$8 sps:$4 sm:$0xff]  }
 0x158   :  { %2070 = vmatprep.subr.bf16.mxu0 %v5991_v61  ;;  %v6074_v61 = vld [vmem:[%s8950_s2 + $0x710] ss:$8 sps:$4 sm:$0xff]   ;;  %2432 = vmatprep.subr.bf16.mxu1 %v6174_v60  ;;  %v6132_v60 = vld [vmem:[%s8950_s2 + $0x834] ss:$8 sps:$4 sm:$0xff]  }
 0x15b   :  { %2071 = vmatpush1.bf16.msra.mxu0 %v5989_v62  ;;  %v6079_v62 = vld [vmem:[%s8950_s2 + $0x724] ss:$8 sps:$4 sm:$0xff]  }
 0x15c   :  { %2072 = vmatprep.subr.bf16.mxu0 %v5994_v63  ;;  %v6176_v63 = vld [vmem:[%s8952_s4 + $0x10] ss:$8 sps:$4 sm:$0xff]  }
 0x15d   :  { %2433 = vmatpush1.bf16.msra.mxu1 %v6176_v63  ;;  %v6133_v63 = vld [vmem:[%s8950_s2 + $0x840] ss:$8 sps:$4 sm:$0xff]  }
 0x15f   :  { %2073 = vmatpush1.bf16.msra.mxu0 %v5992_v0  ;;  %v6177_v0 = vld [vmem:[%s8952_s4 + $0x24] ss:$8 sps:$4 sm:$0xff]  }
 0x160   :  { %2074 = vmatprep.subr.bf16.mxu0 %v5997_v1  ;;  %v6077_v1 = vld [vmem:[%s8950_s2 + $0x720] ss:$8 sps:$4 sm:$0xff]   ;;  %2434 = vmatprep.subr.bf16.mxu1 %v6177_v0  ;;  %v6138_v0 = vld [vmem:[%s8950_s2 + $0x854] ss:$8 sps:$4 sm:$0xff]  }
 0x163   :  { %2075 = vmatpush1.bf16.msra.mxu0 %v5995_v2  ;;  %v6082_v2 = vld [vmem:[%s8950_s2 + $0x734] ss:$8 sps:$4 sm:$0xff]  }
 0x164   :  { %2076 = vmatprep.subr.bf16.mxu0 %v6000_v3  ;;  %v6179_v3 = vld [vmem:[%s8952_s4 + $0x20] ss:$8 sps:$4 sm:$0xff]  }
 0x165   :  { %2435 = vmatpush1.bf16.msra.mxu1 %v6179_v3  ;;  %v6139_v3 = vld [vmem:[%s8950_s2 + $0x860] ss:$8 sps:$4 sm:$0xff]  }
 0x167   :  { %2077 = vmatpush1.bf16.msra.mxu0 %v5998_v4  ;;  %v6180_v4 = vld [vmem:[%s8952_s4 + $0x34] ss:$8 sps:$4 sm:$0xff]  }
 0x168   :  { %2078 = vmatprep.subr.bf16.mxu0 %v6003_v5  ;;  %v6080_v5 = vld [vmem:[%s8950_s2 + $0x730] ss:$8 sps:$4 sm:$0xff]   ;;  %2436 = vmatprep.subr.bf16.mxu1 %v6180_v4  ;;  %v6144_v4 = vld [vmem:[%s8950_s2 + $0x874] ss:$8 sps:$4 sm:$0xff]  }
 0x16b   :  { %2079 = vmatpush1.bf16.msra.mxu0 %v6001_v6  ;;  %v6085_v6 = vld [vmem:[%s8950_s2 + $0x744] ss:$8 sps:$4 sm:$0xff]  }
 0x16c   :  { %2080 = vmatprep.subr.bf16.mxu0 %v6006_v7  ;;  %v6182_v7 = vld [vmem:[%s8952_s4 + $0x30] ss:$8 sps:$4 sm:$0xff]  }
 0x16d   :  { %2437 = vmatpush1.bf16.msra.mxu1 %v6182_v7  ;;  %v6145_v7 = vld [vmem:[%s8950_s2 + $0x880] ss:$8 sps:$4 sm:$0xff]  }
 0x16f   :  { %2081 = vmatpush1.bf16.msra.mxu0 %v6004_v8  ;;  %v6183_v8 = vld [vmem:[%s8952_s4 + $0x44] ss:$8 sps:$4 sm:$0xff]  }
 0x170   :  { %2082 = vmatprep.subr.bf16.mxu0 %v6009_v9  ;;  %v6083_v9 = vld [vmem:[%s8950_s2 + $0x740] ss:$8 sps:$4 sm:$0xff]   ;;  %2438 = vmatprep.subr.bf16.mxu1 %v6183_v8  ;;  %v6150_v8 = vld [vmem:[%s8950_s2 + $0x894] ss:$8 sps:$4 sm:$0xff]  }
 0x173   :  { %2083 = vmatpush1.bf16.msra.mxu0 %v6007_v10  ;;  %v6088_v10 = vld [vmem:[%s8950_s2 + $0x754] ss:$8 sps:$4 sm:$0xff]  }
 0x174   :  { %2084 = vmatprep.subr.bf16.mxu0 %v6012_v11  ;;  %v6185_v11 = vld [vmem:[%s8952_s4 + $0x40] ss:$8 sps:$4 sm:$0xff]  }
 0x175   :  { %2439 = vmatpush1.bf16.msra.mxu1 %v6185_v11  ;;  %v6151_v11 = vld [vmem:[%s8950_s2 + $0x8a0] ss:$8 sps:$4 sm:$0xff]  }
 0x177   :  { %2085 = vmatpush1.bf16.msra.mxu0 %v6010_v12  ;;  %v6186_v12 = vld [vmem:[%s8952_s4 + $0x54] ss:$8 sps:$4 sm:$0xff]  }
 0x178   :  { %2086 = vmatprep.subr.bf16.mxu0 %v6015_v13  ;;  %v6086_v13 = vld [vmem:[%s8950_s2 + $0x750] ss:$8 sps:$4 sm:$0xff]   ;;  %2440 = vmatprep.subr.bf16.mxu1 %v6186_v12  ;;  %v6156_v12 = vld [vmem:[%s8950_s2 + $0x8b4] ss:$8 sps:$4 sm:$0xff]  }
 0x17b   :  { %2087 = vmatpush1.bf16.msra.mxu0 %v6013_v14  ;;  %v6091_v14 = vld [vmem:[%s8950_s2 + $0x764] ss:$8 sps:$4 sm:$0xff]  }
 0x17c   :  { %2088 = vmatprep.subr.bf16.mxu0 %v6018_v15  ;;  %v6188_v15 = vld [vmem:[%s8952_s4 + $0x50] ss:$8 sps:$4 sm:$0xff]  }
 0x17d   :  { %2441 = vmatpush1.bf16.msra.mxu1 %v6188_v15  ;;  %v6157_v15 = vld [vmem:[%s8950_s2 + $0x8c0] ss:$8 sps:$4 sm:$0xff]  }
 0x17f   :  { %2089 = vmatpush1.bf16.msra.mxu0 %v6016_v16  ;;  %v6189_v16 = vld [vmem:[%s8952_s4 + $0x64] ss:$8 sps:$4 sm:$0xff]  }
 0x180   :  { %2099 = vmatprep.subr.bf16.mxu0 %v6023_v17  ;;  %v6089_v17 = vld [vmem:[%s8950_s2 + $0x760] ss:$8 sps:$4 sm:$0xff]   ;;  %2442 = vmatprep.subr.bf16.mxu1 %v6189_v16  ;;  %v6162_v16 = vld [vmem:[%s8950_s2 + $0x8d4] ss:$8 sps:$4 sm:$0xff]  }
 0x182   :  { %2091 = vmatmul.mubr.bf16.vlgmr.msra.gmra.mrb[0].mxu0 %v5033_v19  ;;  %v6191_v19 = vld [vmem:[%s8952_s4 + $0x60] ss:$8 sps:$4 sm:$0xff]  }
 0x183   :  { %2100 = vmatpush1.bf16.msra.mxu0 %v6021_v20  ;;  %2131 = vmatprep.mubr.bf16.mxu0 %v5036_v21  ;;  %v6192_v20 = vld [vmem:[%s8952_s4 + $0x74] ss:$8 sps:$4 sm:$0xff]   ;;  %v6092_v21 = vld [vmem:[%s8950_s2 + $0x770] ss:$8 sps:$4 sm:$0xff]  }
 0x184   :  { %2101 = vmatprep.subr.bf16.mxu0 %v6026_v22  ;;  %v6097_v22 = vld [vmem:[%s8950_s2 + $0x784] ss:$8 sps:$4 sm:$0xff]   ;;  %2443 = vmatpush1.bf16.msra.mxu1 %v6191_v19  ;;  %v6163_v19 = vld [vmem:[%s8950_s2 + $0x8e0] ss:$8 sps:$4 sm:$0xff]  }
 0x185   :  { %2444 = vmatprep.subr.bf16.mxu1 %v6192_v20  ;;  %v6168_v20 = vld [vmem:[%s8950_s2 + $0x8f4] ss:$8 sps:$4 sm:$0xff]  }
 0x187   :  { %2102 = vmatpush1.bf16.msra.mxu0 %v6024_v23  ;;  %v6194_v23 = vld [vmem:[%s8952_s4 + $0x70] ss:$8 sps:$4 sm:$0xff]  }
 0x188   :  { %2103 = vmatprep.subr.bf16.mxu0 %v6029_v24  ;;  %v6195_v24 = vld [vmem:[%s8952_s4 + $0x84] ss:$8 sps:$4 sm:$0xff]   ;;  %2445 = vmatpush1.bf16.msra.mxu1 %v6194_v23 }
 0x189   :  { %2446 = vmatprep.subr.bf16.mxu1 %v6195_v24  ;;  %v6213_v23 = vld [vmem:[%s8952_s4 + $0xe4] ss:$8 sps:$4 sm:$0xff]   ;;  %v6215_v24 = vld [vmem:[%s8952_s4 + $0xe0] ss:$8 sps:$4 sm:$0xff]  }
 0x18b   :  { %2104 = vmatpush1.bf16.msra.mxu0 %v6027_v25  ;;  %v6095_v25 = vld [vmem:[%s8950_s2 + $0x780] ss:$8 sps:$4 sm:$0xff]  }
 0x18c   :  { %2105 = vmatprep.subr.bf16.mxu0 %v6032_v26  ;;  %v6100_v26 = vld [vmem:[%s8950_s2 + $0x794] ss:$8 sps:$4 sm:$0xff]  }
 0x18f   :  { %2106 = vmatpush1.bf16.msra.mxu0 %v6030_v27  ;;  %v6197_v27 = vld [vmem:[%s8952_s4 + $0x80] ss:$8 sps:$4 sm:$0xff]  }
 0x190   :  { %2107 = vmatprep.subr.bf16.mxu0 %v6035_v28  ;;  %v6198_v28 = vld [vmem:[%s8952_s4 + $0x94] ss:$8 sps:$4 sm:$0xff]   ;;  %2447 = vmatpush1.bf16.msra.mxu1 %v6197_v27  ;;  %v6221_v27 = vld [vmem:[%s8954_s6 + $0x4] ss:$8 sps:$4 sm:$0xff]  }
 0x191   :  { %2448 = vmatprep.subr.bf16.mxu1 %v6198_v28  ;;  %v340_v28 = vlaneseq }
 0x193   :  { %2108 = vmatpush1.bf16.msra.mxu0 %v6033_v29  ;;  %v6098_v29 = vld [vmem:[%s8950_s2 + $0x790] ss:$8 sps:$4 sm:$0xff]  }
 0x194   :  { %2109 = vmatprep.subr.bf16.mxu0 %v6038_v30  ;;  %v6103_v30 = vld [vmem:[%s8950_s2 + $0x7a4] ss:$8 sps:$4 sm:$0xff]  }
 0x197   :  { %2110 = vmatpush1.bf16.msra.mxu0 %v6036_v31  ;;  %v6200_v31 = vld [vmem:[%s8952_s4 + $0x90] ss:$8 sps:$4 sm:$0xff]  }
 0x198   :  { %2111 = vmatprep.subr.bf16.mxu0 %v6041_v32  ;;  %v6201_v32 = vld [vmem:[%s8952_s4 + $0xa4] ss:$8 sps:$4 sm:$0xff]   ;;  %2449 = vmatpush1.bf16.msra.mxu1 %v6200_v31  ;;  %v338_v31 = vld [vmem:[%s8951_s3] sm:$0x3] }
 0x199   :  { %2450 = vmatprep.subr.bf16.mxu1 %v6201_v32 }
 0x19b   :  { %2112 = vmatpush1.bf16.msra.mxu0 %v6039_v33  ;;  %v6101_v33 = vld [vmem:[%s8950_s2 + $0x7a0] ss:$8 sps:$4 sm:$0xff]  }
 0x19c   :  { %2113 = vmatprep.subr.bf16.mxu0 %v6044_v34  ;;  %v6106_v34 = vld [vmem:[%s8950_s2 + $0x7b4] ss:$8 sps:$4 sm:$0xff]  }
 0x19f   :  { %2114 = vmatpush1.bf16.msra.mxu0 %v6042_v35  ;;  %v6203_v35 = vld [vmem:[%s8952_s4 + $0xa0] ss:$8 sps:$4 sm:$0xff]  }
 0x1a0   :  { %2115 = vmatprep.subr.bf16.mxu0 %v6047_v36  ;;  %v6204_v36 = vld [vmem:[%s8952_s4 + $0xb4] ss:$8 sps:$4 sm:$0xff]   ;;  %2451 = vmatpush1.bf16.msra.mxu1 %v6203_v35 }
 0x1a1   :  { %2452 = vmatprep.subr.bf16.mxu1 %v6204_v36 }
 0x1a3   :  { %2116 = vmatpush1.bf16.msra.mxu0 %v6045_v37  ;;  %v6104_v37 = vld [vmem:[%s8950_s2 + $0x7b0] ss:$8 sps:$4 sm:$0xff]  }
 0x1a4   :  { %2117 = vmatprep.subr.bf16.mxu0 %v6050_v38  ;;  %v6109_v38 = vld [vmem:[%s8950_s2 + $0x7c4] ss:$8 sps:$4 sm:$0xff]  }
 0x1a7   :  { %2118 = vmatpush1.bf16.msra.mxu0 %v6048_v39  ;;  %v6206_v39 = vld [vmem:[%s8952_s4 + $0xb0] ss:$8 sps:$4 sm:$0xff]  }
 0x1a8   :  { %2119 = vmatprep.subr.bf16.mxu0 %v6053_v40  ;;  %v6207_v40 = vld [vmem:[%s8952_s4 + $0xc4] ss:$8 sps:$4 sm:$0xff]   ;;  %2453 = vmatpush1.bf16.msra.mxu1 %v6206_v39 }
 0x1a9   :  { %2454 = vmatprep.subr.bf16.mxu1 %v6207_v40 }
 0x1ab   :  { %2120 = vmatpush1.bf16.msra.mxu0 %v6051_v41  ;;  %v6107_v41 = vld [vmem:[%s8950_s2 + $0x7c0] ss:$8 sps:$4 sm:$0xff]  }
 0x1ac   :  { %2121 = vmatprep.subr.bf16.mxu0 %v6056_v42  ;;  %v6112_v42 = vld [vmem:[%s8950_s2 + $0x7d4] ss:$8 sps:$4 sm:$0xff]  }
 0x1af   :  { %2122 = vmatpush1.bf16.msra.mxu0 %v6054_v43  ;;  %v6209_v43 = vld [vmem:[%s8952_s4 + $0xc0] ss:$8 sps:$4 sm:$0xff]  }
 0x1b0   :  { %2123 = vmatprep.subr.bf16.mxu0 %v6059_v44  ;;  %v6210_v44 = vld [vmem:[%s8952_s4 + $0xd4] ss:$8 sps:$4 sm:$0xff]   ;;  %2455 = vmatpush1.bf16.msra.mxu1 %v6209_v43 }
 0x1b1   :  { %2456 = vmatprep.subr.bf16.mxu1 %v6210_v44  ;;  %v6219_v44 = vld [vmem:[%s8954_s6] ss:$8 sps:$4 sm:$0xff]  }
 0x1b3   :  { %2124 = vmatpush1.bf16.msra.mxu0 %v6057_v45  ;;  %v6110_v45 = vld [vmem:[%s8950_s2 + $0x7d0] ss:$8 sps:$4 sm:$0xff]  }
 0x1b4   :  { %2125 = vmatprep.subr.bf16.mxu0 %v6062_v46  ;;  %v6115_v46 = vld [vmem:[%s8950_s2 + $0x7e4] ss:$8 sps:$4 sm:$0xff]  }
 0x1b7   :  { %2126 = vmatpush1.bf16.msra.mxu0 %v6060_v47  ;;  %v6212_v47 = vld [vmem:[%s8952_s4 + $0xd0] ss:$8 sps:$4 sm:$0xff]  }
 0x1b8   :  { %2127 = vmatprep.subr.bf16.mxu0 %v6065_v48  ;;  %v6113_v48 = vld [vmem:[%s8950_s2 + $0x7e0] ss:$8 sps:$4 sm:$0xff]   ;;  %2457 = vmatpush1.bf16.msra.mxu1 %v6212_v47  ;;  %v6222_v47 = vld [vmem:[%s8954_s6 + $0x10] ss:$8 sps:$4 sm:$0xff]  }
 0x1b9   :  { %2458 = vmatprep.subr.bf16.mxu1 %v6213_v23  ;;  %v6320_v23 = vld [vmem:[%s8956_s8 + $0x704] ss:$72 sps:$4 sm:$0xff]  }
 0x1bb   :  { %2128 = vmatpush1.bf16.msra.mxu0 %v6063_v49  ;;  %v6118_v49 = vld [vmem:[%s8950_s2 + $0x7f4] ss:$8 sps:$4 sm:$0xff]  }
 0x1bc   :  { %2129 = vmatprep.subr.bf16.mxu0 %v6068_v50  ;;  %v6116_v50 = vld [vmem:[%s8950_s2 + $0x7f0] ss:$8 sps:$4 sm:$0xff]   ;;  %2459 = vmatpush1.bf16.msra.mxu1 %v6215_v24 }
 0x1bd   :  { %v6324_v24 = vld [vmem:[%s8956_s8 + $0x790] ss:$72 sps:$4 sm:$0xff]  }
 0x1bf   :  { %2130 = vmatpush1.bf16.msra.mxu0 %v6066_v51  ;;  %v6123_v51 = vld [vmem:[%s8950_s2 + $0x804] ss:$8 sps:$4 sm:$0xff]  }
 0x1c0   :  { %2140 = vmatprep.subr.bf16.mxu0 %v6073_v52  ;;  %v7774_v52 = vld [vmem:[%s8948_s0 + $0x40] sm:$0xff] }
 0x1c2   :  { %2132 = vmatmul.mubr.bf16.vlgmr.msra.gmra.mrb[0].mxu0 %v5035_v54  ;;  %v5037_v54 = vcombine.low %v7585_v53, %v7585_v53  ;;  %v6129_v53 = vld [vmem:[%s8950_s2 + $0x824] ss:$8 sps:$4 sm:$0xff]  }
 0x1c3   :  { %2141 = vmatpush1.bf16.msra.mxu0 %v6071_v55  ;;  %2172 = vmatprep.mubr.bf16.mxu0 %v5038_v56  ;;  %v6121_v55 = vld [vmem:[%s8950_s2 + $0x800] ss:$8 sps:$4 sm:$0xff]   ;;  %v5040_v56 = vcombine.high %v7774_v52, %v7774_v52 }
 0x1c4   :  { %2142 = vmatprep.subr.bf16.mxu0 %v6076_v57  ;;  %v6126_v57 = vld [vmem:[%s8950_s2 + $0x814] ss:$8 sps:$4 sm:$0xff]  }
 0x1c7   :  { %2143 = vmatpush1.bf16.msra.mxu0 %v6074_v61  ;;  %v6130_v61 = vld [vmem:[%s8950_s2 + $0x830] ss:$8 sps:$4 sm:$0xff]  }
 0x1c8   :  { %2144 = vmatprep.subr.bf16.mxu0 %v6079_v62  ;;  %v6135_v62 = vld [vmem:[%s8950_s2 + $0x844] ss:$8 sps:$4 sm:$0xff]  }
 0x1cb   :  { %2145 = vmatpush1.bf16.msra.mxu0 %v6077_v1  ;;  %v6136_v1 = vld [vmem:[%s8950_s2 + $0x850] ss:$8 sps:$4 sm:$0xff]  }
 0x1cc   :  { %2146 = vmatprep.subr.bf16.mxu0 %v6082_v2  ;;  %v6141_v2 = vld [vmem:[%s8950_s2 + $0x864] ss:$8 sps:$4 sm:$0xff]  }
 0x1cf   :  { %2147 = vmatpush1.bf16.msra.mxu0 %v6080_v5  ;;  %v6142_v5 = vld [vmem:[%s8950_s2 + $0x870] ss:$8 sps:$4 sm:$0xff]  }
 0x1d0   :  { %2148 = vmatprep.subr.bf16.mxu0 %v6085_v6  ;;  %v6147_v6 = vld [vmem:[%s8950_s2 + $0x884] ss:$8 sps:$4 sm:$0xff]  }
 0x1d3   :  { %2149 = vmatpush1.bf16.msra.mxu0 %v6083_v9  ;;  %v6148_v9 = vld [vmem:[%s8950_s2 + $0x890] ss:$8 sps:$4 sm:$0xff]  }
 0x1d4   :  { %2150 = vmatprep.subr.bf16.mxu0 %v6088_v10  ;;  %v6153_v10 = vld [vmem:[%s8950_s2 + $0x8a4] ss:$8 sps:$4 sm:$0xff]  }
 0x1d7   :  { %2151 = vmatpush1.bf16.msra.mxu0 %v6086_v13  ;;  %v6154_v13 = vld [vmem:[%s8950_s2 + $0x8b0] ss:$8 sps:$4 sm:$0xff]  }
 0x1d8   :  { %2152 = vmatprep.subr.bf16.mxu0 %v6091_v14  ;;  %v6159_v14 = vld [vmem:[%s8950_s2 + $0x8c4] ss:$8 sps:$4 sm:$0xff]  }
 0x1db   :  { %2153 = vmatpush1.bf16.msra.mxu0 %v6089_v17  ;;  %v6160_v17 = vld [vmem:[%s8950_s2 + $0x8d0] ss:$8 sps:$4 sm:$0xff]  }
 0x1dc   :  { %2154 = vmatprep.subr.bf16.mxu0 %v6094_v18  ;;  %v6165_v18 = vld [vmem:[%s8950_s2 + $0x8e4] ss:$8 sps:$4 sm:$0xff]  }
 0x1df   :  { %2155 = vmatpush1.bf16.msra.mxu0 %v6092_v21  ;;  %v6166_v21 = vld [vmem:[%s8950_s2 + $0x8f0] ss:$8 sps:$4 sm:$0xff]  }
 0x1e0   :  { %2156 = vmatprep.subr.bf16.mxu0 %v6097_v22  ;;  %v5039_v22 = vcombine.low %v7774_v52, %v7774_v52  ;;  %v6233_v52 = vld [vmem:[%s8954_s6 + $0x44] ss:$8 sps:$4 sm:$0xff]  }
 0x1e3   :  { %2157 = vmatpush1.bf16.msra.mxu0 %v6095_v25  ;;  %v6216_v25 = vld [vmem:[%s8952_s4 + $0xf4] ss:$8 sps:$4 sm:$0xff]  }
 0x1e4   :  { %2158 = vmatprep.subr.bf16.mxu0 %v6100_v26  ;;  %v6218_v26 = vld [vmem:[%s8952_s4 + $0xf0] ss:$8 sps:$4 sm:$0xff]   ;;  %2460 = vmatprep.subr.bf16.mxu1 %v6216_v25  ;;  %v6326_v25 = vld [vmem:[%s8956_s8 + $0x794] ss:$72 sps:$4 sm:$0xff]  }
 0x1e5   :  { %2461 = vmatpush1.bf16.msra.mxu1 %v6218_v26  ;;  %v2258_v26 = vld [vmem:[%s8953_s5] sm:$0x3] }
 0x1e6   :  { %2586 = vmatprep.subr.bf16.mxu1 %v6221_v27 }
 0x1e7   :  { %2159 = vmatpush1.bf16.msra.mxu0 %v6098_v29  ;;  %v7890_v29 = vshrl.u32 %v340_v28, 7 }
 0x1e8   :  { %2160 = vmatprep.subr.bf16.mxu0 %v6103_v30 }
 0x1e9   :  { %v7893_v30 = vsub.s32 0, %v7890_v29  ;;  %v7899_v32 = vsub.s32 1, %v7890_v29 }
 0x1eb   :  { %2161 = vmatpush1.bf16.msra.mxu0 %v6101_v33  ;;  %v343_v33 = vrot.slane %v338_v31, %v7893_v30  ;;  %v2263_v27 = vrot.slane %v2258_v26, %v7893_v30  ;;  %v2267_v28 = vrot.slane %v2258_v26, %v7899_v32 }
 0x1ec   :  { %2162 = vmatprep.subr.bf16.mxu0 %v6106_v34  ;;  %v347_v34 = vrot.slane %v338_v31, %v7899_v32 }
 0x1ef   :  { %2163 = vmatpush1.bf16.msra.mxu0 %v6104_v37 }
 0x1f0   :  { %2164 = vmatprep.subr.bf16.mxu0 %v6109_v38 }
 0x1f3   :  { %2165 = vmatpush1.bf16.msra.mxu0 %v6107_v41 }
 0x1f4   :  { %2166 = vmatprep.subr.bf16.mxu0 %v6112_v42 }
 0x1f7   :  { %2167 = vmatpush1.bf16.msra.mxu0 %v6110_v45 }
 0x1f8   :  { %2168 = vmatprep.subr.bf16.mxu0 %v6115_v46  ;;  %v6224_v46 = vld [vmem:[%s8954_s6 + $0x14] ss:$8 sps:$4 sm:$0xff]  }
 0x1fb   :  { %2169 = vmatpush1.bf16.msra.mxu0 %v6113_v48  ;;  %v6227_v48 = vld [vmem:[%s8954_s6 + $0x24] ss:$8 sps:$4 sm:$0xff]  }
 0x1fc   :  { %2170 = vmatprep.subr.bf16.mxu0 %v6118_v49  ;;  %v6225_v49 = vld [vmem:[%s8954_s6 + $0x20] ss:$8 sps:$4 sm:$0xff]  }
 0x1ff   :  { %2171 = vmatpush1.bf16.msra.mxu0 %v6116_v50  ;;  %v6230_v50 = vld [vmem:[%s8954_s6 + $0x34] ss:$8 sps:$4 sm:$0xff]  }
 0x200   :  { %2181 = vmatprep.subr.bf16.mxu0 %v6123_v51  ;;  %v6228_v51 = vld [vmem:[%s8954_s6 + $0x30] ss:$8 sps:$4 sm:$0xff]  }
 0x202   :  { %2173 = vmatmul.mubr.bf16.vlgmr.msra.gmra.mrb[0].mxu0 %v5037_v54  ;;  %v6231_v54 = vld [vmem:[%s8954_s6 + $0x40] ss:$8 sps:$4 sm:$0xff]  }
 0x203   :  { %2182 = vmatpush1.bf16.msra.mxu0 %v6121_v55  ;;  %2213 = vmatprep.mubr.bf16.mxu0 %v5040_v56  ;;  %v6236_v55 = vld [vmem:[%s8954_s6 + $0x54] ss:$8 sps:$4 sm:$0xff]   ;;  %v6234_v56 = vld [vmem:[%s8954_s6 + $0x50] ss:$8 sps:$4 sm:$0xff]  }
 0x204   :  { %2183 = vmatprep.subr.bf16.mxu0 %v6126_v57  ;;  %v6239_v57 = vld [vmem:[%s8954_s6 + $0x64] ss:$8 sps:$4 sm:$0xff]  }
 0x207   :  { %2184 = vmatpush1.bf16.msra.mxu0 %v6124_v58  ;;  %v6783_v58 = vmov 0  }
 0x208   :  { %2185 = vmatprep.subr.bf16.mxu0 %v6129_v53  ;;  %v6237_v53 = vld [vmem:[%s8954_s6 + $0x60] ss:$8 sps:$4 sm:$0xff]  }
 0x20b   :  { %2186 = vmatpush1.bf16.msra.mxu0 %v6127_v59  ;;  %v6242_v59 = vld [vmem:[%s8954_s6 + $0x74] ss:$8 sps:$4 sm:$0xff]  }
 0x20c   :  { %2187 = vmatprep.subr.bf16.mxu0 %v6132_v60  ;;  %v6240_v60 = vld [vmem:[%s8954_s6 + $0x70] ss:$8 sps:$4 sm:$0xff]  }
 0x20f   :  { %2188 = vmatpush1.bf16.msra.mxu0 %v6130_v61  ;;  %v6245_v61 = vld [vmem:[%s8956_s8 + $0x4] ss:$72 sps:$4 sm:$0xff]  }
 0x210   :  { %2189 = vmatprep.subr.bf16.mxu0 %v6135_v62  ;;  %v6246_v62 = vld [vmem:[%s8956_s8 + $0x40] ss:$72 sps:$4 sm:$0xff]  }
 0x213   :  { %2190 = vmatpush1.bf16.msra.mxu0 %v6133_v63  ;;  %v6248_v63 = vld [vmem:[%s8956_s8 + $0x44] ss:$72 sps:$4 sm:$0xff]  }
 0x214   :  { %2191 = vmatprep.subr.bf16.mxu0 %v6138_v0  ;;  %v6252_v0 = vld [vmem:[%s8956_s8 + $0xd0] ss:$72 sps:$4 sm:$0xff]  }
 0x217   :  { %2192 = vmatpush1.bf16.msra.mxu0 %v6136_v1  ;;  %v6254_v1 = vld [vmem:[%s8956_s8 + $0xd4] ss:$72 sps:$4 sm:$0xff]  }
 0x218   :  { %2193 = vmatprep.subr.bf16.mxu0 %v6141_v2  ;;  %v6258_v2 = vld [vmem:[%s8956_s8 + $0x160] ss:$72 sps:$4 sm:$0xff]  }
 0x21b   :  { %2194 = vmatpush1.bf16.msra.mxu0 %v6139_v3  ;;  %v6260_v3 = vld [vmem:[%s8956_s8 + $0x164] ss:$72 sps:$4 sm:$0xff]  }
 0x21c   :  { %2195 = vmatprep.subr.bf16.mxu0 %v6144_v4  ;;  %v6264_v4 = vld [vmem:[%s8956_s8 + $0x1f0] ss:$72 sps:$4 sm:$0xff]  }
 0x21f   :  { %2196 = vmatpush1.bf16.msra.mxu0 %v6142_v5  ;;  %v6266_v5 = vld [vmem:[%s8956_s8 + $0x1f4] ss:$72 sps:$4 sm:$0xff]  }
 0x220   :  { %2197 = vmatprep.subr.bf16.mxu0 %v6147_v6  ;;  %v6270_v6 = vld [vmem:[%s8956_s8 + $0x280] ss:$72 sps:$4 sm:$0xff]  }
 0x223   :  { %2198 = vmatpush1.bf16.msra.mxu0 %v6145_v7  ;;  %v6272_v7 = vld [vmem:[%s8956_s8 + $0x284] ss:$72 sps:$4 sm:$0xff]  }
 0x224   :  { %2199 = vmatprep.subr.bf16.mxu0 %v6150_v8  ;;  %v6276_v8 = vld [vmem:[%s8956_s8 + $0x310] ss:$72 sps:$4 sm:$0xff]  }
 0x227   :  { %2200 = vmatpush1.bf16.msra.mxu0 %v6148_v9  ;;  %v6278_v9 = vld [vmem:[%s8956_s8 + $0x314] ss:$72 sps:$4 sm:$0xff]  }
 0x228   :  { %2201 = vmatprep.subr.bf16.mxu0 %v6153_v10  ;;  %v6282_v10 = vld [vmem:[%s8956_s8 + $0x3a0] ss:$72 sps:$4 sm:$0xff]  }
 0x22b   :  { %2202 = vmatpush1.bf16.msra.mxu0 %v6151_v11  ;;  %v6284_v11 = vld [vmem:[%s8956_s8 + $0x3a4] ss:$72 sps:$4 sm:$0xff]  }
 0x22c   :  { %2203 = vmatprep.subr.bf16.mxu0 %v6156_v12  ;;  %v6288_v12 = vld [vmem:[%s8956_s8 + $0x430] ss:$72 sps:$4 sm:$0xff]  }
 0x22f   :  { %2204 = vmatpush1.bf16.msra.mxu0 %v6154_v13  ;;  %v6290_v13 = vld [vmem:[%s8956_s8 + $0x434] ss:$72 sps:$4 sm:$0xff]  }
 0x230   :  { %2205 = vmatprep.subr.bf16.mxu0 %v6159_v14  ;;  %v6294_v14 = vld [vmem:[%s8956_s8 + $0x4c0] ss:$72 sps:$4 sm:$0xff]  }
 0x233   :  { %2206 = vmatpush1.bf16.msra.mxu0 %v6157_v15  ;;  %v6296_v15 = vld [vmem:[%s8956_s8 + $0x4c4] ss:$72 sps:$4 sm:$0xff]  }
 0x234   :  { %2207 = vmatprep.subr.bf16.mxu0 %v6162_v16  ;;  %v6300_v16 = vld [vmem:[%s8956_s8 + $0x550] ss:$72 sps:$4 sm:$0xff]  }
 0x237   :  { %2208 = vmatpush1.bf16.msra.mxu0 %v6160_v17  ;;  %v6302_v17 = vld [vmem:[%s8956_s8 + $0x554] ss:$72 sps:$4 sm:$0xff]  }
 0x238   :  { %2209 = vmatprep.subr.bf16.mxu0 %v6165_v18  ;;  %v6306_v18 = vld [vmem:[%s8956_s8 + $0x5e0] ss:$72 sps:$4 sm:$0xff]  }
 0x23b   :  { %2210 = vmatpush1.bf16.msra.mxu0 %v6163_v19  ;;  %v6308_v19 = vld [vmem:[%s8956_s8 + $0x5e4] ss:$72 sps:$4 sm:$0xff]  }
 0x23c   :  { %2211 = vmatprep.subr.bf16.mxu0 %v6168_v20  ;;  %v6312_v20 = vld [vmem:[%s8956_s8 + $0x670] ss:$72 sps:$4 sm:$0xff]  }
 0x23f   :  { %2212 = vmatpush1.bf16.msra.mxu0 %v6166_v21  ;;  %v6314_v21 = vld [vmem:[%s8956_s8 + $0x674] ss:$72 sps:$4 sm:$0xff]  }
 0x240   :  { %4783 = vmatprep.subr.bf16.mxu0 %v6248_v63  ;;  %v6297_v63 = vld [vmem:[%s8956_s8 + $0x510] ss:$72 sps:$4 sm:$0xff]  }
 0x242   :  { %2214 = vmatmul.mubr.bf16.vlgmr.msra.gmra.mrb[0].mxu0 %v5039_v22  ;;  %v6318_v22 = vld [vmem:[%s8956_s8 + $0x700] ss:$72 sps:$4 sm:$0xff]  }
 0x243   :  { %4784 = vmatpush1.bf16.msra.mxu0 %v6246_v62  ;;  %v6299_v62 = vld [vmem:[%s8956_s8 + $0x514] ss:$72 sps:$4 sm:$0xff]  }
 0x244   :  { %4785 = vmatprep.subr.bf16.mxu0 %v6254_v1  ;;  %v6303_v1 = vld [vmem:[%s8956_s8 + $0x5a0] ss:$72 sps:$4 sm:$0xff]  }
 0x247   :  { %4786 = vmatpush1.bf16.msra.mxu0 %v6252_v0  ;;  %v6305_v0 = vld [vmem:[%s8956_s8 + $0x5a4] ss:$72 sps:$4 sm:$0xff]  }
 0x248   :  { %4787 = vmatprep.subr.bf16.mxu0 %v6260_v3  ;;  %v6309_v3 = vld [vmem:[%s8956_s8 + $0x630] ss:$72 sps:$4 sm:$0xff]  }
 0x24b   :  { %4788 = vmatpush1.bf16.msra.mxu0 %v6258_v2  ;;  %v6311_v2 = vld [vmem:[%s8956_s8 + $0x634] ss:$72 sps:$4 sm:$0xff]  }
 0x24c   :  { %4789 = vmatprep.subr.bf16.mxu0 %v6266_v5  ;;  %v6315_v5 = vld [vmem:[%s8956_s8 + $0x6c0] ss:$72 sps:$4 sm:$0xff]  }
 0x24f   :  { %4790 = vmatpush1.bf16.msra.mxu0 %v6264_v4  ;;  %v6317_v4 = vld [vmem:[%s8956_s8 + $0x6c4] ss:$72 sps:$4 sm:$0xff]  }
 0x250   :  { %4791 = vmatprep.subr.bf16.mxu0 %v6272_v7  ;;  %v6321_v7 = vld [vmem:[%s8956_s8 + $0x750] ss:$72 sps:$4 sm:$0xff]  }
 0x253   :  { %4792 = vmatpush1.bf16.msra.mxu0 %v6270_v6  ;;  %v6323_v6 = vld [vmem:[%s8956_s8 + $0x754] ss:$72 sps:$4 sm:$0xff]  }
 0x254   :  { %4793 = vmatprep.subr.bf16.mxu0 %v6278_v9  ;;  %v6327_v9 = vld [vmem:[%s8956_s8 + $0x7e0] ss:$72 sps:$4 sm:$0xff]  }
 0x257   :  { %4794 = vmatpush1.bf16.msra.mxu0 %v6276_v8  ;;  %v6329_v8 = vld [vmem:[%s8956_s8 + $0x7e4] ss:$72 sps:$4 sm:$0xff]  }
 0x258   :  { %4795 = vmatprep.subr.bf16.mxu0 %v6284_v11  ;;  %v6330_v11 = vld [vmem:[%s8956_s8 + $0x820] ss:$72 sps:$4 sm:$0xff]  }
 0x25b   :  { %4796 = vmatpush1.bf16.msra.mxu0 %v6282_v10  ;;  %v6332_v10 = vld [vmem:[%s8956_s8 + $0x824] ss:$72 sps:$4 sm:$0xff]  }
 0x25c   :  { %4797 = vmatprep.subr.bf16.mxu0 %v6290_v13  ;;  %v6333_v13 = vld [vmem:[%s8956_s8 + $0x870] ss:$72 sps:$4 sm:$0xff]  }
 0x25f   :  { %4798 = vmatpush1.bf16.msra.mxu0 %v6288_v12  ;;  %v6335_v12 = vld [vmem:[%s8956_s8 + $0x874] ss:$72 sps:$4 sm:$0xff]  }
 0x260   :  { %4799 = vmatprep.subr.bf16.mxu0 %v6296_v15  ;;  %v6336_v15 = vld [vmem:[%s8956_s8 + $0x8b0] ss:$72 sps:$4 sm:$0xff]  }
 0x263   :  { %4800 = vmatpush1.bf16.msra.mxu0 %v6294_v14  ;;  %v6338_v14 = vld [vmem:[%s8956_s8 + $0x8b4] ss:$72 sps:$4 sm:$0xff]  }
 0x264   :  { %4801 = vmatprep.subr.bf16.mxu0 %v6302_v17  ;;  %v2494_v17 = vld [vmem:[%s8955_s7] sm:$0x3] }
 0x267   :  { %4802 = vmatpush1.bf16.msra.mxu0 %v6300_v16  ;;  %v6341_v16 = vld [vmem:[%s8956_s8 + $0xc] ss:$72 sps:$4 sm:$0xff]  }
 0x268   :  { %4803 = vmatprep.subr.bf16.mxu0 %v6308_v19  ;;  %v2503_v19 = vrot.slane %v2494_v17, %v7899_v32 }
 0x26b   :  { %4804 = vmatpush1.bf16.msra.mxu0 %v6306_v18  ;;  %v2499_v18 = vrot.slane %v2494_v17, %v7893_v30  ;;  %v6411_v17 = vld [vmem:[%s8956_s8 + $0x490] ss:$72 sps:$4 sm:$0xff]  }
 0x26c   :  { %4805 = vmatprep.subr.bf16.mxu0 %v6314_v21 }
 0x26f   :  { %4806 = vmatpush1.bf16.msra.mxu0 %v6312_v20 }
 0x270   :  { %4807 = vmatprep.subr.bf16.mxu0 %v6320_v23 }
 0x273   :  { %4808 = vmatpush1.bf16.msra.mxu0 %v6318_v22 }
 0x274   :  { %4809 = vmatprep.subr.bf16.mxu0 %v6326_v25 }
 0x277   :  { %4810 = vmatpush1.bf16.msra.mxu0 %v6324_v24 }
 0x278   :  { %4811 = vmatprep.subr.bf16.mxu0 %v6332_v10  ;;  %v6404_v10 = vld [vmem:[%s8956_s8 + $0x2e4] ss:$72 sps:$4 sm:$0xff]  }
 0x27b   :  { %4812 = vmatpush1.bf16.msra.mxu0 %v6330_v11  ;;  %v6402_v11 = vld [vmem:[%s8956_s8 + $0x2e0] ss:$72 sps:$4 sm:$0xff]  }
 0x27c   :  { %4813 = vmatprep.subr.bf16.mxu0 %v6338_v14  ;;  %v6410_v14 = vld [vmem:[%s8956_s8 + $0x404] ss:$72 sps:$4 sm:$0xff]  }
 0x27f   :  { %4814 = vmatpush1.bf16.msra.mxu0 %v6336_v15  ;;  %v6408_v15 = vld [vmem:[%s8956_s8 + $0x400] ss:$72 sps:$4 sm:$0xff]  }
 0x315   :  { %v2215_v35 = vpop.f32.mrb[0].mxu0 }
 0x316   :  { %v5683_v36 = vadd.f32 %v2215_v35, %v343_v33  ;;  %v2217_v37 = vpop.f32.mrb[1].mxu0 }
 0x317   :  { %v5684_v38 = vadd.f32 %v2217_v37, %v347_v34  ;;  %v2219_v39 = vpop.f32.mrb[2].mxu0 }
 0x318   :  { %v2222_v40 = vmax.f32 %v5683_v36, 0.0  ;;  %v2220_v41 = vpop.f32.mrb[3].mxu0 }
 0x319   :  { %v2223_v42 = vmax.f32 %v5684_v38, 0.0 }
 0x31a   :  { %v2224_v45 = vpack.c.bf16 %v2222_v40, %v2222_v40  ;;  %v2471_v40 = vld [vmem:[%s8949_s1] sm:$0xff] }
 0x31b   :  { %v2225_v43 = vpack.c.bf16 %v2223_v42, %v2223_v42 }
 0x31d   :  { %2462 = vmatprep.mubr.bf16.mxu1 %v2225_v43 }
 0x31e   :  { %2463 = vmatmul.mubr.bf16.vlgmr.msra.gmra.mrb[0].mxu1 %v2224_v45 }
 0x31f   :  { %2587 = vmatpush1.bf16.msra.mxu1 %v6219_v44  ;;  %2618 = vmatprep.mubr.bf16.mxu1 %v6783_v58  ;;  %v6243_v44 = vld [vmem:[%s8956_s8] ss:$72 sps:$4 sm:$0xff]  }
 0x320   :  { %2588 = vmatprep.subr.bf16.mxu1 %v6224_v46  ;;  %v6251_v46 = vld [vmem:[%s8956_s8 + $0x94] ss:$72 sps:$4 sm:$0xff]   ;;  %v6279_v58 = vld [vmem:[%s8956_s8 + $0x360] ss:$72 sps:$4 sm:$0xff]  }
 0x323   :  { %2589 = vmatpush1.bf16.msra.mxu1 %v6222_v47  ;;  %v6249_v47 = vld [vmem:[%s8956_s8 + $0x90] ss:$72 sps:$4 sm:$0xff]  }
 0x324   :  { %2590 = vmatprep.subr.bf16.mxu1 %v6227_v48  ;;  %v6257_v48 = vld [vmem:[%s8956_s8 + $0x124] ss:$72 sps:$4 sm:$0xff]  }
 0x327   :  { %2591 = vmatpush1.bf16.msra.mxu1 %v6225_v49  ;;  %v6255_v49 = vld [vmem:[%s8956_s8 + $0x120] ss:$72 sps:$4 sm:$0xff]  }
 0x328   :  { %2592 = vmatprep.subr.bf16.mxu1 %v6230_v50  ;;  %v6263_v50 = vld [vmem:[%s8956_s8 + $0x1b4] ss:$72 sps:$4 sm:$0xff]  }
 0x32b   :  { %2593 = vmatpush1.bf16.msra.mxu1 %v6228_v51  ;;  %v6261_v51 = vld [vmem:[%s8956_s8 + $0x1b0] ss:$72 sps:$4 sm:$0xff]  }
 0x32c   :  { %2594 = vmatprep.subr.bf16.mxu1 %v6233_v52  ;;  %v6269_v52 = vld [vmem:[%s8956_s8 + $0x244] ss:$72 sps:$4 sm:$0xff]  }
 0x32f   :  { %2595 = vmatpush1.bf16.msra.mxu1 %v6231_v54  ;;  %v6267_v54 = vld [vmem:[%s8956_s8 + $0x240] ss:$72 sps:$4 sm:$0xff]  }
 0x330   :  { %2596 = vmatprep.subr.bf16.mxu1 %v6236_v55  ;;  %v6275_v55 = vld [vmem:[%s8956_s8 + $0x2d4] ss:$72 sps:$4 sm:$0xff]  }
 0x333   :  { %2597 = vmatpush1.bf16.msra.mxu1 %v6234_v56  ;;  %v6273_v56 = vld [vmem:[%s8956_s8 + $0x2d0] ss:$72 sps:$4 sm:$0xff]  }
 0x334   :  { %2598 = vmatprep.subr.bf16.mxu1 %v6239_v57  ;;  %v6281_v57 = vld [vmem:[%s8956_s8 + $0x364] ss:$72 sps:$4 sm:$0xff]  }
 0x337   :  { %2599 = vmatpush1.bf16.msra.mxu1 %v6237_v53  ;;  %v6287_v53 = vld [vmem:[%s8956_s8 + $0x3f4] ss:$72 sps:$4 sm:$0xff]  }
 0x338   :  { %2600 = vmatprep.subr.bf16.mxu1 %v6242_v59  ;;  %v6285_v59 = vld [vmem:[%s8956_s8 + $0x3f0] ss:$72 sps:$4 sm:$0xff]  }
 0x33b   :  { %2601 = vmatpush1.bf16.msra.mxu1 %v6240_v60  ;;  %v6293_v60 = vld [vmem:[%s8956_s8 + $0x484] ss:$72 sps:$4 sm:$0xff]  }
 0x33c   :  { %4455 = vmatprep.subr.bf16.mxu1 %v6245_v61  ;;  %v6291_v61 = vld [vmem:[%s8956_s8 + $0x480] ss:$72 sps:$4 sm:$0xff]  }
 0x3f1   :  { %v2464_v31 = vpop.f32.mrb[0].mxu1 }
 0x3f2   :  { %v2465_v33 = vadd.f32 %v2464_v31, %v2263_v27  ;;  %v2466_v34 = vpop.f32.mrb[1].mxu1  ;;  %v6339_v31 = vld [vmem:[%s8956_s8 + $0x8] ss:$72 sps:$4 sm:$0xff]  }
 0x3f3   :  { %v2467_v35 = vadd.f32 %v2466_v34, %v2267_v28  ;;  %v2468_v36 = vpop.f32.mrb[2].mxu1  ;;  %v6344_v34 = vld [vmem:[%s8956_s8 + $0x9c] ss:$72 sps:$4 sm:$0xff]  }
 0x3f4   :  { %4980 = vst [vmem:[#allocation4] sm:$0xff] %v2465_v33  ;;  %v2469_v37 = vpop.f32.mrb[3].mxu1  ;;  %v6347_v36 = vld [vmem:[%s8956_s8 + $0x12c] ss:$72 sps:$4 sm:$0xff]  }
 0x3f5   :  { %v2472_v38 = vmul.f32 0.5, %v2467_v35  ;;  %4981 = vst [vmem:[#allocation6] sm:$0xff] %v2467_v35  ;;  %v6342_v35 = vld [vmem:[%s8956_s8 + $0x98] ss:$72 sps:$4 sm:$0xff]   ;;  %v6345_v37 = vld [vmem:[%s8956_s8 + $0x128] ss:$72 sps:$4 sm:$0xff]  }
 0x3f7   :  { %v2473_v39 = vmul.f32 1.442695, %v2472_v38  ;;  %v6350_v38 = vld [vmem:[%s8956_s8 + $0x1bc] ss:$72 sps:$4 sm:$0xff]  }
 0x3f9   :  { %6675 = vpow2.f32 %v2473_v39  ;;  %v6348_v39 = vld [vmem:[%s8956_s8 + $0x1b8] ss:$72 sps:$4 sm:$0xff]  }
 0x403   :  { %v6676_v41 = vpop.eup %6675 }
 0x404   :  { %v2475_v42 = vmul.f32 %v6676_v41, %v2471_v40  ;;  %v6353_v40 = vld [vmem:[%s8956_s8 + $0x24c] ss:$72 sps:$4 sm:$0xff]   ;;  %v6351_v41 = vld [vmem:[%s8956_s8 + $0x248] ss:$72 sps:$4 sm:$0xff]  }
 0x406   :  { %v2476_v43 = vadd.f32 %v2475_v42, %v2465_v33  ;;  %v6356_v42 = vld [vmem:[%s8956_s8 + $0x2dc] ss:$72 sps:$4 sm:$0xff]  }
 0x408   :  { %v2477_v45 = vpack.c.bf16 %v2476_v43, %v2476_v43  ;;  %v6354_v43 = vld [vmem:[%s8956_s8 + $0x2d8] ss:$72 sps:$4 sm:$0xff]  }
 0x40a   :  { %2619 = vmatmul.mubr.bf16.vlgmr.msra.gmra.mrb[4].mxu1 %v2477_v45  ;;  %v6357_v45 = vld [vmem:[%s8956_s8 + $0x368] ss:$72 sps:$4 sm:$0xff]  }
 0x40b   :  { %4456 = vmatpush1.bf16.msra.mxu1 %v6243_v44  ;;  %v6359_v44 = vld [vmem:[%s8956_s8 + $0x36c] ss:$72 sps:$4 sm:$0xff]  }
 0x40c   :  { %4457 = vmatprep.subr.bf16.mxu1 %v6251_v46  ;;  %v6362_v46 = vld [vmem:[%s8956_s8 + $0x3fc] ss:$72 sps:$4 sm:$0xff]  }
 0x40f   :  { %4458 = vmatpush1.bf16.msra.mxu1 %v6249_v47  ;;  %v6360_v47 = vld [vmem:[%s8956_s8 + $0x3f8] ss:$72 sps:$4 sm:$0xff]  }
 0x410   :  { %4459 = vmatprep.subr.bf16.mxu1 %v6257_v48  ;;  %v6365_v48 = vld [vmem:[%s8956_s8 + $0x48c] ss:$72 sps:$4 sm:$0xff]  }
 0x413   :  { %4460 = vmatpush1.bf16.msra.mxu1 %v6255_v49  ;;  %v6363_v49 = vld [vmem:[%s8956_s8 + $0x488] ss:$72 sps:$4 sm:$0xff]  }
 0x414   :  { %4461 = vmatprep.subr.bf16.mxu1 %v6263_v50  ;;  %v6368_v50 = vld [vmem:[%s8956_s8 + $0x51c] ss:$72 sps:$4 sm:$0xff]  }
 0x417   :  { %4462 = vmatpush1.bf16.msra.mxu1 %v6261_v51  ;;  %v6366_v51 = vld [vmem:[%s8956_s8 + $0x518] ss:$72 sps:$4 sm:$0xff]  }
 0x418   :  { %4463 = vmatprep.subr.bf16.mxu1 %v6269_v52  ;;  %v6371_v52 = vld [vmem:[%s8956_s8 + $0x5ac] ss:$72 sps:$4 sm:$0xff]  }
 0x41b   :  { %4464 = vmatpush1.bf16.msra.mxu1 %v6267_v54  ;;  %v6369_v54 = vld [vmem:[%s8956_s8 + $0x5a8] ss:$72 sps:$4 sm:$0xff]  }
 0x41c   :  { %4465 = vmatprep.subr.bf16.mxu1 %v6275_v55  ;;  %v6374_v55 = vld [vmem:[%s8956_s8 + $0x63c] ss:$72 sps:$4 sm:$0xff]  }
 0x41f   :  { %4466 = vmatpush1.bf16.msra.mxu1 %v6273_v56  ;;  %v6372_v56 = vld [vmem:[%s8956_s8 + $0x638] ss:$72 sps:$4 sm:$0xff]  }
 0x420   :  { %4467 = vmatprep.subr.bf16.mxu1 %v6281_v57  ;;  %v6377_v57 = vld [vmem:[%s8956_s8 + $0x6cc] ss:$72 sps:$4 sm:$0xff]  }
 0x423   :  { %4468 = vmatpush1.bf16.msra.mxu1 %v6279_v58  ;;  %v6375_v58 = vld [vmem:[%s8956_s8 + $0x6c8] ss:$72 sps:$4 sm:$0xff]  }
 0x424   :  { %4469 = vmatprep.subr.bf16.mxu1 %v6287_v53  ;;  %v6380_v53 = vld [vmem:[%s8956_s8 + $0x75c] ss:$72 sps:$4 sm:$0xff]  }
 0x427   :  { %4470 = vmatpush1.bf16.msra.mxu1 %v6285_v59  ;;  %v6378_v59 = vld [vmem:[%s8956_s8 + $0x758] ss:$72 sps:$4 sm:$0xff]  }
 0x428   :  { %4471 = vmatprep.subr.bf16.mxu1 %v6293_v60  ;;  %v6383_v60 = vld [vmem:[%s8956_s8 + $0x7ec] ss:$72 sps:$4 sm:$0xff]  }
 0x42b   :  { %4472 = vmatpush1.bf16.msra.mxu1 %v6291_v61  ;;  %v6381_v61 = vld [vmem:[%s8956_s8 + $0x7e8] ss:$72 sps:$4 sm:$0xff]  }
 0x42c   :  { %4473 = vmatprep.subr.bf16.mxu1 %v6299_v62  ;;  %v6386_v62 = vld [vmem:[%s8956_s8 + $0x87c] ss:$72 sps:$4 sm:$0xff]  }
 0x42f   :  { %4474 = vmatpush1.bf16.msra.mxu1 %v6297_v63  ;;  %v6384_v63 = vld [vmem:[%s8956_s8 + $0x878] ss:$72 sps:$4 sm:$0xff]  }
 0x430   :  { %4475 = vmatprep.subr.bf16.mxu1 %v6305_v0  ;;  %v6389_v0 = vld [vmem:[%s8956_s8 + $0x14] ss:$72 sps:$4 sm:$0xff]  }
 0x433   :  { %4476 = vmatpush1.bf16.msra.mxu1 %v6303_v1  ;;  %v6387_v1 = vld [vmem:[%s8956_s8 + $0x10] ss:$72 sps:$4 sm:$0xff]  }
 0x434   :  { %4477 = vmatprep.subr.bf16.mxu1 %v6311_v2  ;;  %v6392_v2 = vld [vmem:[%s8956_s8 + $0xa4] ss:$72 sps:$4 sm:$0xff]  }
 0x437   :  { %4478 = vmatpush1.bf16.msra.mxu1 %v6309_v3  ;;  %v6390_v3 = vld [vmem:[%s8956_s8 + $0xa0] ss:$72 sps:$4 sm:$0xff]  }
 0x438   :  { %4479 = vmatprep.subr.bf16.mxu1 %v6317_v4  ;;  %v6395_v4 = vld [vmem:[%s8956_s8 + $0x134] ss:$72 sps:$4 sm:$0xff]  }
 0x43b   :  { %4480 = vmatpush1.bf16.msra.mxu1 %v6315_v5  ;;  %v6393_v5 = vld [vmem:[%s8956_s8 + $0x130] ss:$72 sps:$4 sm:$0xff]  }
 0x43c   :  { %4481 = vmatprep.subr.bf16.mxu1 %v6323_v6  ;;  %v6398_v6 = vld [vmem:[%s8956_s8 + $0x1c4] ss:$72 sps:$4 sm:$0xff]  }
 0x43f   :  { %4482 = vmatpush1.bf16.msra.mxu1 %v6321_v7  ;;  %v6396_v7 = vld [vmem:[%s8956_s8 + $0x1c0] ss:$72 sps:$4 sm:$0xff]  }
 0x440   :  { %4483 = vmatprep.subr.bf16.mxu1 %v6329_v8  ;;  %v6401_v8 = vld [vmem:[%s8956_s8 + $0x254] ss:$72 sps:$4 sm:$0xff]  }
 0x443   :  { %4484 = vmatpush1.bf16.msra.mxu1 %v6327_v9  ;;  %v6399_v9 = vld [vmem:[%s8956_s8 + $0x250] ss:$72 sps:$4 sm:$0xff]  }
 0x444   :  { %4485 = vmatprep.subr.bf16.mxu1 %v6335_v12  ;;  %v6407_v12 = vld [vmem:[%s8956_s8 + $0x374] ss:$72 sps:$4 sm:$0xff]  }
 0x447   :  { %4486 = vmatpush1.bf16.msra.mxu1 %v6333_v13  ;;  %v6405_v13 = vld [vmem:[%s8956_s8 + $0x370] ss:$72 sps:$4 sm:$0xff]  }
 0x448   :  { %4496 = vmatprep.subr.bf16.mxu1 %v6341_v16  ;;  %v6413_v16 = vld [vmem:[%s8956_s8 + $0x494] ss:$72 sps:$4 sm:$0xff]  }
 0x4dd   :  { %v2620_v20 = vpop.f32.mrb[4].mxu1 }
 0x4de   :  { %v2621_v21 = vadd.f32 %v2620_v20, %v2499_v18  ;;  %v2622_v22 = vpop.f32.mrb[5].mxu1  ;;  %v6416_v18 = vld [vmem:[%s8956_s8 + $0x524] ss:$72 sps:$4 sm:$0xff]   ;;  %v6419_v20 = vld [vmem:[%s8956_s8 + $0x5b4] ss:$72 sps:$4 sm:$0xff]  }
 0x4df   :  { %v2623_v23 = vadd.f32 %v2622_v22, %v2503_v19  ;;  %v2624_v24 = vpop.f32.mrb[6].mxu1  ;;  %v6414_v19 = vld [vmem:[%s8956_s8 + $0x520] ss:$72 sps:$4 sm:$0xff]   ;;  %v6422_v22 = vld [vmem:[%s8956_s8 + $0x644] ss:$72 sps:$4 sm:$0xff]  }
 0x4e0   :  { %v2627_v25 = vmax.f32 %v2621_v21, 0.0  ;;  %v2625_v26 = vpop.f32.mrb[7].mxu1  ;;  %v6417_v21 = vld [vmem:[%s8956_s8 + $0x5b0] ss:$72 sps:$4 sm:$0xff]   ;;  %v6425_v24 = vld [vmem:[%s8956_s8 + $0x6d4] ss:$72 sps:$4 sm:$0xff]  }
 0x4e1   :  { %v2628_v27 = vmax.f32 %v2623_v23, 0.0  ;;  %v6420_v23 = vld [vmem:[%s8956_s8 + $0x640] ss:$72 sps:$4 sm:$0xff]   ;;  %v6428_v26 = vld [vmem:[%s8956_s8 + $0x764] ss:$72 sps:$4 sm:$0xff]  }
 0x4e2   :  { %v8161_v33 = vpack.c.bf16 %v2627_v25, %v2627_v25  ;;  %v6423_v25 = vld [vmem:[%s8956_s8 + $0x6d0] ss:$72 sps:$4 sm:$0xff]  }
 0x4e3   :  { %v8156_v28 = vpack.c.bf16 %v2628_v27, %v2628_v27  ;;  %v6426_v27 = vld [vmem:[%s8956_s8 + $0x760] ss:$72 sps:$4 sm:$0xff]  }
 0x4e5   :  { %4487 = vmatprep.mubr.bf16.mxu1 %v8156_v28  ;;  %4815 = vmatprep.mubr.bf16.mxu0 %v8156_v28 }
 0x4e6   :  { %4488 = vmatmul.mubr.bf16.vlgmr.msra.gmra.mrb[8].mxu1 %v8161_v33  ;;  %4816 = vmatmul.mubr.bf16.vlgmr.msra.gmra.mrb[4].mxu0 %v8161_v33 }
 0x4e7   :  { %4497 = vmatpush1.bf16.msra.mxu1 %v6339_v31  ;;  %4528 = vmatprep.mubr.bf16.mxu1 %v8156_v28  ;;  %v6431_v31 = vld [vmem:[%s8956_s8 + $0x7f4] ss:$72 sps:$4 sm:$0xff]  }
 0x4e8   :  { %4498 = vmatprep.subr.bf16.mxu1 %v6344_v34  ;;  %v6429_v34 = vld [vmem:[%s8956_s8 + $0x7f0] ss:$72 sps:$4 sm:$0xff]  }
 0x4eb   :  { %4499 = vmatpush1.bf16.msra.mxu1 %v6342_v35  ;;  %v6434_v35 = vld [vmem:[%s8956_s8 + $0x884] ss:$72 sps:$4 sm:$0xff]  }
 0x4ec   :  { %4500 = vmatprep.subr.bf16.mxu1 %v6347_v36  ;;  %v6432_v36 = vld [vmem:[%s8956_s8 + $0x880] ss:$72 sps:$4 sm:$0xff]  }
 0x4ef   :  { %4501 = vmatpush1.bf16.msra.mxu1 %v6345_v37  ;;  %v6437_v37 = vld [vmem:[%s8956_s8 + $0x1c] ss:$72 sps:$4 sm:$0xff]  }
 0x4f0   :  { %4502 = vmatprep.subr.bf16.mxu1 %v6350_v38  ;;  %v6435_v38 = vld [vmem:[%s8956_s8 + $0x18] ss:$72 sps:$4 sm:$0xff]  }
 0x4f3   :  { %4503 = vmatpush1.bf16.msra.mxu1 %v6348_v39  ;;  %v6440_v39 = vld [vmem:[%s8956_s8 + $0xac] ss:$72 sps:$4 sm:$0xff]  }
 0x4f4   :  { %4504 = vmatprep.subr.bf16.mxu1 %v6353_v40  ;;  %v6438_v40 = vld [vmem:[%s8956_s8 + $0xa8] ss:$72 sps:$4 sm:$0xff]  }
 0x4f7   :  { %4505 = vmatpush1.bf16.msra.mxu1 %v6351_v41  ;;  %v6443_v41 = vld [vmem:[%s8956_s8 + $0x13c] ss:$72 sps:$4 sm:$0xff]  }
 0x4f8   :  { %4506 = vmatprep.subr.bf16.mxu1 %v6356_v42  ;;  %v6441_v42 = vld [vmem:[%s8956_s8 + $0x138] ss:$72 sps:$4 sm:$0xff]  }
 0x4fb   :  { %4507 = vmatpush1.bf16.msra.mxu1 %v6354_v43  ;;  %v6446_v43 = vld [vmem:[%s8956_s8 + $0x1cc] ss:$72 sps:$4 sm:$0xff]  }
 0x4fc   :  { %4508 = vmatprep.subr.bf16.mxu1 %v6359_v44  ;;  %v6444_v44 = vld [vmem:[%s8956_s8 + $0x1c8] ss:$72 sps:$4 sm:$0xff]  }
 0x4ff   :  { %4509 = vmatpush1.bf16.msra.mxu1 %v6357_v45  ;;  %v6449_v45 = vld [vmem:[%s8956_s8 + $0x25c] ss:$72 sps:$4 sm:$0xff]  }
 0x500   :  { %4510 = vmatprep.subr.bf16.mxu1 %v6362_v46  ;;  %v6447_v46 = vld [vmem:[%s8956_s8 + $0x258] ss:$72 sps:$4 sm:$0xff]  }
 0x503   :  { %4511 = vmatpush1.bf16.msra.mxu1 %v6360_v47  ;;  %v6452_v47 = vld [vmem:[%s8956_s8 + $0x2ec] ss:$72 sps:$4 sm:$0xff]  }
 0x504   :  { %4512 = vmatprep.subr.bf16.mxu1 %v6365_v48  ;;  %v6450_v48 = vld [vmem:[%s8956_s8 + $0x2e8] ss:$72 sps:$4 sm:$0xff]  }
 0x507   :  { %4513 = vmatpush1.bf16.msra.mxu1 %v6363_v49  ;;  %v6455_v49 = vld [vmem:[%s8956_s8 + $0x37c] ss:$72 sps:$4 sm:$0xff]  }
 0x508   :  { %4514 = vmatprep.subr.bf16.mxu1 %v6368_v50  ;;  %v6453_v50 = vld [vmem:[%s8956_s8 + $0x378] ss:$72 sps:$4 sm:$0xff]  }
 0x50b   :  { %4515 = vmatpush1.bf16.msra.mxu1 %v6366_v51  ;;  %v6458_v51 = vld [vmem:[%s8956_s8 + $0x40c] ss:$72 sps:$4 sm:$0xff]  }
 0x50c   :  { %4516 = vmatprep.subr.bf16.mxu1 %v6371_v52  ;;  %v6456_v52 = vld [vmem:[%s8956_s8 + $0x408] ss:$72 sps:$4 sm:$0xff]  }
 0x50f   :  { %4517 = vmatpush1.bf16.msra.mxu1 %v6369_v54  ;;  %v6461_v54 = vld [vmem:[%s8956_s8 + $0x49c] ss:$72 sps:$4 sm:$0xff]  }
 0x510   :  { %4518 = vmatprep.subr.bf16.mxu1 %v6374_v55  ;;  %v6459_v55 = vld [vmem:[%s8956_s8 + $0x498] ss:$72 sps:$4 sm:$0xff]  }
 0x513   :  { %4519 = vmatpush1.bf16.msra.mxu1 %v6372_v56  ;;  %v6464_v56 = vld [vmem:[%s8956_s8 + $0x52c] ss:$72 sps:$4 sm:$0xff]  }
 0x514   :  { %4520 = vmatprep.subr.bf16.mxu1 %v6377_v57  ;;  %v6462_v57 = vld [vmem:[%s8956_s8 + $0x528] ss:$72 sps:$4 sm:$0xff]  }
 0x517   :  { %4521 = vmatpush1.bf16.msra.mxu1 %v6375_v58  ;;  %v6467_v58 = vld [vmem:[%s8956_s8 + $0x5bc] ss:$72 sps:$4 sm:$0xff]  }
 0x518   :  { %4522 = vmatprep.subr.bf16.mxu1 %v6380_v53  ;;  %v6465_v53 = vld [vmem:[%s8956_s8 + $0x5b8] ss:$72 sps:$4 sm:$0xff]  }
 0x51b   :  { %4523 = vmatpush1.bf16.msra.mxu1 %v6378_v59  ;;  %v6470_v59 = vld [vmem:[%s8956_s8 + $0x64c] ss:$72 sps:$4 sm:$0xff]  }
 0x51c   :  { %4524 = vmatprep.subr.bf16.mxu1 %v6383_v60  ;;  %v6468_v60 = vld [vmem:[%s8956_s8 + $0x648] ss:$72 sps:$4 sm:$0xff]  }
 0x51f   :  { %4525 = vmatpush1.bf16.msra.mxu1 %v6381_v61  ;;  %v6473_v61 = vld [vmem:[%s8956_s8 + $0x6dc] ss:$72 sps:$4 sm:$0xff]  }
 0x520   :  { %4526 = vmatprep.subr.bf16.mxu1 %v6386_v62  ;;  %v6471_v62 = vld [vmem:[%s8956_s8 + $0x6d8] ss:$72 sps:$4 sm:$0xff]  }
 0x523   :  { %4527 = vmatpush1.bf16.msra.mxu1 %v6384_v63  ;;  %v6476_v63 = vld [vmem:[%s8956_s8 + $0x76c] ss:$72 sps:$4 sm:$0xff]  }
 0x524   :  { %4537 = vmatprep.subr.bf16.mxu1 %v6389_v0  ;;  %v6474_v0 = vld [vmem:[%s8956_s8 + $0x768] ss:$72 sps:$4 sm:$0xff]  }
 0x526   :  { %4529 = vmatmul.mubr.bf16.vlgmr.msra.gmra.mrb[12].mxu1 %v8161_v33 }
 0x527   :  { %4538 = vmatpush1.bf16.msra.mxu1 %v6387_v1  ;;  %4569 = vmatprep.mubr.bf16.mxu1 %v8156_v28  ;;  %v6479_v1 = vld [vmem:[%s8956_s8 + $0x7fc] ss:$72 sps:$4 sm:$0xff]  }
 0x528   :  { %4539 = vmatprep.subr.bf16.mxu1 %v6392_v2  ;;  %v6477_v2 = vld [vmem:[%s8956_s8 + $0x7f8] ss:$72 sps:$4 sm:$0xff]  }
 0x52b   :  { %4540 = vmatpush1.bf16.msra.mxu1 %v6390_v3  ;;  %v6482_v3 = vld [vmem:[%s8956_s8 + $0x88c] ss:$72 sps:$4 sm:$0xff]  }
 0x52c   :  { %4541 = vmatprep.subr.bf16.mxu1 %v6395_v4  ;;  %v6480_v4 = vld [vmem:[%s8956_s8 + $0x888] ss:$72 sps:$4 sm:$0xff]  }
 0x52f   :  { %4542 = vmatpush1.bf16.msra.mxu1 %v6393_v5  ;;  %v6485_v5 = vld [vmem:[%s8956_s8 + $0x24] ss:$72 sps:$4 sm:$0xff]  }
 0x530   :  { %4543 = vmatprep.subr.bf16.mxu1 %v6398_v6  ;;  %v6483_v6 = vld [vmem:[%s8956_s8 + $0x20] ss:$72 sps:$4 sm:$0xff]  }
 0x533   :  { %4544 = vmatpush1.bf16.msra.mxu1 %v6396_v7  ;;  %v6488_v7 = vld [vmem:[%s8956_s8 + $0xb4] ss:$72 sps:$4 sm:$0xff]  }
 0x534   :  { %4545 = vmatprep.subr.bf16.mxu1 %v6401_v8  ;;  %v6486_v8 = vld [vmem:[%s8956_s8 + $0xb0] ss:$72 sps:$4 sm:$0xff]  }
 0x537   :  { %4546 = vmatpush1.bf16.msra.mxu1 %v6399_v9  ;;  %v6491_v9 = vld [vmem:[%s8956_s8 + $0x144] ss:$72 sps:$4 sm:$0xff]  }
 0x538   :  { %4547 = vmatprep.subr.bf16.mxu1 %v6404_v10  ;;  %v6489_v10 = vld [vmem:[%s8956_s8 + $0x140] ss:$72 sps:$4 sm:$0xff]  }
 0x53b   :  { %4548 = vmatpush1.bf16.msra.mxu1 %v6402_v11  ;;  %v6494_v11 = vld [vmem:[%s8956_s8 + $0x1d4] ss:$72 sps:$4 sm:$0xff]  }
 0x53c   :  { %4549 = vmatprep.subr.bf16.mxu1 %v6407_v12  ;;  %v6492_v12 = vld [vmem:[%s8956_s8 + $0x1d0] ss:$72 sps:$4 sm:$0xff]  }
 0x53f   :  { %4550 = vmatpush1.bf16.msra.mxu1 %v6405_v13  ;;  %v6497_v13 = vld [vmem:[%s8956_s8 + $0x264] ss:$72 sps:$4 sm:$0xff]  }
 0x540   :  { %4551 = vmatprep.subr.bf16.mxu1 %v6410_v14  ;;  %v6495_v14 = vld [vmem:[%s8956_s8 + $0x260] ss:$72 sps:$4 sm:$0xff]  }
 0x543   :  { %4552 = vmatpush1.bf16.msra.mxu1 %v6408_v15  ;;  %v8489_v15 = vld [vmem:[%s8957_s9] sm:$0xff] }
 0x544   :  { %4553 = vmatprep.subr.bf16.mxu1 %v6413_v16  ;;  %v2921_v16 = vld [vmem:[%s8957_s9 + $0x10] sm:$0x3] }
 0x547   :  { %4554 = vmatpush1.bf16.msra.mxu1 %v6411_v17  ;;  %v6500_v17 = vld [vmem:[%s8956_s8 + $0x2f4] ss:$72 sps:$4 sm:$0xff]  }
 0x548   :  { %4555 = vmatprep.subr.bf16.mxu1 %v6416_v18  ;;  %v2928_v18 = vrot.slane %v8489_v15, %v7893_v30 }
 0x54b   :  { %4556 = vmatpush1.bf16.msra.mxu1 %v6414_v19  ;;  %v2992_v19 = vrot.slane %v2921_v16, %v7893_v30 }
 0x54c   :  { %4557 = vmatprep.subr.bf16.mxu1 %v6419_v20  ;;  %v6498_v20 = vld [vmem:[%s8956_s8 + $0x2f0] ss:$72 sps:$4 sm:$0xff]  }
 0x54f   :  { %4558 = vmatpush1.bf16.msra.mxu1 %v6417_v21  ;;  %v2932_v21 = vrot.slane %v8489_v15, %v7899_v32 }
 0x550   :  { %4559 = vmatprep.subr.bf16.mxu1 %v6422_v22  ;;  %v2996_v22 = vrot.slane %v2921_v16, %v7899_v32  ;;  %v6531_v16 = vld [vmem:[%s8956_s8 + $0x28] ss:$72 sps:$4 sm:$0xff]  }
 0x553   :  { %4560 = vmatpush1.bf16.msra.mxu1 %v6420_v23  ;;  %v6503_v23 = vld [vmem:[%s8956_s8 + $0x384] ss:$72 sps:$4 sm:$0xff]  }
 0x554   :  { %4561 = vmatprep.subr.bf16.mxu1 %v6425_v24 }
 0x557   :  { %4562 = vmatpush1.bf16.msra.mxu1 %v6423_v25 }
 0x558   :  { %4563 = vmatprep.subr.bf16.mxu1 %v6428_v26 }
 0x55b   :  { %4564 = vmatpush1.bf16.msra.mxu1 %v6426_v27 }
 0x55c   :  { %4565 = vmatprep.subr.bf16.mxu1 %v6431_v31 }
 0x55f   :  { %4566 = vmatpush1.bf16.msra.mxu1 %v6429_v34 }
 0x560   :  { %4567 = vmatprep.subr.bf16.mxu1 %v6434_v35 }
 0x563   :  { %4568 = vmatpush1.bf16.msra.mxu1 %v6432_v36 }
 0x564   :  { %4578 = vmatprep.subr.bf16.mxu1 %v6437_v37 }
 0x566   :  { %4570 = vmatmul.mubr.bf16.vlgmr.msra.gmra.mrb[16].mxu1 %v8161_v33 }
 0x567   :  { %4579 = vmatpush1.bf16.msra.mxu1 %v6435_v38  ;;  %4610 = vmatprep.mubr.bf16.mxu1 %v8156_v28 }
 0x568   :  { %4580 = vmatprep.subr.bf16.mxu1 %v6440_v39  ;;  %v6501_v39 = vld [vmem:[%s8956_s8 + $0x380] ss:$72 sps:$4 sm:$0xff]  }
 0x56b   :  { %4581 = vmatpush1.bf16.msra.mxu1 %v6438_v40 }
 0x56c   :  { %4582 = vmatprep.subr.bf16.mxu1 %v6443_v41 }
 0x56f   :  { %4583 = vmatpush1.bf16.msra.mxu1 %v6441_v42 }
 0x570   :  { %4584 = vmatprep.subr.bf16.mxu1 %v6446_v43 }
 0x573   :  { %4585 = vmatpush1.bf16.msra.mxu1 %v6444_v44  ;;  %v6506_v44 = vld [vmem:[%s8956_s8 + $0x414] ss:$72 sps:$4 sm:$0xff]  }
 0x574   :  { %4586 = vmatprep.subr.bf16.mxu1 %v6449_v45 }
 0x577   :  { %4587 = vmatpush1.bf16.msra.mxu1 %v6447_v46 }
 0x578   :  { %4588 = vmatprep.subr.bf16.mxu1 %v6452_v47  ;;  %v6504_v47 = vld [vmem:[%s8956_s8 + $0x410] ss:$72 sps:$4 sm:$0xff]  }
 0x57b   :  { %4589 = vmatpush1.bf16.msra.mxu1 %v6450_v48  ;;  %v6509_v48 = vld [vmem:[%s8956_s8 + $0x4a4] ss:$72 sps:$4 sm:$0xff]  }
 0x57c   :  { %4590 = vmatprep.subr.bf16.mxu1 %v6455_v49  ;;  %v6507_v49 = vld [vmem:[%s8956_s8 + $0x4a0] ss:$72 sps:$4 sm:$0xff]  }
 0x57f   :  { %4591 = vmatpush1.bf16.msra.mxu1 %v6453_v50  ;;  %v6512_v50 = vld [vmem:[%s8956_s8 + $0x534] ss:$72 sps:$4 sm:$0xff]  }
 0x580   :  { %4592 = vmatprep.subr.bf16.mxu1 %v6458_v51  ;;  %v6510_v51 = vld [vmem:[%s8956_s8 + $0x530] ss:$72 sps:$4 sm:$0xff]  }
 0x583   :  { %4593 = vmatpush1.bf16.msra.mxu1 %v6456_v52 }
 0x584   :  { %4594 = vmatprep.subr.bf16.mxu1 %v6461_v54  ;;  %v6515_v54 = vld [vmem:[%s8956_s8 + $0x5c4] ss:$72 sps:$4 sm:$0xff]  }
 0x587   :  { %4595 = vmatpush1.bf16.msra.mxu1 %v6459_v55 }
 0x588   :  { %4596 = vmatprep.subr.bf16.mxu1 %v6464_v56 }
 0x58b   :  { %4597 = vmatpush1.bf16.msra.mxu1 %v6462_v57 }
 0x58c   :  { %4598 = vmatprep.subr.bf16.mxu1 %v6467_v58 }
 0x58f   :  { %4599 = vmatpush1.bf16.msra.mxu1 %v6465_v53 }
 0x590   :  { %4600 = vmatprep.subr.bf16.mxu1 %v6470_v59 }
 0x593   :  { %4601 = vmatpush1.bf16.msra.mxu1 %v6468_v60 }
 0x594   :  { %4602 = vmatprep.subr.bf16.mxu1 %v6473_v61  ;;  %v6513_v61 = vld [vmem:[%s8956_s8 + $0x5c0] ss:$72 sps:$4 sm:$0xff]  }
 0x597   :  { %4603 = vmatpush1.bf16.msra.mxu1 %v6471_v62 }
 0x598   :  { %4604 = vmatprep.subr.bf16.mxu1 %v6476_v63 }
 0x59b   :  { %4605 = vmatpush1.bf16.msra.mxu1 %v6474_v0  ;;  %v6518_v0 = vld [vmem:[%s8956_s8 + $0x654] ss:$72 sps:$4 sm:$0xff]  }
 0x59c   :  { %4606 = vmatprep.subr.bf16.mxu1 %v6479_v1 }
 0x59f   :  { %4607 = vmatpush1.bf16.msra.mxu1 %v6477_v2 }
 0x5a0   :  { %4608 = vmatprep.subr.bf16.mxu1 %v6482_v3 }
 0x5a3   :  { %4609 = vmatpush1.bf16.msra.mxu1 %v6480_v4  ;;  %v6516_v4 = vld [vmem:[%s8956_s8 + $0x650] ss:$72 sps:$4 sm:$0xff]  }
 0x5a4   :  { %4619 = vmatprep.subr.bf16.mxu1 %v6485_v5 }
 0x5a6   :  { %4611 = vmatmul.mubr.bf16.vlgmr.msra.gmra.mrb[20].mxu1 %v8161_v33 }
 0x5a7   :  { %4620 = vmatpush1.bf16.msra.mxu1 %v6483_v6  ;;  %4651 = vmatprep.mubr.bf16.mxu1 %v8156_v28  ;;  %v6521_v6 = vld [vmem:[%s8956_s8 + $0x6e4] ss:$72 sps:$4 sm:$0xff]  }
 0x5a8   :  { %4621 = vmatprep.subr.bf16.mxu1 %v6488_v7  ;;  %v6519_v7 = vld [vmem:[%s8956_s8 + $0x6e0] ss:$72 sps:$4 sm:$0xff]  }
 0x5ab   :  { %4622 = vmatpush1.bf16.msra.mxu1 %v6486_v8  ;;  %v6524_v8 = vld [vmem:[%s8956_s8 + $0x774] ss:$72 sps:$4 sm:$0xff]  }
 0x5ac   :  { %4623 = vmatprep.subr.bf16.mxu1 %v6491_v9  ;;  %v6522_v9 = vld [vmem:[%s8956_s8 + $0x770] ss:$72 sps:$4 sm:$0xff]  }
 0x5af   :  { %4624 = vmatpush1.bf16.msra.mxu1 %v6489_v10  ;;  %v6527_v10 = vld [vmem:[%s8956_s8 + $0x804] ss:$72 sps:$4 sm:$0xff]  }
 0x5b0   :  { %4625 = vmatprep.subr.bf16.mxu1 %v6494_v11  ;;  %v6525_v11 = vld [vmem:[%s8956_s8 + $0x800] ss:$72 sps:$4 sm:$0xff]  }
 0x5b3   :  { %4626 = vmatpush1.bf16.msra.mxu1 %v6492_v12  ;;  %v6530_v12 = vld [vmem:[%s8956_s8 + $0x894] ss:$72 sps:$4 sm:$0xff]  }
 0x5b4   :  { %4627 = vmatprep.subr.bf16.mxu1 %v6497_v13  ;;  %v6528_v13 = vld [vmem:[%s8956_s8 + $0x890] ss:$72 sps:$4 sm:$0xff]  }
 0x5b7   :  { %4628 = vmatpush1.bf16.msra.mxu1 %v6495_v14  ;;  %v6533_v14 = vld [vmem:[%s8956_s8 + $0x2c] ss:$72 sps:$4 sm:$0xff]  }
 0x5b8   :  { %4629 = vmatprep.subr.bf16.mxu1 %v6500_v17  ;;  %v6536_v17 = vld [vmem:[%s8956_s8 + $0xbc] ss:$72 sps:$4 sm:$0xff]  }
 0x5b9   :  { %v4489_v24 = vpop.f32.mrb[8].mxu1  ;;  %v4817_v25 = vpop.f32.mrb[4].mxu0 }
 0x5ba   :  { %v4490_v26 = vadd.f32 %v4489_v24, %v2928_v18  ;;  %v4818_v27 = vadd.f32 %v4817_v25, %v2992_v19  ;;  %v4491_v31 = vpop.f32.mrb[9].mxu1  ;;  %v4819_v34 = vpop.f32.mrb[5].mxu0  ;;  %v6534_v18 = vld [vmem:[%s8956_s8 + $0xb8] ss:$72 sps:$4 sm:$0xff]   ;;  %v6539_v19 = vld [vmem:[%s8956_s8 + $0x14c] ss:$72 sps:$4 sm:$0xff]  }
 0x5bb   :  { %v4492_v35 = vadd.f32 %v4491_v31, %v2932_v21  ;;  %4630 = vmatpush1.bf16.msra.mxu1 %v6498_v20  ;;  %v4820_v36 = vadd.f32 %v4819_v34, %v2996_v22  ;;  %v4493_v37 = vpop.f32.mrb[10].mxu1  ;;  %v4821_v38 = vpop.f32.mrb[6].mxu0  ;;  %v6537_v20 = vld [vmem:[%s8956_s8 + $0x148] ss:$72 sps:$4 sm:$0xff]   ;;  %v6542_v21 = vld [vmem:[%s8956_s8 + $0x1dc] ss:$72 sps:$4 sm:$0xff]  }
 0x5bc   :  { %v4824_v40 = vmul.f32 0.5, %v4490_v26  ;;  %v4840_v41 = vmul.f32 0.5, %v4818_v27  ;;  %v4494_v42 = vpop.f32.mrb[11].mxu1  ;;  %v4822_v43 = vpop.f32.mrb[7].mxu0  ;;  %4631 = vmatprep.subr.bf16.mxu1 %v6503_v23  ;;  %v6540_v22 = vld [vmem:[%s8956_s8 + $0x1d8] ss:$72 sps:$4 sm:$0xff]  }
 0x5bd   :  { %v4825_v45 = vmul.f32 0.5, %v4492_v35  ;;  %v4841_v46 = vmul.f32 0.5, %v4820_v36  ;;  %v6545_v23 = vld [vmem:[%s8956_s8 + $0x26c] ss:$72 sps:$4 sm:$0xff]   ;;  %v2935_v24 = vsub.s32 2, %v7890_v29  ;;  %v2939_v26 = vsub.s32 3, %v7890_v29 }
 0x5be   :  { %6677 = vtanh.f32 %v4824_v40  ;;  %v6543_v25 = vld [vmem:[%s8956_s8 + $0x268] ss:$72 sps:$4 sm:$0xff]   ;;  %v6548_v27 = vld [vmem:[%s8956_s8 + $0x2fc] ss:$72 sps:$4 sm:$0xff]   ;;  %v6546_v35 = vld [vmem:[%s8956_s8 + $0x2f8] ss:$72 sps:$4 sm:$0xff]  }
 0x5bf   :  { %6679 = vtanh.f32 %v4840_v41  ;;  %4632 = vmatpush1.bf16.msra.mxu1 %v6501_v39  ;;  %v2936_v31 = vrot.slane %v8489_v15, %v2935_v24  ;;  %v2940_v34 = vrot.slane %v8489_v15, %v2939_v26  ;;  %v6551_v36 = vld [vmem:[%s8956_s8 + $0x38c] ss:$72 sps:$4 sm:$0xff]   ;;  %v6549_v42 = vld [vmem:[%s8956_s8 + $0x388] ss:$72 sps:$4 sm:$0xff]  }
 0x5c0   :  { %6681 = vtanh.f32 %v4825_v45  ;;  %4633 = vmatprep.subr.bf16.mxu1 %v6506_v44  ;;  %v6554_v45 = vld [vmem:[%s8956_s8 + $0x41c] ss:$72 sps:$4 sm:$0xff]  }
 0x5c1   :  { %6683 = vtanh.f32 %v4841_v46 }
 0x5c3   :  { %4634 = vmatpush1.bf16.msra.mxu1 %v6504_v47  ;;  %v6552_v47 = vld [vmem:[%s8956_s8 + $0x418] ss:$72 sps:$4 sm:$0xff]  }
 0x5c4   :  { %4635 = vmatprep.subr.bf16.mxu1 %v6509_v48  ;;  %v6557_v48 = vld [vmem:[%s8956_s8 + $0x4ac] ss:$72 sps:$4 sm:$0xff]  }
 0x5c7   :  { %4636 = vmatpush1.bf16.msra.mxu1 %v6507_v49  ;;  %v6555_v49 = vld [vmem:[%s8956_s8 + $0x4a8] ss:$72 sps:$4 sm:$0xff]  }
 0x5c8   :  { %v6678_v52 = vpop.eup %6677  ;;  %4637 = vmatprep.subr.bf16.mxu1 %v6512_v50  ;;  %v6560_v50 = vld [vmem:[%s8956_s8 + $0x53c] ss:$72 sps:$4 sm:$0xff]  }
 0x5c9   :  { %v6680_v55 = vpop.eup %6679  ;;  %v4860_v56 = vmul.f32 0.5, %v6678_v52 }
 0x5ca   :  { %v6682_v57 = vpop.eup %6681  ;;  %v4876_v58 = vmul.f32 0.5, %v6680_v55 }
 0x5cb   :  { %v6684_v53 = vpop.eup %6683  ;;  %v4878_v59 = vadd.f32 0.5, %v4860_v56  ;;  %v4861_v60 = vmul.f32 0.5, %v6682_v57  ;;  %4638 = vmatpush1.bf16.msra.mxu1 %v6510_v51  ;;  %v6558_v51 = vld [vmem:[%s8956_s8 + $0x538] ss:$72 sps:$4 sm:$0xff]  }
 0x5cc   :  { %v4894_v62 = vadd.f32 0.5, %v4876_v58  ;;  %v4877_v63 = vmul.f32 0.5, %v6684_v53  ;;  %4639 = vmatprep.subr.bf16.mxu1 %v6515_v54  ;;  %v6563_v54 = vld [vmem:[%s8956_s8 + $0x5cc] ss:$72 sps:$4 sm:$0xff]   ;;  %v6561_v53 = vld [vmem:[%s8956_s8 + $0x5c8] ss:$72 sps:$4 sm:$0xff]  }
 0x5cd   :  { %v4879_v1 = vadd.f32 0.5, %v4861_v60  ;;  %v6566_v60 = vld [vmem:[%s8956_s8 + $0x65c] ss:$72 sps:$4 sm:$0xff]  }
 0x5ce   :  { %v4895_v2 = vadd.f32 0.5, %v4877_v63  ;;  %v6569_v63 = vld [vmem:[%s8956_s8 + $0x6ec] ss:$72 sps:$4 sm:$0xff]  }
 0x5cf   :  { %v5674_v3 = vpack.c.bf16 %v4879_v1, %v4878_v59  ;;  %4640 = vmatpush1.bf16.msra.mxu1 %v6513_v61  ;;  %v6572_v1 = vld [vmem:[%s8956_s8 + $0x77c] ss:$72 sps:$4 sm:$0xff]  }
 0x5d0   :  { %v5682_v5 = vpack.c.bf16 %v4895_v2, %v4894_v62  ;;  %4641 = vmatprep.subr.bf16.mxu1 %v6518_v0  ;;  %v6564_v62 = vld [vmem:[%s8956_s8 + $0x658] ss:$72 sps:$4 sm:$0xff]   ;;  %v6567_v0 = vld [vmem:[%s8956_s8 + $0x6e8] ss:$72 sps:$4 sm:$0xff]  }
 0x5d1   :  { %4968 = vst [vmem:[#allocation2] sm:$0xff] %v5674_v3  ;;  %v6570_v2 = vld [vmem:[%s8956_s8 + $0x778] ss:$72 sps:$4 sm:$0xff]   ;;  %v6575_v3 = vld [vmem:[%s8956_s8 + $0x80c] ss:$72 sps:$4 sm:$0xff]  }
 0x5d2   :  { %4979 = vst.msk [vmem:[#allocation2 + $0x40] sm:$0xff] %vm4978_vm2, %v5682_v5  ;;  %v6578_v5 = vld [vmem:[%s8956_s8 + $0x89c] ss:$72 sps:$4 sm:$0xff]  }
 0x5d3   :  { %4642 = vmatpush1.bf16.msra.mxu1 %v6516_v4  ;;  %v6573_v4 = vld [vmem:[%s8956_s8 + $0x808] ss:$72 sps:$4 sm:$0xff]  }
 0x5d4   :  { %4643 = vmatprep.subr.bf16.mxu1 %v6521_v6  ;;  %v6576_v6 = vld [vmem:[%s8956_s8 + $0x898] ss:$72 sps:$4 sm:$0xff]  }
 0x5d7   :  { %4644 = vmatpush1.bf16.msra.mxu1 %v6519_v7  ;;  %v6581_v7 = vld [vmem:[%s8956_s8 + $0x34] ss:$72 sps:$4 sm:$0xff]  }
 0x5d8   :  { %4645 = vmatprep.subr.bf16.mxu1 %v6524_v8  ;;  %v6579_v8 = vld [vmem:[%s8956_s8 + $0x30] ss:$72 sps:$4 sm:$0xff]  }
 0x5db   :  { %4646 = vmatpush1.bf16.msra.mxu1 %v6522_v9  ;;  %v6584_v9 = vld [vmem:[%s8956_s8 + $0xc4] ss:$72 sps:$4 sm:$0xff]  }
 0x5dc   :  { %4647 = vmatprep.subr.bf16.mxu1 %v6527_v10  ;;  %v6582_v10 = vld [vmem:[%s8956_s8 + $0xc0] ss:$72 sps:$4 sm:$0xff]  }
 0x5df   :  { %4648 = vmatpush1.bf16.msra.mxu1 %v6525_v11  ;;  %v6587_v11 = vld [vmem:[%s8956_s8 + $0x154] ss:$72 sps:$4 sm:$0xff]  }
 0x5e0   :  { %4649 = vmatprep.subr.bf16.mxu1 %v6530_v12  ;;  %v6585_v12 = vld [vmem:[%s8956_s8 + $0x150] ss:$72 sps:$4 sm:$0xff]  }
 0x5e3   :  { %4650 = vmatpush1.bf16.msra.mxu1 %v6528_v13  ;;  %v6590_v13 = vld [vmem:[%s8956_s8 + $0x1e4] ss:$72 sps:$4 sm:$0xff]  }
 0x5e4   :  { %4660 = vmatprep.subr.bf16.mxu1 %v6533_v14  ;;  %v6588_v14 = vld [vmem:[%s8956_s8 + $0x1e0] ss:$72 sps:$4 sm:$0xff]  }
 0x5e6   :  { %4652 = vmatmul.mubr.bf16.vlgmr.msra.gmra.mrb[24].mxu1 %v8161_v33 }
 0x5e7   :  { %4661 = vmatpush1.bf16.msra.mxu1 %v6531_v16  ;;  %4692 = vmatprep.mubr.bf16.mxu1 %v8156_v28  ;;  %v6593_v16 = vld [vmem:[%s8956_s8 + $0x274] ss:$72 sps:$4 sm:$0xff]  }
 0x5e8   :  { %4662 = vmatprep.subr.bf16.mxu1 %v6536_v17  ;;  %v2943_v17 = vsub.s32 4, %v7890_v29 }
 0x5eb   :  { %4663 = vmatpush1.bf16.msra.mxu1 %v6534_v18  ;;  %v6591_v18 = vld [vmem:[%s8956_s8 + $0x270] ss:$72 sps:$4 sm:$0xff]  }
 0x5ec   :  { %4664 = vmatprep.subr.bf16.mxu1 %v6539_v19  ;;  %v2947_v19 = vsub.s32 5, %v7890_v29 }
 0x5ef   :  { %4665 = vmatpush1.bf16.msra.mxu1 %v6537_v20  ;;  %v6596_v20 = vld [vmem:[%s8956_s8 + $0x304] ss:$72 sps:$4 sm:$0xff]  }
 0x5f0   :  { %4666 = vmatprep.subr.bf16.mxu1 %v6542_v21  ;;  %v2944_v21 = vrot.slane %v8489_v15, %v2943_v17 }
 0x5f3   :  { %4667 = vmatpush1.bf16.msra.mxu1 %v6540_v22  ;;  %v2948_v22 = vrot.slane %v8489_v15, %v2947_v19 }
 0x5f4   :  { %4668 = vmatprep.subr.bf16.mxu1 %v6545_v23  ;;  %v6594_v23 = vld [vmem:[%s8956_s8 + $0x300] ss:$72 sps:$4 sm:$0xff]  }
 0x5f7   :  { %4669 = vmatpush1.bf16.msra.mxu1 %v6543_v25  ;;  %v6599_v25 = vld [vmem:[%s8956_s8 + $0x394] ss:$72 sps:$4 sm:$0xff]  }
 0x5f8   :  { %4670 = vmatprep.subr.bf16.mxu1 %v6548_v27 }
 0x5f9   :  { %v4530_v37 = vpop.f32.mrb[12].mxu1 }
 0x5fa   :  { %v4531_v38 = vadd.f32 %v4530_v37, %v2936_v31  ;;  %v4532_v39 = vpop.f32.mrb[13].mxu1  ;;  %v6597_v37 = vld [vmem:[%s8956_s8 + $0x390] ss:$72 sps:$4 sm:$0xff]  }
 0x5fb   :  { %v4533_v40 = vadd.f32 %v4532_v39, %v2940_v34  ;;  %v4534_v41 = vpop.f32.mrb[14].mxu1  ;;  %4671 = vmatpush1.bf16.msra.mxu1 %v6546_v35 }
 0x5fc   :  { %v4826_v43 = vmul.f32 0.5, %v4531_v38  ;;  %v4535_v44 = vpop.f32.mrb[15].mxu1  ;;  %4672 = vmatprep.subr.bf16.mxu1 %v6551_v36 }
 0x5fd   :  { %v4827_v46 = vmul.f32 0.5, %v4533_v40  ;;  %v6602_v40 = vld [vmem:[%s8956_s8 + $0x424] ss:$72 sps:$4 sm:$0xff]   ;;  %v6603_v44 = vld [vmem:[%s8956_s8 + $0x4b0] ss:$72 sps:$4 sm:$0xff]  }
 0x5fe   :  { %6685 = vtanh.f32 %v4826_v43  ;;  %v6605_v43 = vld [vmem:[%s8956_s8 + $0x4b4] ss:$72 sps:$4 sm:$0xff]  }
 0x5ff   :  { %6687 = vtanh.f32 %v4827_v46  ;;  %4673 = vmatpush1.bf16.msra.mxu1 %v6549_v42  ;;  %v6600_v42 = vld [vmem:[%s8956_s8 + $0x420] ss:$72 sps:$4 sm:$0xff]  }
 0x600   :  { %4674 = vmatprep.subr.bf16.mxu1 %v6554_v45  ;;  %v6608_v45 = vld [vmem:[%s8956_s8 + $0x544] ss:$72 sps:$4 sm:$0xff]   ;;  %v6606_v46 = vld [vmem:[%s8956_s8 + $0x540] ss:$72 sps:$4 sm:$0xff]  }
 0x603   :  { %4675 = vmatpush1.bf16.msra.mxu1 %v6552_v47 }
 0x604   :  { %4676 = vmatprep.subr.bf16.mxu1 %v6557_v48  ;;  %v6611_v48 = vld [vmem:[%s8956_s8 + $0x5d4] ss:$72 sps:$4 sm:$0xff]  }
 0x607   :  { %4677 = vmatpush1.bf16.msra.mxu1 %v6555_v49 }
 0x608   :  { %v6686_v52 = vpop.eup %6685  ;;  %4678 = vmatprep.subr.bf16.mxu1 %v6560_v50 }
 0x609   :  { %v6688_v55 = vpop.eup %6687  ;;  %v4862_v56 = vmul.f32 0.5, %v6686_v52 }
 0x60a   :  { %v4863_v57 = vmul.f32 0.5, %v6688_v55 }
 0x60b   :  { %v4880_v58 = vadd.f32 0.5, %v4862_v56  ;;  %4679 = vmatpush1.bf16.msra.mxu1 %v6558_v51  ;;  %v6614_v56 = vld [vmem:[%s8956_s8 + $0x664] ss:$72 sps:$4 sm:$0xff]  }
 0x60c   :  { %v4881_v59 = vadd.f32 0.5, %v4863_v57  ;;  %4680 = vmatprep.subr.bf16.mxu1 %v6563_v54  ;;  %v6609_v54 = vld [vmem:[%s8956_s8 + $0x5d0] ss:$72 sps:$4 sm:$0xff]  }
 0x60e   :  { %v5675_v61 = vpack.c.bf16 %v4881_v59, %v4880_v58  ;;  %v6612_v58 = vld [vmem:[%s8956_s8 + $0x660] ss:$72 sps:$4 sm:$0xff]   ;;  %v6615_v59 = vld [vmem:[%s8956_s8 + $0x6f0] ss:$72 sps:$4 sm:$0xff]  }
 0x60f   :  { %4681 = vmatpush1.bf16.msra.mxu1 %v6561_v53  ;;  %v6617_v53 = vld [vmem:[%s8956_s8 + $0x6f4] ss:$72 sps:$4 sm:$0xff]  }
 0x610   :  { %4969 = vst [vmem:[#allocation2 + $0x8] sm:$0xff] %v5675_v61  ;;  %4682 = vmatprep.subr.bf16.mxu1 %v6566_v60  ;;  %v6620_v60 = vld [vmem:[%s8956_s8 + $0x784] ss:$72 sps:$4 sm:$0xff]   ;;  %v6618_v61 = vld [vmem:[%s8956_s8 + $0x780] ss:$72 sps:$4 sm:$0xff]  }
 0x613   :  { %4683 = vmatpush1.bf16.msra.mxu1 %v6564_v62  ;;  %v6623_v62 = vld [vmem:[%s8956_s8 + $0x814] ss:$72 sps:$4 sm:$0xff]  }
 0x614   :  { %4684 = vmatprep.subr.bf16.mxu1 %v6569_v63  ;;  %v6621_v63 = vld [vmem:[%s8956_s8 + $0x810] ss:$72 sps:$4 sm:$0xff]  }
 0x617   :  { %4685 = vmatpush1.bf16.msra.mxu1 %v6567_v0  ;;  %v6626_v0 = vld [vmem:[%s8956_s8 + $0x8a4] ss:$72 sps:$4 sm:$0xff]  }
 0x618   :  { %4686 = vmatprep.subr.bf16.mxu1 %v6572_v1  ;;  %v6624_v1 = vld [vmem:[%s8956_s8 + $0x8a0] ss:$72 sps:$4 sm:$0xff]  }
 0x61b   :  { %4687 = vmatpush1.bf16.msra.mxu1 %v6570_v2  ;;  %v6629_v2 = vld [vmem:[%s8956_s8 + $0x3c] ss:$72 sps:$4 sm:$0xff]  }
 0x61c   :  { %4688 = vmatprep.subr.bf16.mxu1 %v6575_v3  ;;  %v6627_v3 = vld [vmem:[%s8956_s8 + $0x38] ss:$72 sps:$4 sm:$0xff]  }
 0x61f   :  { %4689 = vmatpush1.bf16.msra.mxu1 %v6573_v4  ;;  %v6632_v4 = vld [vmem:[%s8956_s8 + $0xcc] ss:$72 sps:$4 sm:$0xff]  }
 0x620   :  { %4690 = vmatprep.subr.bf16.mxu1 %v6578_v5  ;;  %v6630_v5 = vld [vmem:[%s8956_s8 + $0xc8] ss:$72 sps:$4 sm:$0xff]  }
 0x623   :  { %4691 = vmatpush1.bf16.msra.mxu1 %v6576_v6  ;;  %v6635_v6 = vld [vmem:[%s8956_s8 + $0x15c] ss:$72 sps:$4 sm:$0xff]  }
 0x624   :  { %4701 = vmatprep.subr.bf16.mxu1 %v6581_v7  ;;  %v6633_v7 = vld [vmem:[%s8956_s8 + $0x158] ss:$72 sps:$4 sm:$0xff]  }
 0x626   :  { %4693 = vmatmul.mubr.bf16.vlgmr.msra.gmra.mrb[28].mxu1 %v8161_v33 }
 0x627   :  { %4702 = vmatpush1.bf16.msra.mxu1 %v6579_v8  ;;  %4733 = vmatprep.mubr.bf16.mxu1 %v8156_v28  ;;  %v6638_v8 = vld [vmem:[%s8956_s8 + $0x1ec] ss:$72 sps:$4 sm:$0xff]  }
 0x628   :  { %4703 = vmatprep.subr.bf16.mxu1 %v6584_v9  ;;  %v6641_v9 = vld [vmem:[%s8956_s8 + $0x27c] ss:$72 sps:$4 sm:$0xff]  }
 0x62b   :  { %4704 = vmatpush1.bf16.msra.mxu1 %v6582_v10  ;;  %v2951_v10 = vsub.s32 6, %v7890_v29 }
 0x62c   :  { %4705 = vmatprep.subr.bf16.mxu1 %v6587_v11  ;;  %v6639_v11 = vld [vmem:[%s8956_s8 + $0x278] ss:$72 sps:$4 sm:$0xff]  }
 0x62f   :  { %4706 = vmatpush1.bf16.msra.mxu1 %v6585_v12  ;;  %v2955_v12 = vsub.s32 7, %v7890_v29 }
 0x630   :  { %4707 = vmatprep.subr.bf16.mxu1 %v6590_v13  ;;  %v6644_v13 = vld [vmem:[%s8956_s8 + $0x30c] ss:$72 sps:$4 sm:$0xff]  }
 0x633   :  { %4708 = vmatpush1.bf16.msra.mxu1 %v6588_v14  ;;  %v2952_v14 = vrot.slane %v8489_v15, %v2951_v10 }
 0x634   :  { %4709 = vmatprep.subr.bf16.mxu1 %v6593_v16  ;;  %v2956_v16 = vrot.slane %v8489_v15, %v2955_v12 }
 0x637   :  { %4710 = vmatpush1.bf16.msra.mxu1 %v6591_v18  ;;  %v6642_v18 = vld [vmem:[%s8956_s8 + $0x308] ss:$72 sps:$4 sm:$0xff]  }
 0x638   :  { %4711 = vmatprep.subr.bf16.mxu1 %v6596_v20  ;;  %v6647_v20 = vld [vmem:[%s8956_s8 + $0x39c] ss:$72 sps:$4 sm:$0xff]  }
 0x639   :  { %v4571_v27 = vpop.f32.mrb[16].mxu1 }
 0x63a   :  { %v4572_v31 = vadd.f32 %v4571_v27, %v2944_v21  ;;  %v4573_v34 = vpop.f32.mrb[17].mxu1 }
 0x63b   :  { %v4574_v35 = vadd.f32 %v4573_v34, %v2948_v22  ;;  %v4575_v36 = vpop.f32.mrb[18].mxu1  ;;  %4712 = vmatpush1.bf16.msra.mxu1 %v6594_v23 }
 0x63c   :  { %v4828_v38 = vmul.f32 0.5, %v4572_v31  ;;  %v4576_v39 = vpop.f32.mrb[19].mxu1  ;;  %4713 = vmatprep.subr.bf16.mxu1 %v6599_v25  ;;  %v6645_v31 = vld [vmem:[%s8956_s8 + $0x398] ss:$72 sps:$4 sm:$0xff]  }
 0x63d   :  { %v4829_v41 = vmul.f32 0.5, %v4574_v35  ;;  %v6650_v35 = vld [vmem:[%s8956_s8 + $0x42c] ss:$72 sps:$4 sm:$0xff]   ;;  %v6651_v39 = vld [vmem:[%s8956_s8 + $0x4b8] ss:$72 sps:$4 sm:$0xff]  }
 0x63e   :  { %6689 = vtanh.f32 %v4828_v38  ;;  %v6653_v38 = vld [vmem:[%s8956_s8 + $0x4bc] ss:$72 sps:$4 sm:$0xff]  }
 0x63f   :  { %6691 = vtanh.f32 %v4829_v41  ;;  %4714 = vmatpush1.bf16.msra.mxu1 %v6597_v37  ;;  %v6648_v37 = vld [vmem:[%s8956_s8 + $0x428] ss:$72 sps:$4 sm:$0xff]  }
 0x640   :  { %4715 = vmatprep.subr.bf16.mxu1 %v6602_v40  ;;  %v6656_v40 = vld [vmem:[%s8956_s8 + $0x54c] ss:$72 sps:$4 sm:$0xff]   ;;  %v6654_v41 = vld [vmem:[%s8956_s8 + $0x548] ss:$72 sps:$4 sm:$0xff]  }
 0x643   :  { %4716 = vmatpush1.bf16.msra.mxu1 %v6600_v42 }
 0x644   :  { %4717 = vmatprep.subr.bf16.mxu1 %v6605_v43  ;;  %v6659_v43 = vld [vmem:[%s8956_s8 + $0x5dc] ss:$72 sps:$4 sm:$0xff]  }
 0x647   :  { %4718 = vmatpush1.bf16.msra.mxu1 %v6603_v44 }
 0x648   :  { %v6690_v47 = vpop.eup %6689  ;;  %4719 = vmatprep.subr.bf16.mxu1 %v6608_v45 }
 0x649   :  { %v6692_v49 = vpop.eup %6691  ;;  %v4864_v50 = vmul.f32 0.5, %v6690_v47 }
 0x64a   :  { %v4865_v51 = vmul.f32 0.5, %v6692_v49 }
 0x64b   :  { %v4882_v52 = vadd.f32 0.5, %v4864_v50  ;;  %4720 = vmatpush1.bf16.msra.mxu1 %v6606_v46  ;;  %v6662_v50 = vld [vmem:[%s8956_s8 + $0x66c] ss:$72 sps:$4 sm:$0xff]  }
 0x64c   :  { %v4883_v55 = vadd.f32 0.5, %v4865_v51  ;;  %4721 = vmatprep.subr.bf16.mxu1 %v6611_v48  ;;  %v6657_v48 = vld [vmem:[%s8956_s8 + $0x5d8] ss:$72 sps:$4 sm:$0xff]  }
 0x64e   :  { %v5676_v57 = vpack.c.bf16 %v4883_v55, %v4882_v52  ;;  %v6660_v52 = vld [vmem:[%s8956_s8 + $0x668] ss:$72 sps:$4 sm:$0xff]   ;;  %v6663_v55 = vld [vmem:[%s8956_s8 + $0x6f8] ss:$72 sps:$4 sm:$0xff]  }
 0x64f   :  { %4722 = vmatpush1.bf16.msra.mxu1 %v6609_v54  ;;  %v6665_v54 = vld [vmem:[%s8956_s8 + $0x6fc] ss:$72 sps:$4 sm:$0xff]  }
 0x650   :  { %4970 = vst [vmem:[#allocation2 + $0x10] sm:$0xff] %v5676_v57  ;;  %4723 = vmatprep.subr.bf16.mxu1 %v6614_v56  ;;  %v6668_v56 = vld [vmem:[%s8956_s8 + $0x78c] ss:$72 sps:$4 sm:$0xff]   ;;  %v6666_v57 = vld [vmem:[%s8956_s8 + $0x788] ss:$72 sps:$4 sm:$0xff]  }
 0x653   :  { %4724 = vmatpush1.bf16.msra.mxu1 %v6612_v58  ;;  %v6671_v58 = vld [vmem:[%s8956_s8 + $0x81c] ss:$72 sps:$4 sm:$0xff]  }
 0x654   :  { %4725 = vmatprep.subr.bf16.mxu1 %v6617_v53  ;;  %v6669_v53 = vld [vmem:[%s8956_s8 + $0x818] ss:$72 sps:$4 sm:$0xff]  }
 0x657   :  { %4726 = vmatpush1.bf16.msra.mxu1 %v6615_v59  ;;  %v6674_v59 = vld [vmem:[%s8956_s8 + $0x8ac] ss:$72 sps:$4 sm:$0xff]  }
 0x658   :  { %4727 = vmatprep.subr.bf16.mxu1 %v6620_v60  ;;  %v6672_v60 = vld [vmem:[%s8956_s8 + $0x8a8] ss:$72 sps:$4 sm:$0xff]  }
 0x65b   :  { %4728 = vmatpush1.bf16.msra.mxu1 %v6618_v61  ;;  %v8888_v61 = vld [vmem:[%s8957_s9 + $0x8] sm:$0xff] }
 0x65c   :  { %4729 = vmatprep.subr.bf16.mxu1 %v6623_v62  ;;  %v2960_v62 = vrot.slane %v8888_v61, %v7893_v30 }
 0x65f   :  { %4730 = vmatpush1.bf16.msra.mxu1 %v6621_v63  ;;  %v2964_v63 = vrot.slane %v8888_v61, %v7899_v32  ;;  %v2968_v32 = vrot.slane %v8888_v61, %v2935_v24 }
 0x660   :  { %4731 = vmatprep.subr.bf16.mxu1 %v6626_v0 }
 0x663   :  { %4732 = vmatpush1.bf16.msra.mxu1 %v6624_v1 }
 0x664   :  { %4742 = vmatprep.subr.bf16.mxu1 %v6629_v2 }
 0x666   :  { %4734 = vmatmul.mubr.bf16.vlgmr.msra.gmra.mrb[32].mxu1 %v8161_v33 }
 0x667   :  { %4743 = vmatpush1.bf16.msra.mxu1 %v6627_v3  ;;  %4774 = vmatprep.mubr.bf16.mxu1 %v8156_v28  ;;  %v6636_v28 = vld [vmem:[%s8956_s8 + $0x1e8] ss:$72 sps:$4 sm:$0xff]   ;;  %s6784_s8 = smov [#allocation4]  }
 0x668   :  { %4744 = vmatprep.subr.bf16.mxu1 %v6632_v4  ;;  %s4998_s9 = sshll.u32 %s6784_s8, 4  ;;  %s4999_s9 = int_to_ptr.vmem [resolvable:$true] %s4998_s9 }
 0x669   :  { %s6713_s17 = scalar_lea.vmem %s4999_s9, 128  ;;  %p6718_p1 = scmp.lt.s32.totalorder %s4999_s9, %s4999_s9 }
 0x66a   :  { %p6714_p0 = scmp.ne.s32.totalorder %s4999_s9, %s6713_s17  ;;  %p6719_p2 = scmp.lt.s32.totalorder %s6713_s17, %s6713_s17 }
 0x66b   :  { %4745 = vmatpush1.bf16.msra.mxu1 %v6630_v5 }
 0x66c   :  { %4746 = vmatprep.subr.bf16.mxu1 %v6635_v6  ;;  %p6720_p3 = por %p6719_p2, %p6718_p1 }
 0x66e   :  { %p6721_p4 = pnand %p6720_p3, %p6714_p0 }
 0x66f   :  { %4747 = vmatpush1.bf16.msra.mxu1 %v6633_v7 }
 0x670   :  { %4748 = vmatprep.subr.bf16.mxu1 %v6638_v8 }
 0x673   :  { %4749 = vmatpush1.bf16.msra.mxu1 %v6636_v28 }
 0x674   :  { %4750 = vmatprep.subr.bf16.mxu1 %v6641_v9 }
 0x677   :  { %4751 = vmatpush1.bf16.msra.mxu1 %v6639_v11 }
 0x678   :  { %4752 = vmatprep.subr.bf16.mxu1 %v6644_v13 }
 0x679   :  { %v4612_v21 = vpop.f32.mrb[20].mxu1 }
 0x67a   :  { %v4613_v22 = vadd.f32 %v4612_v21, %v2952_v14  ;;  %v4614_v23 = vpop.f32.mrb[21].mxu1  ;;  %v2972_v14 = vrot.slane %v8888_v61, %v2939_v26 }
 0x67b   :  { %v4615_v25 = vadd.f32 %v4614_v23, %v2956_v16  ;;  %v4616_v27 = vpop.f32.mrb[22].mxu1  ;;  %4753 = vmatpush1.bf16.msra.mxu1 %v6642_v18 }
 0x67c   :  { %v4830_v15 = vmul.f32 0.5, %v4613_v22  ;;  %v4617_v34 = vpop.f32.mrb[23].mxu1  ;;  %4754 = vmatprep.subr.bf16.mxu1 %v6647_v20 }
 0x67d   :  { %v4831_v36 = vmul.f32 0.5, %v4615_v25 }
 0x67e   :  { %6693 = vtanh.f32 %v4830_v15 }
 0x67f   :  { %6695 = vtanh.f32 %v4831_v36  ;;  %4755 = vmatpush1.bf16.msra.mxu1 %v6645_v31 }
 0x680   :  { %4756 = vmatprep.subr.bf16.mxu1 %v6650_v35 }
 0x683   :  { %4757 = vmatpush1.bf16.msra.mxu1 %v6648_v37 }
 0x684   :  { %4758 = vmatprep.subr.bf16.mxu1 %v6653_v38 }
 0x687   :  { %4759 = vmatpush1.bf16.msra.mxu1 %v6651_v39 }
 0x688   :  { %v6694_v42 = vpop.eup %6693  ;;  %4760 = vmatprep.subr.bf16.mxu1 %v6656_v40 }
 0x689   :  { %v6696_v44 = vpop.eup %6695  ;;  %v4866_v45 = vmul.f32 0.5, %v6694_v42 }
 0x68a   :  { %v4867_v46 = vmul.f32 0.5, %v6696_v44 }
 0x68b   :  { %v4884_v47 = vadd.f32 0.5, %v4866_v45  ;;  %4761 = vmatpush1.bf16.msra.mxu1 %v6654_v41 }
 0x68c   :  { %v4885_v49 = vadd.f32 0.5, %v4867_v46  ;;  %4762 = vmatprep.subr.bf16.mxu1 %v6659_v43 }
 0x68e   :  { %v5677_v51 = vpack.c.bf16 %v4885_v49, %v4884_v47 }
 0x68f   :  { %4763 = vmatpush1.bf16.msra.mxu1 %v6657_v48 }
 0x690   :  { %4971 = vst [vmem:[#allocation2 + $0x18] sm:$0xff] %v5677_v51  ;;  %4764 = vmatprep.subr.bf16.mxu1 %v6662_v50 }
 0x693   :  { %4765 = vmatpush1.bf16.msra.mxu1 %v6660_v52 }
 0x694   :  { %4766 = vmatprep.subr.bf16.mxu1 %v6665_v54 }
 0x697   :  { %4767 = vmatpush1.bf16.msra.mxu1 %v6663_v55 }
 0x698   :  { %4768 = vmatprep.subr.bf16.mxu1 %v6668_v56 }
 0x69b   :  { %4769 = vmatpush1.bf16.msra.mxu1 %v6666_v57 }
 0x69c   :  { %4770 = vmatprep.subr.bf16.mxu1 %v6671_v58 }
 0x69f   :  { %4771 = vmatpush1.bf16.msra.mxu1 %v6669_v53 }
 0x6a0   :  { %4772 = vmatprep.subr.bf16.mxu1 %v6674_v59 }
 0x6a3   :  { %4773 = vmatpush1.bf16.msra.mxu1 %v6672_v60 }
 0x6a6   :  { %4775 = vmatmul.mubr.bf16.vlgmr.msra.gmra.mrb[36].mxu1 %v8161_v33 }
 0x6b9   :  { %v4653_v0 = vpop.f32.mrb[24].mxu1 }
 0x6ba   :  { %v4654_v1 = vadd.f32 %v4653_v0, %v2960_v62  ;;  %v4655_v2 = vpop.f32.mrb[25].mxu1 }
 0x6bb   :  { %v4656_v3 = vadd.f32 %v4655_v2, %v2964_v63  ;;  %v4657_v4 = vpop.f32.mrb[26].mxu1 }
 0x6bc   :  { %v4832_v5 = vmul.f32 0.5, %v4654_v1  ;;  %v4658_v6 = vpop.f32.mrb[27].mxu1 }
 0x6bd   :  { %v4833_v7 = vmul.f32 0.5, %v4656_v3 }
 0x6be   :  { %6697 = vtanh.f32 %v4832_v5 }
 0x6bf   :  { %6699 = vtanh.f32 %v4833_v7 }
 0x6c8   :  { %v6698_v33 = vpop.eup %6697 }
 0x6c9   :  { %v6700_v8 = vpop.eup %6699  ;;  %v4868_v28 = vmul.f32 0.5, %v6698_v33 }
 0x6ca   :  { %v4869_v9 = vmul.f32 0.5, %v6700_v8 }
 0x6cb   :  { %v4886_v11 = vadd.f32 0.5, %v4868_v28 }
 0x6cc   :  { %v4887_v13 = vadd.f32 0.5, %v4869_v9 }
 0x6ce   :  { %v5678_v30 = vpack.c.bf16 %v4887_v13, %v4886_v11 }
 0x6d0   :  { %4972 = vst [vmem:[#allocation2 + $0x20] sm:$0xff] %v5678_v30 }
 0x6f9   :  { %v4694_v16 = vpop.f32.mrb[28].mxu1 }
 0x6fa   :  { %v4695_v18 = vadd.f32 %v4694_v16, %v2968_v32  ;;  %v4696_v20 = vpop.f32.mrb[29].mxu1 }
 0x6fb   :  { %v4697_v21 = vadd.f32 %v4696_v20, %v2972_v14  ;;  %v4698_v22 = vpop.f32.mrb[30].mxu1 }
 0x6fc   :  { %v4834_v23 = vmul.f32 0.5, %v4695_v18  ;;  %v4699_v25 = vpop.f32.mrb[31].mxu1 }
 0x6fd   :  { %v4835_v27 = vmul.f32 0.5, %v4697_v21 }
 0x6fe   :  { %6701 = vtanh.f32 %v4834_v23 }
 0x6ff   :  { %6703 = vtanh.f32 %v4835_v27 }
 0x708   :  { %v6702_v31 = vpop.eup %6701 }
 0x709   :  { %v6704_v15 = vpop.eup %6703  ;;  %v4870_v34 = vmul.f32 0.5, %v6702_v31 }
 0x70a   :  { %v4871_v35 = vmul.f32 0.5, %v6704_v15 }
 0x70b   :  { %v4888_v36 = vadd.f32 0.5, %v4870_v34 }
 0x70c   :  { %v4889_v24 = vadd.f32 0.5, %v4871_v35 }
 0x70e   :  { %v5679_v37 = vpack.c.bf16 %v4889_v24, %v4888_v36 }
 0x710   :  { %4973 = vst [vmem:[#allocation2 + $0x28] sm:$0xff] %v5679_v37 }
 0x711   :  { %6724 = shalt.err (!%p6721_p4)
}
 0x712   :  { %s6725_s19 = scalar_lea.hbm %s8959_s11, 128 }
 0x713   :  { %p6726_p5 = scmp.ne.s32.totalorder %s8959_s11, %s6725_s19  ;;  %p6729_p6 = scmp.lt.u32.totalorder %s6725_s19, %s8959_s11 }
 0x715   :  { %p6731_p7 = pnand %p6729_p6, %p6726_p5 }
 0x717   :  { %6734 = shalt.err (!%p6731_p7)
}
 0x718   :  { %5001 = dma.vmem_to_hbm [thread:$0]  %s4999_s9, 128, %s8959_s11, [#allocation5]  }
 0x719   :  { %s6785_s2 = smov [#allocation6]  }
 0x71a   :  { %s5008_s25 = sshll.u32 %s6785_s2, 4  ;;  %s5009_s25 = int_to_ptr.vmem [resolvable:$true] %s5008_s25 }
 0x71b   :  { %s6735_s26 = scalar_lea.vmem %s5009_s25, 128  ;;  %p6740_p9 = scmp.lt.s32.totalorder %s5009_s25, %s5009_s25 }
 0x71c   :  { %p6736_p8 = scmp.ne.s32.totalorder %s5009_s25, %s6735_s26  ;;  %p6741_p10 = scmp.lt.s32.totalorder %s6735_s26, %s6735_s26 }
 0x71e   :  { %p6742_p11 = por %p6741_p10, %p6740_p9 }
 0x720   :  { %p6743_p12 = pnand %p6742_p11, %p6736_p8 }
 0x722   :  { %6746 = shalt.err (!%p6743_p12)
}
 0x723   :  { %s6747_s29 = scalar_lea.hbm %s8960_s12, 128 }
 0x724   :  { %p6748_p13 = scmp.ne.s32.totalorder %s8960_s12, %s6747_s29  ;;  %p6751_p0 = scmp.lt.u32.totalorder %s6747_s29, %s8960_s12 }
 0x726   :  { %p6753_p1 = pnand %p6751_p0, %p6748_p13 }
 0x728   :  { %6756 = shalt.err (!%p6753_p1)
}
 0x729   :  { %5011 = dma.vmem_to_hbm [thread:$0]  %s5009_s25, 128, %s8960_s12, [#allocation5]   ;;  %v2976_v26 = vrot.slane %v8888_v61, %v2943_v17  ;;  %v2980_v38 = vrot.slane %v8888_v61, %v2947_v19  ;;  %v2984_v19 = vrot.slane %v8888_v61, %v2951_v10  ;;  %v2988_v54 = vrot.slane %v8888_v61, %v2955_v12 }
 0x72a   :  { %s6786_s12 = smov [#allocation2]  }
 0x72b   :  { %s4988_s13 = sshll.u32 %s6786_s12, 4  ;;  %s4989_s13 = int_to_ptr.vmem [resolvable:$true] %s4988_s13 }
 0x72c   :  { %s6757_s14 = scalar_lea.vmem %s4989_s13, 1152  ;;  %p6762_p3 = scmp.lt.s32.totalorder %s4989_s13, %s4989_s13 }
 0x72d   :  { %p6758_p2 = scmp.ne.s32.totalorder %s4989_s13, %s6757_s14  ;;  %p6763_p4 = scmp.lt.s32.totalorder %s6757_s14, %s6757_s14 }
 0x72f   :  { %p6764_p5 = por %p6763_p4, %p6762_p3 }
 0x731   :  { %p6765_p6 = pnand %p6764_p5, %p6758_p2 }
 0x739   :  { %v4735_v39 = vpop.f32.mrb[32].mxu1 }
 0x73a   :  { %v4736_v40 = vadd.f32 %v4735_v39, %v2976_v26  ;;  %v4737_v41 = vpop.f32.mrb[33].mxu1 }
 0x73b   :  { %v4738_v42 = vadd.f32 %v4737_v41, %v2980_v38  ;;  %v4739_v43 = vpop.f32.mrb[34].mxu1 }
 0x73c   :  { %v4836_v44 = vmul.f32 0.5, %v4736_v40  ;;  %v4740_v45 = vpop.f32.mrb[35].mxu1 }
 0x73d   :  { %v4837_v46 = vmul.f32 0.5, %v4738_v42 }
 0x73e   :  { %6705 = vtanh.f32 %v4836_v44 }
 0x73f   :  { %6707 = vtanh.f32 %v4837_v46 }
 0x748   :  { %v6706_v47 = vpop.eup %6705 }
 0x749   :  { %v6708_v48 = vpop.eup %6707  ;;  %v4872_v49 = vmul.f32 0.5, %v6706_v47 }
 0x74a   :  { %v4873_v50 = vmul.f32 0.5, %v6708_v48 }
 0x74b   :  { %v4890_v51 = vadd.f32 0.5, %v4872_v49 }
 0x74c   :  { %v4891_v17 = vadd.f32 0.5, %v4873_v50 }
 0x74e   :  { %v5680_v52 = vpack.c.bf16 %v4891_v17, %v4890_v51 }
 0x750   :  { %4974 = vst [vmem:[#allocation2 + $0x30] sm:$0xff] %v5680_v52 }
 0x779   :  { %v4776_v55 = vpop.f32.mrb[36].mxu1 }
 0x77a   :  { %v4777_v56 = vadd.f32 %v4776_v55, %v2984_v19  ;;  %v4778_v57 = vpop.f32.mrb[37].mxu1 }
 0x77b   :  { %v4779_v58 = vadd.f32 %v4778_v57, %v2988_v54  ;;  %v4780_v53 = vpop.f32.mrb[38].mxu1 }
 0x77c   :  { %v4838_v59 = vmul.f32 0.5, %v4777_v56  ;;  %v4781_v60 = vpop.f32.mrb[39].mxu1 }
 0x77d   :  { %v4839_v62 = vmul.f32 0.5, %v4779_v58 }
 0x77e   :  { %6709 = vtanh.f32 %v4838_v59 }
 0x77f   :  { %6711 = vtanh.f32 %v4839_v62 }
 0x788   :  { %v6710_v63 = vpop.eup %6709 }
 0x789   :  { %v6712_v0 = vpop.eup %6711  ;;  %v4874_v1 = vmul.f32 0.5, %v6710_v63 }
 0x78a   :  { %v4875_v2 = vmul.f32 0.5, %v6712_v0 }
 0x78b   :  { %v4892_v3 = vadd.f32 0.5, %v4874_v1 }
 0x78c   :  { %v4893_v29 = vadd.f32 0.5, %v4875_v2 }
 0x78e   :  { %v5681_v10 = vpack.c.bf16 %v4893_v29, %v4892_v3 }
 0x790   :  { %4975 = vst [vmem:[#allocation2 + $0x38] sm:$0xff] %v5681_v10 }
 0x791   :  { %6768 = shalt.err (!%p6765_p6)
}
 0x792   :  { %s6769_s16 = scalar_lea.hbm %s8958_s10, 1152 }
 0x793   :  { %p6770_p7 = scmp.ne.s32.totalorder %s8958_s10, %s6769_s16  ;;  %p6773_p8 = scmp.lt.u32.totalorder %s6769_s16, %s8958_s10 }
 0x795   :  { %p6775_p9 = pnand %p6773_p8, %p6770_p7 }
 0x797   :  { %6778 = shalt.err (!%p6775_p9)
}
 0x798   :  { %4991 = dma.vmem_to_hbm [thread:$0]  %s4989_s13, 1152, %s8958_s10, [#allocation3]  }
 0x799   :  { %6779 = dma.done.wait [#allocation3], 1152  }
 0x79a   :  { %6780 = vsyncadd [#allocation3], 4294966144 }
 0x79b   :  { %6781 = dma.done.wait [#allocation5], 256  }
 0x79c   :  { %6782 = vsyncadd [#allocation5], 4294967040 }
 0x79d   :  { %5021 = vsyncpa [#allocation3], 1 }
 0x79e   :  { %5022 = vsyncpa [#allocation5], 1 }

</bundles_post_ra>
